<compile_context>
chip_gen: v5e
topology: v5e:2x2
jax: 0.10.0
libtpu: 0.0.40
codegen_flags: <defaults>
</compile_context>

<pallas_src>
import functools

import jax
import jax.numpy as jnp
from jax.experimental import pallas as pl
from jax.experimental.pallas import tpu as pltpu


def _im2col_into(p_ref, x_ref, row0, *, k, cin, th, wo):
    """Fill p_ref (TH, Wo, k*k*Cin) with patches for output rows [row0, row0+TH).

    x_ref is the whole zero-padded NHWC image block (1, Hp, Wp, Cin) already in
    VMEM, so the halo rows come for free (no overlapping-block DMA needed).
    """
    for dh in range(k):
        for dw in range(k):
            tap = dh * k + dw
            p_ref[:, :, tap * cin:(tap + 1) * cin] = (
                x_ref[0, pl.ds(row0 + dh, th), pl.ds(dw, wo), :].astype(p_ref.dtype))


def _conv_affine_act_kernel(x_ref, w_ref, scale_ref, shift_ref, o_ref, p_ref, *,
                            k, cin, th, wo, activation):
    """One row stripe: in-VMEM im2col -> single MXU matmul -> y*scale+shift -> act."""
    row0 = pl.multiple_of(pl.program_id(1) * th, th)
    _im2col_into(p_ref, x_ref, row0, k=k, cin=cin, th=th, wo=wo)
    p = p_ref[...].reshape(th * wo, k * k * cin)
    acc = jnp.dot(p, w_ref[...], preferred_element_type=jnp.float32)
    acc = acc * scale_ref[...] + shift_ref[...]          # folded BN or plain bias
    if activation is not None:
        acc = activation(acc)
    o_ref[0] = acc.astype(o_ref.dtype)


def _conv_stats_kernel(x_ref, w_ref, sum_ref, sq_ref, p_ref, *, k, cin, th, wo):
    """One row stripe: conv (bias skipped, it cancels in BN) + partial BN stats only.

    No conv intermediate is written to HBM; pass 2 recomputes the conv instead,
    which is cheaper than writing + re-reading an f32 (rows, Cout) tensor.
    """
    row0 = pl.multiple_of(pl.program_id(1) * th, th)
    _im2col_into(p_ref, x_ref, row0, k=k, cin=cin, th=th, wo=wo)
    p = p_ref[...].reshape(th * wo, k * k * cin)
    acc = jnp.dot(p, w_ref[...], preferred_element_type=jnp.float32)
    # TODO(synk): E[x^2]-E[x]^2 in f32 can cancel when |mean| >> std; switch to a
    # centered/Welford accumulation if this ever feeds large-scale training.
    sum_ref[0] = jnp.sum(acc, axis=0, keepdims=True)
    sq_ref[0] = jnp.sum(acc * acc, axis=0, keepdims=True)


def base_conv_forward(x_nchw, weight, bias, gamma, beta, *, stride=1,
                      use_bn=False, activation=None,
                      compute_dtype=jnp.bfloat16, row_tile=1024):
    """Forward of BaseConv. x_nchw: (N, Cin, H, W); weight: (Cout, Cin, k, k)."""
    # TODO(synk): only stride=1 is implemented in-kernel (the module's default).
    assert stride == 1, "only stride=1 supported by this Pallas kernel"

    N, Cin, H, W = x_nchw.shape
    Cout, _, k, _ = weight.shape
    pad = k // 2
    Hp, Wp = H + 2 * pad, W + 2 * pad
    Ho, Wo = Hp - k + 1, Wp - k + 1
    K = k * k * Cin

    out_dtype = x_nchw.dtype
    cdt = compute_dtype if compute_dtype is not None else x_nchw.dtype

    # ---- layout prep (wrapper glue) -------------------------------------------------
    # TODO(synk): NCHW<->NHWC transposes kept only to preserve the PyTorch interface;
    # drop them if the surrounding model is channels-last.  The spatial zero-pad is a
    # single small HBM pass; folding it into an in-kernel halo with masked patch
    # construction is a follow-up.
    x = jnp.transpose(x_nchw, (0, 2, 3, 1))                        # NHWC
    x = jnp.pad(x, ((0, 0), (pad, pad), (pad, pad), (0, 0)))       # (N, Hp, Wp, Cin)

    # Lane-dense output padding only pays off when the overhead is small: pad Cout to
    # a multiple of 128 only for Cout >= 64, otherwise store at true width.
    CO = ((Cout + 127) // 128) * 128 if Cout >= 64 else Cout

    # Weight as a (k*k*Cin, CO) matmul operand; column order matches the in-kernel
    # patch layout (dh, dw, ci).
    w2d = jnp.transpose(weight, (2, 3, 1, 0)).reshape(K, Cout)
    w2d = jnp.pad(w2d, ((0, 0), (0, CO - Cout))).astype(cdt)

    bias_p = jnp.pad(bias.astype(jnp.float32), (0, CO - Cout))
    gamma_p = jnp.pad(gamma.astype(jnp.float32), (0, CO - Cout))
    beta_p = jnp.pad(beta.astype(jnp.float32), (0, CO - Cout))

    # Row-stripe tiling: TH output rows per grid step; TH | Ho so BN stats stay exact
    # and output blocks tile evenly; TH*Wo kept a multiple of 8 (sublane constraint).
    TH = Ho
    if Ho * Wo > row_tile:
        cands = [t for t in range(1, Ho) if Ho % t == 0
                 and t * Wo <= row_tile and (t * Wo) % 8 == 0]
        if cands:
            TH = max(cands)
    nH = Ho // TH

    # Per-step VMEM budget (double-buffered where pipelined); stay well under the
    # v7x 64 MiB physical VMEM.
    csz = jnp.dtype(cdt).itemsize
    vmem_est = (2 * Hp * Wp * Cin * jnp.dtype(x.dtype).itemsize    # image block
                + 2 * K * CO * csz                                  # weights
                + TH * Wo * K * csz                                 # patch scratch
                + TH * Wo * CO * 4                                  # f32 accumulator
                + 2 * TH * Wo * CO * jnp.dtype(out_dtype).itemsize)
    cparams = pltpu.CompilerParams(
        dimension_semantics=("parallel", "parallel"),
        vmem_limit_bytes=int(min(48 * 2**20, max(32 * 2**20, 2 * vmem_est))))

    # Grid-invariant specs (constant index_map => the block is not re-fetched per step).
    x_spec = pl.BlockSpec((1, Hp, Wp, Cin), lambda n, i: (n, 0, 0, 0))
    w_spec = pl.BlockSpec((K, CO), lambda n, i: (0, 0))
    vec_spec = pl.BlockSpec((1, CO), lambda n, i: (0, 0))
    out_spec = pl.BlockSpec((1, TH * Wo, CO), lambda n, i: (n, i, 0))
    scratch = [pltpu.VMEM((TH, Wo, K), cdt)]
    grid = (N, nH)

    if use_bn:
        # Pass 1: conv + per-stripe partial stats (no bias -- it cancels exactly in
        # the BN mean subtraction).  Only tiny (1, CO) partials go to HBM.
        sums, sqs = pl.pallas_call(
            functools.partial(_conv_stats_kernel, k=k, cin=Cin, th=TH, wo=Wo),
            out_shape=(jax.ShapeDtypeStruct((N * nH, 1, CO), jnp.float32),
                       jax.ShapeDtypeStruct((N * nH, 1, CO), jnp.float32)),
            grid_spec=pltpu.PrefetchScalarGridSpec(
                num_scalar_prefetch=0, grid=grid,
                in_specs=[x_spec, w_spec],
                out_specs=(pl.BlockSpec((1, 1, CO), lambda n, i: (n * nH + i, 0, 0)),
                           pl.BlockSpec((1, 1, CO), lambda n, i: (n * nH + i, 0, 0))),
                scratch_shapes=scratch),
            compiler_params=cparams,
        )(x, w2d)

        # Tiny CO-sized cross-stripe reduction + BN fold in plain JAX.
        count = jnp.float32(N * Ho * Wo)
        mean = jnp.sum(sums, axis=(0, 1)) / count
        var = jnp.sum(sqs, axis=(0, 1)) / count - mean * mean      # biased variance
        inv_std = jax.lax.rsqrt(var + 1e-5)
        scale = (gamma_p * inv_std).reshape(1, CO)
        shift = (beta_p - mean * gamma_p * inv_std).reshape(1, CO)
    else:
        scale = jnp.ones((1, CO), jnp.float32)
        shift = bias_p.reshape(1, CO)

    # Conv + folded affine + activation.  (In the BN path this recomputes the conv
    # from the input, which is cheaper than writing + re-reading an f32 intermediate.)
    out3d = pl.pallas_call(
        functools.partial(_conv_affine_act_kernel, k=k, cin=Cin, th=TH, wo=Wo,
                          activation=activation),
        out_shape=jax.ShapeDtypeStruct((N, Ho * Wo, CO), out_dtype),
        grid_spec=pltpu.PrefetchScalarGridSpec(
            num_scalar_prefetch=0, grid=grid,
            in_specs=[x_spec, w_spec, vec_spec, vec_spec],
            out_specs=out_spec,
            scratch_shapes=scratch),
        compiler_params=cparams,
    )(x, w2d, scale, shift)

    out_nhwc = out3d[:, :, :Cout].reshape(N, Ho, Wo, Cout)
    return jnp.transpose(out_nhwc, (0, 3, 1, 2))                   # back to NCHW


def _reference(x_nchw, weight, bias, gamma, beta, *, use_bn, activation):
    """Pure-JAX reference matching PyTorch Conv2d + BatchNorm2d(train) + act."""
    k = weight.shape[-1]
    pad = k // 2
    y = jax.lax.conv_general_dilated(
        x_nchw, weight, window_strides=(1, 1),
        padding=[(pad, pad), (pad, pad)],
        dimension_numbers=('NCHW', 'OIHW', 'NCHW'))
    y = y + bias[None, :, None, None]
    if use_bn:
        mean = jnp.mean(y, axis=(0, 2, 3), keepdims=True)
        var = jnp.mean((y - mean) ** 2, axis=(0, 2, 3), keepdims=True)
        y = (y - mean) * jax.lax.rsqrt(var + 1e-5)
        y = y * gamma[None, :, None, None] + beta[None, :, None, None]
    if activation is not None:
        y = activation(y)
    return y


if __name__ == "__main__":
    # Module config: BaseConv(in_channels=4, out_channels=8, kernel=3, stride=1,
    #                         activation=relu, use_bn=True)
    in_channels, out_channels, kernel = 4, 8, 3

    key = jax.random.PRNGKey(0)
    kx, kw = jax.random.split(key)

    x = jax.random.normal(kx, (2, in_channels, 16, 16), dtype=jnp.float32)

    # Deterministic parameter init mirroring the module's __init__:
    #   conv.weight ~ N(0, 0.01), conv.bias = 0, bn.weight = 1, bn.bias = 0
    weight = 0.01 * jax.random.normal(
        kw, (out_channels, in_channels, kernel, kernel), dtype=jnp.float32)
    bias = jnp.zeros((out_channels,), jnp.float32)
    gamma = jnp.ones((out_channels,), jnp.float32)
    beta = jnp.zeros((out_channels,), jnp.float32)

    fwd = jax.jit(base_conv_forward,
                  static_argnames=("stride", "use_bn", "activation",
                                   "compute_dtype", "row_tile"))

    ref_bn = _reference(x, weight, bias, gamma, beta,
                        use_bn=True, activation=jax.nn.relu)
    ref_plain = _reference(x, weight, bias, gamma, beta,
                           use_bn=False, activation=None)

    # 1) BN + ReLU, default bf16 MXU operands (f32 accumulate / f32 BN math).
    out1 = jax.block_until_ready(
        fwd(x, weight, bias, gamma, beta, use_bn=True, activation=jax.nn.relu))
    assert out1.shape == ref_bn.shape == (2, out_channels, 16, 16)
    assert jnp.allclose(out1, ref_bn, atol=5e-2, rtol=5e-2), "BN+ReLU bf16 mismatch"

    # 2) BN + ReLU, f32 operands (tight tolerance).
    out2 = jax.block_until_ready(
        fwd(x, weight, bias, gamma, beta, use_bn=True, activation=jax.nn.relu,
            compute_dtype=jnp.float32))
    assert jnp.allclose(out2, ref_bn, atol=1e-3, rtol=1e-3), "BN+ReLU f32 mismatch"

    # 3) plain conv + bias path (use_bn=False, no activation), f32 operands.
    out3 = jax.block_until_ready(
        fwd(x, weight, bias, gamma, beta, use_bn=False, activation=None,
            compute_dtype=jnp.float32))
    assert jnp.allclose(out3, ref_plain, atol=1e-3, rtol=1e-3), "conv-only mismatch"

    print("KERNEL_OK")
</pallas_src>

<mosaic_0001>
module attributes {stable_mosaic.version = 11 : i64} {
  func.func @_conv_stats_kernel(%arg0: i32, %arg1: i32, %arg2: memref<1x18x18x4xf32, #tpu.memory_space<vmem>>, %arg3: memref<36x8xbf16, #tpu.memory_space<vmem>>, %arg4: memref<1x1x8xf32, #tpu.memory_space<vmem>>, %arg5: memref<1x1x8xf32, #tpu.memory_space<vmem>>, %arg6: memref<16x16x36xbf16, #tpu.memory_space<vmem>>) attributes {dimension_semantics = [#tpu.dimension_semantics<parallel>, #tpu.dimension_semantics<parallel>], iteration_bounds = array<i64: 2, 1>, scalar_prefetch = 0 : i64, scratch_operands = 1 : i64, tpu.core_type = #tpu.core_type<tc>, window_params = [{transform_indices = @transform_0, window_bounds = array<i64: 1, 18, 18, 4>}, {pipeline_mode = #tpu.pipeline_mode<synchronous>, transform_indices = @transform_1, window_bounds = array<i64: 36, 8>}, {transform_indices = @transform_2, window_bounds = array<i64: 1, 1, 8>}, {transform_indices = @transform_3, window_bounds = array<i64: 1, 1, 8>}]} {
    %c16_i32 = arith.constant 16 : i32
    %0 = arith.muli %arg1, %c16_i32 : i32
    %1 = tpu.assume_multiple %0, 16 : i32
    %c0_i32 = arith.constant 0 : i32
    %2 = arith.addi %1, %c0_i32 : i32
    %c0 = arith.constant 0 : index
    %3 = arith.index_cast %2 : i32 to index
    %c0_0 = arith.constant 0 : index
    %c0_1 = arith.constant 0 : index
    %4 = vector.load %arg2[%c0, %3, %c0_0, %c0_1] : memref<1x18x18x4xf32, #tpu.memory_space<vmem>>, vector<1x16x16x4xf32>
    %5 = vector.shape_cast %4 : vector<1x16x16x4xf32> to vector<16x16x4xf32>
    %6 = arith.truncf %5 : vector<16x16x4xf32> to vector<16x16x4xbf16>
    %c0_2 = arith.constant 0 : index
    %c0_3 = arith.constant 0 : index
    %c0_4 = arith.constant 0 : index
    %7 = vector.load %arg6[%c0_2, %c0_3, %c0_4] : memref<16x16x36xbf16, #tpu.memory_space<vmem>>, vector<16x16x4xbf16>
    tpu.vector_store %arg6[%c0_2, %c0_3, %c0_4], %6 {strides = array<i32>} : memref<16x16x36xbf16, #tpu.memory_space<vmem>>, vector<16x16x4xbf16>,
    %c0_i32_5 = arith.constant 0 : i32
    %8 = arith.addi %1, %c0_i32_5 : i32
    %c0_6 = arith.constant 0 : index
    %9 = arith.index_cast %8 : i32 to index
    %c1 = arith.constant 1 : index
    %c0_7 = arith.constant 0 : index
    %10 = vector.load %arg2[%c0_6, %9, %c1, %c0_7] : memref<1x18x18x4xf32, #tpu.memory_space<vmem>>, vector<1x16x16x4xf32>
    %11 = vector.shape_cast %10 : vector<1x16x16x4xf32> to vector<16x16x4xf32>
    %12 = arith.truncf %11 : vector<16x16x4xf32> to vector<16x16x4xbf16>
    %c0_8 = arith.constant 0 : index
    %c0_9 = arith.constant 0 : index
    %c4 = arith.constant 4 : index
    %13 = vector.load %arg6[%c0_8, %c0_9, %c4] : memref<16x16x36xbf16, #tpu.memory_space<vmem>>, vector<16x16x4xbf16>
    tpu.vector_store %arg6[%c0_8, %c0_9, %c4], %12 {strides = array<i32>} : memref<16x16x36xbf16, #tpu.memory_space<vmem>>, vector<16x16x4xbf16>,
    %c0_i32_10 = arith.constant 0 : i32
    %14 = arith.addi %1, %c0_i32_10 : i32
    %c0_11 = arith.constant 0 : index
    %15 = arith.index_cast %14 : i32 to index
    %c2 = arith.constant 2 : index
    %c0_12 = arith.constant 0 : index
    %16 = vector.load %arg2[%c0_11, %15, %c2, %c0_12] : memref<1x18x18x4xf32, #tpu.memory_space<vmem>>, vector<1x16x16x4xf32>
    %17 = vector.shape_cast %16 : vector<1x16x16x4xf32> to vector<16x16x4xf32>
    %18 = arith.truncf %17 : vector<16x16x4xf32> to vector<16x16x4xbf16>
    %c0_13 = arith.constant 0 : index
    %c0_14 = arith.constant 0 : index
    %c8 = arith.constant 8 : index
    %19 = vector.load %arg6[%c0_13, %c0_14, %c8] : memref<16x16x36xbf16, #tpu.memory_space<vmem>>, vector<16x16x4xbf16>
    tpu.vector_store %arg6[%c0_13, %c0_14, %c8], %18 {strides = array<i32>} : memref<16x16x36xbf16, #tpu.memory_space<vmem>>, vector<16x16x4xbf16>,
    %c1_i32 = arith.constant 1 : i32
    %20 = arith.addi %1, %c1_i32 : i32
    %c0_15 = arith.constant 0 : index
    %21 = arith.index_cast %20 : i32 to index
    %c0_16 = arith.constant 0 : index
    %c0_17 = arith.constant 0 : index
    %22 = vector.load %arg2[%c0_15, %21, %c0_16, %c0_17] : memref<1x18x18x4xf32, #tpu.memory_space<vmem>>, vector<1x16x16x4xf32>
    %23 = vector.shape_cast %22 : vector<1x16x16x4xf32> to vector<16x16x4xf32>
    %24 = arith.truncf %23 : vector<16x16x4xf32> to vector<16x16x4xbf16>
    %c0_18 = arith.constant 0 : index
    %c0_19 = arith.constant 0 : index
    %c12 = arith.constant 12 : index
    %25 = vector.load %arg6[%c0_18, %c0_19, %c12] : memref<16x16x36xbf16, #tpu.memory_space<vmem>>, vector<16x16x4xbf16>
    tpu.vector_store %arg6[%c0_18, %c0_19, %c12], %24 {strides = array<i32>} : memref<16x16x36xbf16, #tpu.memory_space<vmem>>, vector<16x16x4xbf16>,
    %c1_i32_20 = arith.constant 1 : i32
    %26 = arith.addi %1, %c1_i32_20 : i32
    %c0_21 = arith.constant 0 : index
    %27 = arith.index_cast %26 : i32 to index
    %c1_22 = arith.constant 1 : index
    %c0_23 = arith.constant 0 : index
    %28 = vector.load %arg2[%c0_21, %27, %c1_22, %c0_23] : memref<1x18x18x4xf32, #tpu.memory_space<vmem>>, vector<1x16x16x4xf32>
    %29 = vector.shape_cast %28 : vector<1x16x16x4xf32> to vector<16x16x4xf32>
    %30 = arith.truncf %29 : vector<16x16x4xf32> to vector<16x16x4xbf16>
    %c0_24 = arith.constant 0 : index
    %c0_25 = arith.constant 0 : index
    %c16 = arith.constant 16 : index
    %31 = vector.load %arg6[%c0_24, %c0_25, %c16] : memref<16x16x36xbf16, #tpu.memory_space<vmem>>, vector<16x16x4xbf16>
    tpu.vector_store %arg6[%c0_24, %c0_25, %c16], %30 {strides = array<i32>} : memref<16x16x36xbf16, #tpu.memory_space<vmem>>, vector<16x16x4xbf16>,
    %c1_i32_26 = arith.constant 1 : i32
    %32 = arith.addi %1, %c1_i32_26 : i32
    %c0_27 = arith.constant 0 : index
    %33 = arith.index_cast %32 : i32 to index
    %c2_28 = arith.constant 2 : index
    %c0_29 = arith.constant 0 : index
    %34 = vector.load %arg2[%c0_27, %33, %c2_28, %c0_29] : memref<1x18x18x4xf32, #tpu.memory_space<vmem>>, vector<1x16x16x4xf32>
    %35 = vector.shape_cast %34 : vector<1x16x16x4xf32> to vector<16x16x4xf32>
    %36 = arith.truncf %35 : vector<16x16x4xf32> to vector<16x16x4xbf16>
    %c0_30 = arith.constant 0 : index
    %c0_31 = arith.constant 0 : index
    %c20 = arith.constant 20 : index
    %37 = vector.load %arg6[%c0_30, %c0_31, %c20] : memref<16x16x36xbf16, #tpu.memory_space<vmem>>, vector<16x16x4xbf16>
    tpu.vector_store %arg6[%c0_30, %c0_31, %c20], %36 {strides = array<i32>} : memref<16x16x36xbf16, #tpu.memory_space<vmem>>, vector<16x16x4xbf16>,
    %c2_i32 = arith.constant 2 : i32
    %38 = arith.addi %1, %c2_i32 : i32
    %c0_32 = arith.constant 0 : index
    %39 = arith.index_cast %38 : i32 to index
    %c0_33 = arith.constant 0 : index
    %c0_34 = arith.constant 0 : index
    %40 = vector.load %arg2[%c0_32, %39, %c0_33, %c0_34] : memref<1x18x18x4xf32, #tpu.memory_space<vmem>>, vector<1x16x16x4xf32>
    %41 = vector.shape_cast %40 : vector<1x16x16x4xf32> to vector<16x16x4xf32>
    %42 = arith.truncf %41 : vector<16x16x4xf32> to vector<16x16x4xbf16>
    %c0_35 = arith.constant 0 : index
    %c0_36 = arith.constant 0 : index
    %c24 = arith.constant 24 : index
    %43 = vector.load %arg6[%c0_35, %c0_36, %c24] : memref<16x16x36xbf16, #tpu.memory_space<vmem>>, vector<16x16x4xbf16>
    tpu.vector_store %arg6[%c0_35, %c0_36, %c24], %42 {strides = array<i32>} : memref<16x16x36xbf16, #tpu.memory_space<vmem>>, vector<16x16x4xbf16>,
    %c2_i32_37 = arith.constant 2 : i32
    %44 = arith.addi %1, %c2_i32_37 : i32
    %c0_38 = arith.constant 0 : index
    %45 = arith.index_cast %44 : i32 to index
    %c1_39 = arith.constant 1 : index
    %c0_40 = arith.constant 0 : index
    %46 = vector.load %arg2[%c0_38, %45, %c1_39, %c0_40] : memref<1x18x18x4xf32, #tpu.memory_space<vmem>>, vector<1x16x16x4xf32>
    %47 = vector.shape_cast %46 : vector<1x16x16x4xf32> to vector<16x16x4xf32>
    %48 = arith.truncf %47 : vector<16x16x4xf32> to vector<16x16x4xbf16>
    %c0_41 = arith.constant 0 : index
    %c0_42 = arith.constant 0 : index
    %c28 = arith.constant 28 : index
    %49 = vector.load %arg6[%c0_41, %c0_42, %c28] : memref<16x16x36xbf16, #tpu.memory_space<vmem>>, vector<16x16x4xbf16>
    tpu.vector_store %arg6[%c0_41, %c0_42, %c28], %48 {strides = array<i32>} : memref<16x16x36xbf16, #tpu.memory_space<vmem>>, vector<16x16x4xbf16>,
    %c2_i32_43 = arith.constant 2 : i32
    %50 = arith.addi %1, %c2_i32_43 : i32
    %c0_44 = arith.constant 0 : index
    %51 = arith.index_cast %50 : i32 to index
    %c2_45 = arith.constant 2 : index
    %c0_46 = arith.constant 0 : index
    %52 = vector.load %arg2[%c0_44, %51, %c2_45, %c0_46] : memref<1x18x18x4xf32, #tpu.memory_space<vmem>>, vector<1x16x16x4xf32>
    %53 = vector.shape_cast %52 : vector<1x16x16x4xf32> to vector<16x16x4xf32>
    %54 = arith.truncf %53 : vector<16x16x4xf32> to vector<16x16x4xbf16>
    %c0_47 = arith.constant 0 : index
    %c0_48 = arith.constant 0 : index
    %c32 = arith.constant 32 : index
    %55 = vector.load %arg6[%c0_47, %c0_48, %c32] : memref<16x16x36xbf16, #tpu.memory_space<vmem>>, vector<16x16x4xbf16>
    tpu.vector_store %arg6[%c0_47, %c0_48, %c32], %54 {strides = array<i32>} : memref<16x16x36xbf16, #tpu.memory_space<vmem>>, vector<16x16x4xbf16>,
    %c0_49 = arith.constant 0 : index
    %c0_50 = arith.constant 0 : index
    %c0_51 = arith.constant 0 : index
    %56 = vector.load %arg6[%c0_49, %c0_50, %c0_51] : memref<16x16x36xbf16, #tpu.memory_space<vmem>>, vector<16x16x36xbf16>
    %57 = vector.shape_cast %56 : vector<16x16x36xbf16> to vector<256x36xbf16>
    %c0_52 = arith.constant 0 : index
    %c0_53 = arith.constant 0 : index
    %58 = vector.load %arg3[%c0_52, %c0_53] : memref<36x8xbf16, #tpu.memory_space<vmem>>, vector<36x8xbf16>
    %cst = arith.constant dense<0.000000e+00> : vector<256x8xf32>
    %59 = tpu.matmul %57, %58, %cst {dimension_numbers = #tpu.dot_dimension_numbers<[1], [0], [0], [1], [0, 0, 1, 1], [], []>} : vector<256x36xbf16>, vector<36x8xbf16>, vector<256x8xf32> -> vector<256x8xf32>
    %cst_54 = arith.constant dense<0.000000e+00> : vector<8xf32>
    %60 = vector.multi_reduction <add>, %59, %cst_54 [0] : vector<256x8xf32> to vector<8xf32>
    %61 = vector.shape_cast %60 : vector<8xf32> to vector<1x8xf32>
    %c0_55 = arith.constant 0 : index
    %c0_56 = arith.constant 0 : index
    %c0_57 = arith.constant 0 : index
    %62 = vector.load %arg4[%c0_55, %c0_56, %c0_57] : memref<1x1x8xf32, #tpu.memory_space<vmem>>, vector<1x1x8xf32>
    %63 = vector.shape_cast %62 : vector<1x1x8xf32> to vector<1x8xf32>
    %64 = vector.shape_cast %61 : vector<1x8xf32> to vector<1x1x8xf32>
    tpu.vector_store %arg4[%c0_55, %c0_56, %c0_57], %64 {strides = array<i32>} : memref<1x1x8xf32, #tpu.memory_space<vmem>>, vector<1x1x8xf32>,
    %65 = arith.mulf %59, %59 : vector<256x8xf32>
    %cst_58 = arith.constant dense<0.000000e+00> : vector<8xf32>
    %66 = vector.multi_reduction <add>, %65, %cst_58 [0] : vector<256x8xf32> to vector<8xf32>
    %67 = vector.shape_cast %66 : vector<8xf32> to vector<1x8xf32>
    %c0_59 = arith.constant 0 : index
    %c0_60 = arith.constant 0 : index
    %c0_61 = arith.constant 0 : index
    %68 = vector.load %arg5[%c0_59, %c0_60, %c0_61] : memref<1x1x8xf32, #tpu.memory_space<vmem>>, vector<1x1x8xf32>
    %69 = vector.shape_cast %68 : vector<1x1x8xf32> to vector<1x8xf32>
    %70 = vector.shape_cast %67 : vector<1x8xf32> to vector<1x1x8xf32>
    tpu.vector_store %arg5[%c0_59, %c0_60, %c0_61], %70 {strides = array<i32>} : memref<1x1x8xf32, #tpu.memory_space<vmem>>, vector<1x1x8xf32>,
    return
  }
  func.func @transform_0(%arg0: i32, %arg1: i32) -> (i32, i32, i32, i32) {
    %c0_i32 = arith.constant 0 : i32
    %c0_i32_0 = arith.constant 0 : i32
    %c0_i32_1 = arith.constant 0 : i32
    %c0_i32_2 = arith.constant 0 : i32
    return %arg0, %c0_i32, %c0_i32_0, %c0_i32_1 : i32, i32, i32, i32
  }
  func.func @transform_1(%arg0: i32, %arg1: i32) -> (i32, i32) {
    %c0_i32 = arith.constant 0 : i32
    %c0_i32_0 = arith.constant 0 : i32
    %c0_i32_1 = arith.constant 0 : i32
    return %c0_i32, %c0_i32_0 : i32, i32
  }
  func.func @transform_2(%arg0: i32, %arg1: i32) -> (i32, i32, i32) {
    %c1_i32 = arith.constant 1 : i32
    %0 = arith.muli %arg0, %c1_i32 : i32
    %1 = arith.addi %0, %arg1 : i32
    %c0_i32 = arith.constant 0 : i32
    %c0_i32_0 = arith.constant 0 : i32
    %c0_i32_1 = arith.constant 0 : i32
    return %1, %c0_i32, %c0_i32_0 : i32, i32, i32
  }
  func.func @transform_3(%arg0: i32, %arg1: i32) -> (i32, i32, i32) {
    %c1_i32 = arith.constant 1 : i32
    %0 = arith.muli %arg0, %c1_i32 : i32
    %1 = arith.addi %0, %arg1 : i32
    %c0_i32 = arith.constant 0 : i32
    %c0_i32_0 = arith.constant 0 : i32
    %c0_i32_1 = arith.constant 0 : i32
    return %1, %c0_i32, %c0_i32_0 : i32, i32, i32
  }
}

module attributes {stable_mosaic.version = 11 : i64} {
  func.func @_conv_affine_act_kernel(%arg0: i32, %arg1: i32, %arg2: memref<1x18x18x4xf32, #tpu.memory_space<vmem>>, %arg3: memref<36x8xbf16, #tpu.memory_space<vmem>>, %arg4: memref<1x8xf32, #tpu.memory_space<vmem>>, %arg5: memref<1x8xf32, #tpu.memory_space<vmem>>, %arg6: memref<1x256x8xf32, #tpu.memory_space<vmem>>, %arg7: memref<16x16x36xbf16, #tpu.memory_space<vmem>>) attributes {dimension_semantics = [#tpu.dimension_semantics<parallel>, #tpu.dimension_semantics<parallel>], iteration_bounds = array<i64: 2, 1>, scalar_prefetch = 0 : i64, scratch_operands = 1 : i64, tpu.core_type = #tpu.core_type<tc>, window_params = [{transform_indices = @transform_0, window_bounds = array<i64: 1, 18, 18, 4>}, {pipeline_mode = #tpu.pipeline_mode<synchronous>, transform_indices = @transform_1, window_bounds = array<i64: 36, 8>}, {pipeline_mode = #tpu.pipeline_mode<synchronous>, transform_indices = @transform_2, window_bounds = array<i64: 1, 8>}, {pipeline_mode = #tpu.pipeline_mode<synchronous>, transform_indices = @transform_3, window_bounds = array<i64: 1, 8>}, {transform_indices = @transform_4, window_bounds = array<i64: 1, 256, 8>}]} {
    %c16_i32 = arith.constant 16 : i32
    %0 = arith.muli %arg1, %c16_i32 : i32
    %1 = tpu.assume_multiple %0, 16 : i32
    %c0_i32 = arith.constant 0 : i32
    %2 = arith.addi %1, %c0_i32 : i32
    %c0 = arith.constant 0 : index
    %3 = arith.index_cast %2 : i32 to index
    %c0_0 = arith.constant 0 : index
    %c0_1 = arith.constant 0 : index
    %4 = vector.load %arg2[%c0, %3, %c0_0, %c0_1] : memref<1x18x18x4xf32, #tpu.memory_space<vmem>>, vector<1x16x16x4xf32>
    %5 = vector.shape_cast %4 : vector<1x16x16x4xf32> to vector<16x16x4xf32>
    %6 = arith.truncf %5 : vector<16x16x4xf32> to vector<16x16x4xbf16>
    %c0_2 = arith.constant 0 : index
    %c0_3 = arith.constant 0 : index
    %c0_4 = arith.constant 0 : index
    %7 = vector.load %arg7[%c0_2, %c0_3, %c0_4] : memref<16x16x36xbf16, #tpu.memory_space<vmem>>, vector<16x16x4xbf16>
    tpu.vector_store %arg7[%c0_2, %c0_3, %c0_4], %6 {strides = array<i32>} : memref<16x16x36xbf16, #tpu.memory_space<vmem>>, vector<16x16x4xbf16>,
    %c0_i32_5 = arith.constant 0 : i32
    %8 = arith.addi %1, %c0_i32_5 : i32
    %c0_6 = arith.constant 0 : index
    %9 = arith.index_cast %8 : i32 to index
    %c1 = arith.constant 1 : index
    %c0_7 = arith.constant 0 : index
    %10 = vector.load %arg2[%c0_6, %9, %c1, %c0_7] : memref<1x18x18x4xf32, #tpu.memory_space<vmem>>, vector<1x16x16x4xf32>
    %11 = vector.shape_cast %10 : vector<1x16x16x4xf32> to vector<16x16x4xf32>
    %12 = arith.truncf %11 : vector<16x16x4xf32> to vector<16x16x4xbf16>
    %c0_8 = arith.constant 0 : index
    %c0_9 = arith.constant 0 : index
    %c4 = arith.constant 4 : index
    %13 = vector.load %arg7[%c0_8, %c0_9, %c4] : memref<16x16x36xbf16, #tpu.memory_space<vmem>>, vector<16x16x4xbf16>
    tpu.vector_store %arg7[%c0_8, %c0_9, %c4], %12 {strides = array<i32>} : memref<16x16x36xbf16, #tpu.memory_space<vmem>>, vector<16x16x4xbf16>,
    %c0_i32_10 = arith.constant 0 : i32
    %14 = arith.addi %1, %c0_i32_10 : i32
    %c0_11 = arith.constant 0 : index
    %15 = arith.index_cast %14 : i32 to index
    %c2 = arith.constant 2 : index
    %c0_12 = arith.constant 0 : index
    %16 = vector.load %arg2[%c0_11, %15, %c2, %c0_12] : memref<1x18x18x4xf32, #tpu.memory_space<vmem>>, vector<1x16x16x4xf32>
    %17 = vector.shape_cast %16 : vector<1x16x16x4xf32> to vector<16x16x4xf32>
    %18 = arith.truncf %17 : vector<16x16x4xf32> to vector<16x16x4xbf16>
    %c0_13 = arith.constant 0 : index
    %c0_14 = arith.constant 0 : index
    %c8 = arith.constant 8 : index
    %19 = vector.load %arg7[%c0_13, %c0_14, %c8] : memref<16x16x36xbf16, #tpu.memory_space<vmem>>, vector<16x16x4xbf16>
    tpu.vector_store %arg7[%c0_13, %c0_14, %c8], %18 {strides = array<i32>} : memref<16x16x36xbf16, #tpu.memory_space<vmem>>, vector<16x16x4xbf16>,
    %c1_i32 = arith.constant 1 : i32
    %20 = arith.addi %1, %c1_i32 : i32
    %c0_15 = arith.constant 0 : index
    %21 = arith.index_cast %20 : i32 to index
    %c0_16 = arith.constant 0 : index
    %c0_17 = arith.constant 0 : index
    %22 = vector.load %arg2[%c0_15, %21, %c0_16, %c0_17] : memref<1x18x18x4xf32, #tpu.memory_space<vmem>>, vector<1x16x16x4xf32>
    %23 = vector.shape_cast %22 : vector<1x16x16x4xf32> to vector<16x16x4xf32>
    %24 = arith.truncf %23 : vector<16x16x4xf32> to vector<16x16x4xbf16>
    %c0_18 = arith.constant 0 : index
    %c0_19 = arith.constant 0 : index
    %c12 = arith.constant 12 : index
    %25 = vector.load %arg7[%c0_18, %c0_19, %c12] : memref<16x16x36xbf16, #tpu.memory_space<vmem>>, vector<16x16x4xbf16>
    tpu.vector_store %arg7[%c0_18, %c0_19, %c12], %24 {strides = array<i32>} : memref<16x16x36xbf16, #tpu.memory_space<vmem>>, vector<16x16x4xbf16>,
    %c1_i32_20 = arith.constant 1 : i32
    %26 = arith.addi %1, %c1_i32_20 : i32
    %c0_21 = arith.constant 0 : index
    %27 = arith.index_cast %26 : i32 to index
    %c1_22 = arith.constant 1 : index
    %c0_23 = arith.constant 0 : index
    %28 = vector.load %arg2[%c0_21, %27, %c1_22, %c0_23] : memref<1x18x18x4xf32, #tpu.memory_space<vmem>>, vector<1x16x16x4xf32>
    %29 = vector.shape_cast %28 : vector<1x16x16x4xf32> to vector<16x16x4xf32>
    %30 = arith.truncf %29 : vector<16x16x4xf32> to vector<16x16x4xbf16>
    %c0_24 = arith.constant 0 : index
    %c0_25 = arith.constant 0 : index
    %c16 = arith.constant 16 : index
    %31 = vector.load %arg7[%c0_24, %c0_25, %c16] : memref<16x16x36xbf16, #tpu.memory_space<vmem>>, vector<16x16x4xbf16>
    tpu.vector_store %arg7[%c0_24, %c0_25, %c16], %30 {strides = array<i32>} : memref<16x16x36xbf16, #tpu.memory_space<vmem>>, vector<16x16x4xbf16>,
    %c1_i32_26 = arith.constant 1 : i32
    %32 = arith.addi %1, %c1_i32_26 : i32
    %c0_27 = arith.constant 0 : index
    %33 = arith.index_cast %32 : i32 to index
    %c2_28 = arith.constant 2 : index
    %c0_29 = arith.constant 0 : index
    %34 = vector.load %arg2[%c0_27, %33, %c2_28, %c0_29] : memref<1x18x18x4xf32, #tpu.memory_space<vmem>>, vector<1x16x16x4xf32>
    %35 = vector.shape_cast %34 : vector<1x16x16x4xf32> to vector<16x16x4xf32>
    %36 = arith.truncf %35 : vector<16x16x4xf32> to vector<16x16x4xbf16>
    %c0_30 = arith.constant 0 : index
    %c0_31 = arith.constant 0 : index
    %c20 = arith.constant 20 : index
    %37 = vector.load %arg7[%c0_30, %c0_31, %c20] : memref<16x16x36xbf16, #tpu.memory_space<vmem>>, vector<16x16x4xbf16>
    tpu.vector_store %arg7[%c0_30, %c0_31, %c20], %36 {strides = array<i32>} : memref<16x16x36xbf16, #tpu.memory_space<vmem>>, vector<16x16x4xbf16>,
    %c2_i32 = arith.constant 2 : i32
    %38 = arith.addi %1, %c2_i32 : i32
    %c0_32 = arith.constant 0 : index
    %39 = arith.index_cast %38 : i32 to index
    %c0_33 = arith.constant 0 : index
    %c0_34 = arith.constant 0 : index
    %40 = vector.load %arg2[%c0_32, %39, %c0_33, %c0_34] : memref<1x18x18x4xf32, #tpu.memory_space<vmem>>, vector<1x16x16x4xf32>
    %41 = vector.shape_cast %40 : vector<1x16x16x4xf32> to vector<16x16x4xf32>
    %42 = arith.truncf %41 : vector<16x16x4xf32> to vector<16x16x4xbf16>
    %c0_35 = arith.constant 0 : index
    %c0_36 = arith.constant 0 : index
    %c24 = arith.constant 24 : index
    %43 = vector.load %arg7[%c0_35, %c0_36, %c24] : memref<16x16x36xbf16, #tpu.memory_space<vmem>>, vector<16x16x4xbf16>
    tpu.vector_store %arg7[%c0_35, %c0_36, %c24], %42 {strides = array<i32>} : memref<16x16x36xbf16, #tpu.memory_space<vmem>>, vector<16x16x4xbf16>,
    %c2_i32_37 = arith.constant 2 : i32
    %44 = arith.addi %1, %c2_i32_37 : i32
    %c0_38 = arith.constant 0 : index
    %45 = arith.index_cast %44 : i32 to index
    %c1_39 = arith.constant 1 : index
    %c0_40 = arith.constant 0 : index
    %46 = vector.load %arg2[%c0_38, %45, %c1_39, %c0_40] : memref<1x18x18x4xf32, #tpu.memory_space<vmem>>, vector<1x16x16x4xf32>
    %47 = vector.shape_cast %46 : vector<1x16x16x4xf32> to vector<16x16x4xf32>
    %48 = arith.truncf %47 : vector<16x16x4xf32> to vector<16x16x4xbf16>
    %c0_41 = arith.constant 0 : index
    %c0_42 = arith.constant 0 : index
    %c28 = arith.constant 28 : index
    %49 = vector.load %arg7[%c0_41, %c0_42, %c28] : memref<16x16x36xbf16, #tpu.memory_space<vmem>>, vector<16x16x4xbf16>
    tpu.vector_store %arg7[%c0_41, %c0_42, %c28], %48 {strides = array<i32>} : memref<16x16x36xbf16, #tpu.memory_space<vmem>>, vector<16x16x4xbf16>,
    %c2_i32_43 = arith.constant 2 : i32
    %50 = arith.addi %1, %c2_i32_43 : i32
    %c0_44 = arith.constant 0 : index
    %51 = arith.index_cast %50 : i32 to index
    %c2_45 = arith.constant 2 : index
    %c0_46 = arith.constant 0 : index
    %52 = vector.load %arg2[%c0_44, %51, %c2_45, %c0_46] : memref<1x18x18x4xf32, #tpu.memory_space<vmem>>, vector<1x16x16x4xf32>
    %53 = vector.shape_cast %52 : vector<1x16x16x4xf32> to vector<16x16x4xf32>
    %54 = arith.truncf %53 : vector<16x16x4xf32> to vector<16x16x4xbf16>
    %c0_47 = arith.constant 0 : index
    %c0_48 = arith.constant 0 : index
    %c32 = arith.constant 32 : index
    %55 = vector.load %arg7[%c0_47, %c0_48, %c32] : memref<16x16x36xbf16, #tpu.memory_space<vmem>>, vector<16x16x4xbf16>
    tpu.vector_store %arg7[%c0_47, %c0_48, %c32], %54 {strides = array<i32>} : memref<16x16x36xbf16, #tpu.memory_space<vmem>>, vector<16x16x4xbf16>,
    %c0_49 = arith.constant 0 : index
    %c0_50 = arith.constant 0 : index
    %c0_51 = arith.constant 0 : index
    %56 = vector.load %arg7[%c0_49, %c0_50, %c0_51] : memref<16x16x36xbf16, #tpu.memory_space<vmem>>, vector<16x16x36xbf16>
    %57 = vector.shape_cast %56 : vector<16x16x36xbf16> to vector<256x36xbf16>
    %c0_52 = arith.constant 0 : index
    %c0_53 = arith.constant 0 : index
    %58 = vector.load %arg3[%c0_52, %c0_53] : memref<36x8xbf16, #tpu.memory_space<vmem>>, vector<36x8xbf16>
    %cst = arith.constant dense<0.000000e+00> : vector<256x8xf32>
    %59 = tpu.matmul %57, %58, %cst {dimension_numbers = #tpu.dot_dimension_numbers<[1], [0], [0], [1], [0, 0, 1, 1], [], []>} : vector<256x36xbf16>, vector<36x8xbf16>, vector<256x8xf32> -> vector<256x8xf32>
    %c0_54 = arith.constant 0 : index
    %c0_55 = arith.constant 0 : index
    %60 = vector.load %arg4[%c0_54, %c0_55] : memref<1x8xf32, #tpu.memory_space<vmem>>, vector<1x8xf32>
    %61 = vector.broadcast %60 : vector<1x8xf32> to vector<256x8xf32>
    %62 = arith.mulf %59, %61 : vector<256x8xf32>
    %c0_56 = arith.constant 0 : index
    %c0_57 = arith.constant 0 : index
    %63 = vector.load %arg5[%c0_56, %c0_57] : memref<1x8xf32, #tpu.memory_space<vmem>>, vector<1x8xf32>
    %64 = vector.broadcast %63 : vector<1x8xf32> to vector<256x8xf32>
    %65 = arith.addf %62, %64 : vector<256x8xf32>
    %cst_58 = arith.constant 0.000000e+00 : f32
    %66 = vector.broadcast %cst_58 : f32 to vector<256x8xf32>
    %67 = arith.maximumf %65, %66 : vector<256x8xf32>
    %c0_59 = arith.constant 0 : index
    %c0_60 = arith.constant 0 : index
    %c0_61 = arith.constant 0 : index
    %68 = vector.load %arg6[%c0_59, %c0_60, %c0_61] : memref<1x256x8xf32, #tpu.memory_space<vmem>>, vector<1x256x8xf32>
    %69 = vector.shape_cast %68 : vector<1x256x8xf32> to vector<256x8xf32>
    %70 = vector.shape_cast %67 : vector<256x8xf32> to vector<1x256x8xf32>
    tpu.vector_store %arg6[%c0_59, %c0_60, %c0_61], %70 {strides = array<i32>} : memref<1x256x8xf32, #tpu.memory_space<vmem>>, vector<1x256x8xf32>,
    return
  }
  func.func @transform_0(%arg0: i32, %arg1: i32) -> (i32, i32, i32, i32) {
    %c0_i32 = arith.constant 0 : i32
    %c0_i32_0 = arith.constant 0 : i32
    %c0_i32_1 = arith.constant 0 : i32
    %c0_i32_2 = arith.constant 0 : i32
    return %arg0, %c0_i32, %c0_i32_0, %c0_i32_1 : i32, i32, i32, i32
  }
  func.func @transform_1(%arg0: i32, %arg1: i32) -> (i32, i32) {
    %c0_i32 = arith.constant 0 : i32
    %c0_i32_0 = arith.constant 0 : i32
    %c0_i32_1 = arith.constant 0 : i32
    return %c0_i32, %c0_i32_0 : i32, i32
  }
  func.func @transform_2(%arg0: i32, %arg1: i32) -> (i32, i32) {
    %c0_i32 = arith.constant 0 : i32
    %c0_i32_0 = arith.constant 0 : i32
    %c0_i32_1 = arith.constant 0 : i32
    return %c0_i32, %c0_i32_0 : i32, i32
  }
  func.func @transform_3(%arg0: i32, %arg1: i32) -> (i32, i32) {
    %c0_i32 = arith.constant 0 : i32
    %c0_i32_0 = arith.constant 0 : i32
    %c0_i32_1 = arith.constant 0 : i32
    return %c0_i32, %c0_i32_0 : i32, i32
  }
  func.func @transform_4(%arg0: i32, %arg1: i32) -> (i32, i32, i32) {
    %c0_i32 = arith.constant 0 : i32
    %c0_i32_0 = arith.constant 0 : i32
    return %arg0, %arg1, %c0_i32 : i32, i32, i32
  }
}

</mosaic_0001>

<bundles_post_ra>
// kernel: base_conv_forward.2
= control target key start
LH: loop header
LB: loop body
LE: loop exit
PB: predicated region body
PF: predicated region fallthrough
CT: control target
= control target key end

     0   :  { %s3050_s12 = smov 0   ;;  %s3052_s13 = smov 0   ;;  %s4255_s0 = inlined_call_operand.vmem [shape: f32[2,18,18,4], index: 0, kind: input, shape index: {}]   ;;  %s4256_s1 = inlined_call_operand.vmem [shape: bf16[36,8], index: 1, kind: input, shape index: {}]   ;;  %s4257_s2 = inlined_call_operand.vmem [shape: f32[2,1,8], index: 2, kind: output, shape index: {0}]   ;;  %s4258_s3 = inlined_call_operand.vmem [shape: f32[2,1,8], index: 3, kind: output, shape index: {1}]  }
   0x1   :  { %s3054_s14 = smov 0  }
   0x2 LB: > { %s26_s15 = sadd.s32 1, %s3016_s13  ;;  %p2654_p0 = scmp.ge.s32.totalorder %s3020_s14, 1  ;;  %s3020_s14 = sphi %s3054_s14, %s14_s14   ;;  %s3016_s13 = sphi %s3052_s13, %s4260_s13   ;;  %s3012_s12 = sphi %s3050_s12, %s4259_s12  }
   0x3   : > { %p28_p1 = scmp.ge.s32.totalorder %s26_s15, 2  ;;  %p156_p2 = scmp.lt.s32.totalorder %s3020_s14, 3 }
   0x5   : > { %s4262_s15 = smov (%p28_p1, %s26_s15), 0  ;;  %p157_p3 = pnand %p2654_p0, %p156_p2 }
   0x6   : > { %p183_p4 = scmp.lt.s32.totalorder (!%p157_p3), %s3012_s12, 1  ;;  %s3022_s20 = smov (!%p157_p3), 4  }
   0x7   : > { %160 = sbr.rel (%p157_p3) target bundleno = 980 (0x3d4), region = 28  ;;  %s3023_s21 = smov (!%p157_p3), 8  }
   0x8   : > { %s3024_s22 = smov (!%p157_p3), 12   ;;  %s3025_s23 = smov (!%p157_p3), 16  }
   0x9   : > { %s3026_s24 = smov (!%p157_p3), 20   ;;  %s3027_s25 = smov (!%p157_p3), 24  }
   0xa   : > { %s3028_s26 = smov (!%p157_p3), 28   ;;  %s3029_s27 = smov (!%p157_p3), 32  }
   0xc   : > { %s4264_s12 = smov (!%p183_p4, %s3012_s12), 1  ;;  %vm266_vm0 = vcmask 27648   ;;  %vm491_vm1 = vcmask 60448   ;;  %vm716_vm2 = vcmask 93248   ;;  %vm944_vm3 = vcmask 126048  }
   0xd   : > { %s2965_s16 = smul.u32 432, %s4264_s12  ;;  %vm1169_vm4 = vcmask 158848   ;;  %vm1394_vm5 = vcmask 191648   ;;  %vm1622_vm6 = vcmask 224448   ;;  %vm2286_vm7 = vcmask 1041408   ;;  %s191_s9 = scalar_lea.vmem %s4257_s2, %s4264_s12 }
   0xe   : > { %vm1847_vm8 = vcmask 257248   ;;  %vm2072_vm9 = vcmask 290048   ;;  %vm2237_vm10 = vcmask 293888   ;;  %vm2379_vm11 = vcmask 64512  }
   0xf   : > { %s3074_s19 = scalar_lea.vmem %s4255_s0, %s2965_s16  ;;  %vm2449_vm12 = vcmask 57344   ;;  %s196_s16 = scalar_lea.vmem %s4258_s3, %s4264_s12 }
  0x10   : > { %v301_v0 = vld [vmem:[%s3074_s19 + $0x19] sm:$0xff]  ;;  %v299_v1 = vld [vmem:[%s3074_s19 + $0x1] sm:$0xff]  ;;  %v303_v4 = vld [vmem:[%s3074_s19 + $0x31] sm:$0xff] }
  0x11   : > { %v3078_v2 = vpack.c.bf16 %v301_v0, %v301_v0  ;;  %v331_v3 = vpack.c.bf16 %v299_v1, %v299_v1  ;;  %v335_v5 = vpack.c.bf16 %v303_v4, %v303_v4  ;;  %v302_v6 = vld [vmem:[%s3074_s19 + $0x21] sm:$0xff]  ;;  %v300_v7 = vld [vmem:[%s3074_s19 + $0x9] sm:$0xff]  ;;  %v304_v8 = vld [vmem:[%s3074_s19 + $0x39] sm:$0xff] }
  0x12   : > { %v3088_v9 = vpack.c.bf16 %v302_v6, %v302_v6  ;;  %v332_v10 = vpack.c.bf16 %v300_v7, %v300_v7  ;;  %v3090_v11 = vpack.c.bf16 %v304_v8, %v304_v8  ;;  %v306_v12 = vld [vmem:[%s3074_s19 + $0x51] sm:$0xff]  ;;  %v305_v13 = vld [vmem:[%s3074_s19 + $0x49] sm:$0xff]  ;;  %v307_v14 = vld [vmem:[%s3074_s19 + $0x61] sm:$0xff] }
  0x13   : > { %399 = vrot.lane.b32.xlu1 %v3078_v2, %s3022_s20  ;;  %395 = vrot.lane.b32.xlu0 %v331_v3, %s3022_s20  ;;  %v338_v15 = vpack.c.bf16 %v306_v12, %v306_v12  ;;  %v3100_v16 = vpack.c.bf16 %v305_v13, %v305_v13  ;;  %v3102_v17 = vpack.c.bf16 %v307_v14, %v307_v14  ;;  %v309_v18 = vld [vmem:[%s3074_s19 + $0x79] sm:$0xff]  ;;  %v308_v19 = vld [vmem:[%s3074_s19 + $0x69] sm:$0xff] }
  0x14   : > { %403 = vrot.lane.b32.xlu2 %v335_v5, %s3022_s20  ;;  %v310_v20 = vld [vmem:[%s3074_s19 + $0x81] sm:$0xff]  ;;  %v341_v21 = vpack.c.bf16 %v309_v18, %v309_v18  ;;  %v3112_v22 = vpack.c.bf16 %v308_v19, %v308_v19  ;;  %v312_v24 = vld [vmem:[%s3074_s19 + $0x99] sm:$0xff]  ;;  %v311_v25 = vld [vmem:[%s3074_s19 + $0x91] sm:$0xff] }
  0x15   : > { %v3114_v23 = vpack.c.bf16 %v310_v20, %v310_v20  ;;  %v313_v26 = vld [vmem:[%s3074_s19 + $0xa9] sm:$0xff]  ;;  %v344_v27 = vpack.c.bf16 %v312_v24, %v312_v24  ;;  %v3124_v28 = vpack.c.bf16 %v311_v25, %v311_v25  ;;  %v315_v30 = vld [vmem:[%s3074_s19 + $0xc1] sm:$0xff]  ;;  %v314_v31 = vld [vmem:[%s3074_s19 + $0xb1] sm:$0xff] }
  0x16   : > { %v3126_v29 = vpack.c.bf16 %v313_v26, %v313_v26  ;;  %v316_v32 = vld [vmem:[%s3074_s19 + $0xc9] sm:$0xff]  ;;  %v347_v33 = vpack.c.bf16 %v315_v30, %v315_v30  ;;  %v3136_v34 = vpack.c.bf16 %v314_v31, %v314_v31  ;;  %v318_v36 = vld [vmem:[%s3074_s19 + $0xe1] sm:$0xff]  ;;  %v317_v37 = vld [vmem:[%s3074_s19 + $0xd9] sm:$0xff] }
  0x17   : > { %v3138_v35 = vpack.c.bf16 %v316_v32, %v316_v32  ;;  %v319_v38 = vld [vmem:[%s3074_s19 + $0xf1] sm:$0xff]  ;;  %v350_v39 = vpack.c.bf16 %v318_v36, %v318_v36  ;;  %v349_v40 = vpack.c.bf16 %v317_v37, %v317_v37  ;;  %v321_v42 = vld [vmem:[%s3074_s19 + $0x109] sm:$0xff]  ;;  %v320_v43 = vld [vmem:[%s3074_s19 + $0xf9] sm:$0xff] }
  0x18   : > { %v351_v41 = vpack.c.bf16 %v319_v38, %v319_v38  ;;  %v322_v44 = vld [vmem:[%s3074_s19 + $0x111] sm:$0xff]  ;;  %v353_v45 = vpack.c.bf16 %v321_v42, %v321_v42  ;;  %v352_v46 = vpack.c.bf16 %v320_v43, %v320_v43  ;;  %v324_v48 = vld [vmem:[%s3074_s19 + $0x129] sm:$0xff]  ;;  %v323_v49 = vld [vmem:[%s3074_s19 + $0x121] sm:$0xff] }
  0x19   : > { %v354_v47 = vpack.c.bf16 %v322_v44, %v322_v44  ;;  %v325_v50 = vld [vmem:[%s3074_s19 + $0x139] sm:$0xff]  ;;  %v356_v51 = vpack.c.bf16 %v324_v48, %v324_v48  ;;  %v355_v52 = vpack.c.bf16 %v323_v49, %v323_v49  ;;  %v327_v54 = vld [vmem:[%s3074_s19 + $0x151] sm:$0xff]  ;;  %v326_v55 = vld [vmem:[%s3074_s19 + $0x141] sm:$0xff] }
  0x1a   : > { %v357_v53 = vpack.c.bf16 %v325_v50, %v325_v50  ;;  %v328_v56 = vld [vmem:[%s3074_s19 + $0x159] sm:$0xff]  ;;  %v359_v57 = vpack.c.bf16 %v327_v54, %v327_v54  ;;  %v358_v58 = vpack.c.bf16 %v326_v55, %v326_v55  ;;  %v330_v60 = vld [vmem:[%s3074_s19 + $0x171] sm:$0xff]  ;;  %v329_v61 = vld [vmem:[%s3074_s19 + $0x169] sm:$0xff] }
  0x1b   : > { %401 = vrot.lane.b32.xlu1 %v3088_v9, %s3022_s20  ;;  %397 = vrot.lane.b32.xlu0 %v332_v10, %s3022_s20  ;;  %v360_v59 = vpack.c.bf16 %v328_v56, %v328_v56  ;;  %v524_v62 = vld [vmem:[%s3074_s19 + $0x2] sm:$0xff]  ;;  %v362_v63 = vpack.c.bf16 %v330_v60, %v330_v60  ;;  %v361_v0 = vpack.c.bf16 %v329_v61, %v329_v61  ;;  %v206_v4 = vld [vmem:[%s3074_s19 + $0x30] sm:$0xff] }
  0x1c   : > { %405 = vrot.lane.b32.xlu2 %v3090_v11, %s3022_s20  ;;  %v556_v1 = vpack.c.bf16 %v524_v62, %v524_v62  ;;  %v202_v3 = vld [vmem:[%s3074_s19] sm:$0xff]  ;;  %v525_v7 = vld [vmem:[%s3074_s19 + $0xa] sm:$0xff]  ;;  %v3178_v8 = vpack.c.bf16 %v206_v4, %v206_v4  ;;  %v204_v10 = vld [vmem:[%s3074_s19 + $0x18] sm:$0xff] }
  0x1d   : > { %v234_v5 = vpack.c.bf16 %v202_v3, %v202_v3  ;;  %v526_v6 = vld [vmem:[%s3074_s19 + $0x1a] sm:$0xff]  ;;  %v527_v12 = vld [vmem:[%s3074_s19 + $0x22] sm:$0xff]  ;;  %v3186_v13 = vpack.c.bf16 %v204_v10, %v204_v10  ;;  %v528_v24 = vld [vmem:[%s3074_s19 + $0x32] sm:$0xff] }
  0x1e   : > { %271 = vst.msk [vmem:[#allocation2 + $0x10] sm:$0xf] %vm266_vm0, %v3178_v8  ;;  %v558_v14 = vpack.c.bf16 %v526_v6, %v526_v6  ;;  %v559_v18 = vpack.c.bf16 %v527_v12, %v527_v12  ;;  %v207_v19 = vld [vmem:[%s3074_s19 + $0x38] sm:$0xff]  ;;  %v203_v20 = vld [vmem:[%s3074_s19 + $0x8] sm:$0xff]  ;;  %v210_v38 = vld [vmem:[%s3074_s19 + $0x60] sm:$0xff] }
  0x1f   : > { %267 = vst.msk [vmem:[#allocation2] sm:$0xf] %vm266_vm0, %v234_v5  ;;  %v3196_v25 = vpack.c.bf16 %v207_v19, %v207_v19  ;;  %v235_v26 = vpack.c.bf16 %v203_v20, %v203_v20  ;;  %v530_v30 = vld [vmem:[%s3074_s19 + $0x4a] sm:$0xff]  ;;  %v3215_v42 = vpack.c.bf16 %v210_v38, %v210_v38  ;;  %v534_v54 = vld [vmem:[%s3074_s19 + $0x7a] sm:$0xff]  ;;  %v539_v12 = vld [vmem:[%s3074_s19 + $0xb2] sm:$0xff] }
  0x20   : > { %269 = vst.msk [vmem:[#allocation2 + $0x8] sm:$0xf] %vm266_vm0, %v3186_v13  ;;  %v562_v37 = vpack.c.bf16 %v530_v30, %v530_v30  ;;  %v209_v44 = vld [vmem:[%s3074_s19 + $0x50] sm:$0xff]  ;;  %v566_v61 = vpack.c.bf16 %v534_v54, %v534_v54  ;;  %v537_v3 = vld [vmem:[%s3074_s19 + $0x9a] sm:$0xff] }
  0x21   : > { %272 = vst.msk [vmem:[#allocation2 + $0x14] sm:$0xf] %vm266_vm0, %v3196_v25  ;;  %v214_v4 = vld [vmem:[%s3074_s19 + $0x90] sm:$0xff]  ;;  %v215_v10 = vld [vmem:[%s3074_s19 + $0x98] sm:$0xff] }
  0x22   : > { %268 = vst.msk [vmem:[#allocation2 + $0x4] sm:$0xf] %vm266_vm0, %v235_v26  ;;  %v3268_v20 = vpack.c.bf16 %v214_v4, %v214_v4  ;;  %v541_v26 = vld [vmem:[%s3074_s19 + $0xca] sm:$0xff]  ;;  %v542_v38 = vld [vmem:[%s3074_s19 + $0xda] sm:$0xff]  ;;  %v547_v4 = vld [vmem:[%s3074_s19 + $0x112] sm:$0xff] }
  0x23   : > { %409 = vrot.lane.b32.xlu1 %v338_v15, %s3022_s20  ;;  %407 = vrot.lane.b32.xlu0 %v3100_v16, %s3022_s20  ;;  %v557_v15 = vpack.c.bf16 %v525_v7, %v525_v7  ;;  %275 = vst.msk [vmem:[#allocation2 + $0x20] sm:$0xf] %vm266_vm0, %v3215_v42  ;;  %v217_v30 = vld [vmem:[%s3074_s19 + $0xb0] sm:$0xff] }
  0x24   : > { %411 = vrot.lane.b32.xlu2 %v3102_v17, %s3022_s20  ;;  %279 = vst.msk [vmem:[#allocation2 + $0x30] sm:$0xf] %vm266_vm0, %v3268_v20 }
  0x2b   : > { %415 = vrot.lane.b32.xlu1 %v341_v21, %s3022_s20  ;;  %413 = vrot.lane.b32.xlu0 %v3112_v22, %s3022_s20  ;;  %v529_v21 = vld [vmem:[%s3074_s19 + $0x3a] sm:$0xff] }
  0x2c   : > { %417 = vrot.lane.b32.xlu2 %v3114_v23, %s3022_s20  ;;  %v561_v32 = vpack.c.bf16 %v529_v21, %v529_v21  ;;  %v3271_v21 = vpack.c.bf16 %v539_v12, %v539_v12 }
  0x33   : > { %421 = vrot.lane.b32.xlu1 %v344_v27, %s3022_s20  ;;  %419 = vrot.lane.b32.xlu0 %v3124_v28, %s3022_s20  ;;  %v205_v27 = vld [vmem:[%s3074_s19 + $0x20] sm:$0xff] }
  0x34   : > { %423 = vrot.lane.b32.xlu2 %v3126_v29, %s3022_s20  ;;  %v3203_v31 = vpack.c.bf16 %v205_v27, %v205_v27  ;;  %v540_v27 = vld [vmem:[%s3074_s19 + $0xc2] sm:$0xff] }
  0x36   : > { %270 = vst.msk [vmem:[#allocation2 + $0xc] sm:$0xf] %vm266_vm0, %v3203_v31 }
  0x3b   : > { %427 = vrot.lane.b32.xlu1 %v347_v33, %s3022_s20  ;;  %425 = vrot.lane.b32.xlu0 %v3136_v34, %s3022_s20  ;;  %v560_v33 = vpack.c.bf16 %v528_v24, %v528_v24  ;;  %v219_v24 = vld [vmem:[%s3074_s19 + $0xc8] sm:$0xff] }
  0x3c   : > { %429 = vrot.lane.b32.xlu2 %v3138_v35, %s3022_s20 }
  0x43   : > { %433 = vrot.lane.b32.xlu1 %v350_v39, %s3022_s20  ;;  %431 = vrot.lane.b32.xlu0 %v349_v40, %s3022_s20  ;;  %v208_v39 = vld [vmem:[%s3074_s19 + $0x48] sm:$0xff] }
  0x44   : > { %435 = vrot.lane.b32.xlu2 %v351_v41, %s3022_s20  ;;  %v532_v40 = vld [vmem:[%s3074_s19 + $0x62] sm:$0xff]  ;;  %v531_v41 = vld [vmem:[%s3074_s19 + $0x52] sm:$0xff]  ;;  %v3217_v43 = vpack.c.bf16 %v208_v39, %v208_v39 }
  0x45   : > { %v563_v48 = vpack.c.bf16 %v531_v41, %v531_v41  ;;  %v572_v41 = vpack.c.bf16 %v540_v27, %v540_v27 }
  0x46   : > { %273 = vst.msk [vmem:[#allocation2 + $0x18] sm:$0xf] %vm266_vm0, %v3217_v43 }
  0x4b   : > { %439 = vrot.lane.b32.xlu1 %v353_v45, %s3022_s20  ;;  %437 = vrot.lane.b32.xlu0 %v352_v46, %s3022_s20  ;;  %v533_v45 = vld [vmem:[%s3074_s19 + $0x6a] sm:$0xff]  ;;  %v3224_v46 = vpack.c.bf16 %v209_v44, %v209_v44 }
  0x4c   : > { %441 = vrot.lane.b32.xlu2 %v354_v47, %s3022_s20  ;;  %v564_v47 = vpack.c.bf16 %v532_v40, %v532_v40  ;;  %v565_v50 = vpack.c.bf16 %v533_v45, %v533_v45  ;;  %v573_v40 = vpack.c.bf16 %v541_v26, %v541_v26  ;;  %v3295_v45 = vpack.c.bf16 %v217_v30, %v217_v30 }
  0x4d   : > { %274 = vst.msk [vmem:[#allocation2 + $0x1c] sm:$0xf] %vm266_vm0, %v3224_v46  ;;  %v579_v26 = vpack.c.bf16 %v547_v4, %v547_v4  ;;  %v552_v4 = vld [vmem:[%s3074_s19 + $0x152] sm:$0xff] }
  0x4e   : > { %282 = vst.msk [vmem:[#allocation2 + $0x3c] sm:$0xf] %vm266_vm0, %v3295_v45 }
  0x53   : > { %445 = vrot.lane.b32.xlu1 %v356_v51, %s3022_s20  ;;  %443 = vrot.lane.b32.xlu0 %v355_v52, %s3022_s20  ;;  %v213_v51 = vld [vmem:[%s3074_s19 + $0x80] sm:$0xff]  ;;  %v211_v52 = vld [vmem:[%s3074_s19 + $0x68] sm:$0xff] }
  0x54   : > { %447 = vrot.lane.b32.xlu2 %v357_v53, %s3022_s20  ;;  %v535_v53 = vld [vmem:[%s3074_s19 + $0x82] sm:$0xff]  ;;  %v3237_v55 = vpack.c.bf16 %v213_v51, %v213_v51  ;;  %v3239_v56 = vpack.c.bf16 %v211_v52, %v211_v52  ;;  %v220_v51 = vld [vmem:[%s3074_s19 + $0xd8] sm:$0xff] }
  0x55   : > { %v567_v60 = vpack.c.bf16 %v535_v53, %v535_v53 }
  0x56   : > { %278 = vst.msk [vmem:[#allocation2 + $0x2c] sm:$0xf] %vm266_vm0, %v3237_v55 }
  0x57   : > { %276 = vst.msk [vmem:[#allocation2 + $0x24] sm:$0xf] %vm266_vm0, %v3239_v56 }
  0x5b   : > { %451 = vrot.lane.b32.xlu1 %v359_v57, %s3022_s20  ;;  %449 = vrot.lane.b32.xlu0 %v358_v58, %s3022_s20  ;;  %v212_v57 = vld [vmem:[%s3074_s19 + $0x78] sm:$0xff] }
  0x5c   : > { %453 = vrot.lane.b32.xlu2 %v360_v59, %s3022_s20  ;;  %v536_v58 = vld [vmem:[%s3074_s19 + $0x92] sm:$0xff]  ;;  %v3246_v59 = vpack.c.bf16 %v212_v57, %v212_v57  ;;  %v221_v57 = vld [vmem:[%s3074_s19 + $0xe0] sm:$0xff] }
  0x5e   : > { %277 = vst.msk [vmem:[#allocation2 + $0x28] sm:$0xf] %vm266_vm0, %v3246_v59 }
  0x63   : > { %457 = vrot.lane.b32.xlu1 %v362_v63, %s3022_s20  ;;  %455 = vrot.lane.b32.xlu0 %v361_v0, %s3022_s20  ;;  %v568_v63 = vpack.c.bf16 %v536_v58, %v536_v58  ;;  %v216_v0 = vld [vmem:[%s3074_s19 + $0xa8] sm:$0xff]  ;;  %v545_v58 = vld [vmem:[%s3074_s19 + $0xfa] sm:$0xff] }
  0x64   : > { %620 = vrot.lane.b32.xlu2 %v556_v1, %s3023_s21  ;;  %v538_v1 = vld [vmem:[%s3074_s19 + $0xaa] sm:$0xff]  ;;  %v3260_v7 = vpack.c.bf16 %v216_v0, %v216_v0  ;;  %v3322_v0 = vpack.c.bf16 %v220_v51, %v220_v51  ;;  %v551_v51 = vld [vmem:[%s3074_s19 + $0x142] sm:$0xff] }
  0x66   : > { %281 = vst.msk [vmem:[#allocation2 + $0x38] sm:$0xf] %vm266_vm0, %v3260_v7 }
  0x67   : > { %285 = vst.msk [vmem:[#allocation2 + $0x48] sm:$0xf] %vm266_vm0, %v3322_v0 }
  0x6b   : > { %624 = vrot.lane.b32.xlu1 %v558_v14, %s3023_s21  ;;  %622 = vrot.lane.b32.xlu0 %v557_v15, %s3023_s21  ;;  %v3265_v14 = vpack.c.bf16 %v215_v10, %v215_v10  ;;  %v570_v15 = vpack.c.bf16 %v538_v1, %v538_v1  ;;  %v3325_v1 = vpack.c.bf16 %v545_v58, %v545_v58 }
  0x6c   : > { %626 = vrot.lane.b32.xlu2 %v559_v18, %s3023_s21  ;;  %v569_v18 = vpack.c.bf16 %v537_v3, %v537_v3  ;;  %v225_v3 = vld [vmem:[%s3074_s19 + $0x110] sm:$0xff] }
  0x6d   : > { %280 = vst.msk [vmem:[#allocation2 + $0x34] sm:$0xf] %vm266_vm0, %v3265_v14 }
  0x6e   : > { %v404_v36 = vpop.permute.xlu2 %403 }
  0x6f   : > { %496 = vst.msk [vmem:[#allocation2 + $0x10] sm:$0xf] %vm491_vm1, %v404_v36  ;;  %v3287_v36 = vpack.c.bf16 %v219_v24, %v219_v24 }
  0x71   : > { %284 = vst.msk [vmem:[#allocation2 + $0x44] sm:$0xf] %vm266_vm0, %v3287_v36 }
  0x73   : > { %630 = vrot.lane.b32.xlu1 %v561_v32, %s3023_s21  ;;  %628 = vrot.lane.b32.xlu0 %v560_v33, %s3023_s21 }
  0x74   : > { %632 = vrot.lane.b32.xlu2 %v562_v37, %s3023_s21  ;;  %v218_v37 = vld [vmem:[%s3074_s19 + $0xc0] sm:$0xff] }
  0x75   : > { %v3292_v39 = vpack.c.bf16 %v218_v37, %v218_v37  ;;  %v228_v37 = vld [vmem:[%s3074_s19 + $0x138] sm:$0xff] }
  0x76   : > { %v406_v49 = vpop.permute.xlu2 %405 }
  0x77   : > { %497 = vst.msk [vmem:[#allocation2 + $0x14] sm:$0xf] %vm491_vm1, %v406_v49  ;;  %v544_v49 = vld [vmem:[%s3074_s19 + $0xf2] sm:$0xff] }
  0x78   : > { %283 = vst.msk [vmem:[#allocation2 + $0x40] sm:$0xf] %vm266_vm0, %v3292_v39 }
  0x7b   : > { %636 = vrot.lane.b32.xlu1 %v564_v47, %s3023_s21  ;;  %634 = vrot.lane.b32.xlu0 %v563_v48, %s3023_s21  ;;  %v3298_v47 = vpack.c.bf16 %v542_v38, %v542_v38  ;;  %v222_v48 = vld [vmem:[%s3074_s19 + $0xf0] sm:$0xff]  ;;  %v550_v38 = vld [vmem:[%s3074_s19 + $0x13a] sm:$0xff] }
  0x7c   : > { %638 = vrot.lane.b32.xlu2 %v565_v50, %s3023_s21  ;;  %v543_v50 = vld [vmem:[%s3074_s19 + $0xe2] sm:$0xff]  ;;  %v3314_v54 = vpack.c.bf16 %v222_v48, %v222_v48 }
  0x7e   : > { %v412_v62 = vpop.permute.xlu2 %411  ;;  %287 = vst.msk [vmem:[#allocation2 + $0x50] sm:$0xf] %vm266_vm0, %v3314_v54 }
  0x7f   : > { %500 = vst.msk [vmem:[#allocation2 + $0x20] sm:$0xf] %vm491_vm1, %v412_v62  ;;  %v575_v62 = vpack.c.bf16 %v543_v50, %v543_v50  ;;  %v227_v50 = vld [vmem:[%s3074_s19 + $0x128] sm:$0xff] }
  0x83   : > { %642 = vrot.lane.b32.xlu1 %v567_v60, %s3023_s21  ;;  %640 = vrot.lane.b32.xlu0 %v566_v61, %s3023_s21  ;;  %v3319_v60 = vpack.c.bf16 %v221_v57, %v221_v57  ;;  %v576_v61 = vpack.c.bf16 %v544_v49, %v544_v49  ;;  %v3368_v49 = vpack.c.bf16 %v228_v37, %v228_v37 }
  0x84   : > { %644 = vrot.lane.b32.xlu2 %v568_v63, %s3023_s21 }
  0x85   : > { %v400_v5 = vpop.permute.xlu1 %399  ;;  %v396_v6 = vpop.permute.xlu0 %395  ;;  %286 = vst.msk [vmem:[#allocation2 + $0x4c] sm:$0xf] %vm266_vm0, %v3319_v60 }
  0x86   : > { %494 = vst.msk [vmem:[#allocation2 + $0x8] sm:$0xf] %vm491_vm1, %v400_v5  ;;  %v418_v19 = vpop.permute.xlu2 %417  ;;  %v546_v5 = vld [vmem:[%s3074_s19 + $0x10a] sm:$0xff] }
  0x87   : > { %492 = vst.msk [vmem:[#allocation2] sm:$0xf] %vm491_vm1, %v396_v6  ;;  %v223_v6 = vld [vmem:[%s3074_s19 + $0xf8] sm:$0xff]  ;;  %v578_v27 = vpack.c.bf16 %v546_v5, %v546_v5  ;;  %v229_v5 = vld [vmem:[%s3074_s19 + $0x140] sm:$0xff] }
  0x88   : > { %503 = vst.msk [vmem:[#allocation2 + $0x2c] sm:$0xf] %vm491_vm1, %v418_v19  ;;  %v548_v19 = vld [vmem:[%s3074_s19 + $0x122] sm:$0xff] }
  0x89   : > { %293 = vst.msk [vmem:[#allocation2 + $0x68] sm:$0xf] %vm266_vm0, %v3368_v49 }
  0x8b   : > { %648 = vrot.lane.b32.xlu1 %v570_v15, %s3023_s21  ;;  %646 = vrot.lane.b32.xlu0 %v569_v18, %s3023_s21  ;;  %v3341_v15 = vpack.c.bf16 %v225_v3, %v225_v3  ;;  %v224_v18 = vld [vmem:[%s3074_s19 + $0x108] sm:$0xff]  ;;  %v553_v3 = vld [vmem:[%s3074_s19 + $0x15a] sm:$0xff] }
  0x8c   : > { %650 = vrot.lane.b32.xlu2 %v3271_v21, %s3023_s21  ;;  %v3346_v24 = vpack.c.bf16 %v224_v18, %v224_v18  ;;  %v230_v18 = vld [vmem:[%s3074_s19 + $0x150] sm:$0xff] }
  0x8d   : > { %v402_v32 = vpop.permute.xlu1 %401  ;;  %v398_v33 = vpop.permute.xlu0 %397  ;;  %290 = vst.msk [vmem:[#allocation2 + $0x5c] sm:$0xf] %vm266_vm0, %v3341_v15 }
  0x8e   : > { %495 = vst.msk [vmem:[#allocation2 + $0xc] sm:$0xf] %vm491_vm1, %v402_v32  ;;  %v424_v44 = vpop.permute.xlu2 %423  ;;  %v3349_v32 = vpack.c.bf16 %v223_v6, %v223_v6 }
  0x8f   : > { %493 = vst.msk [vmem:[#allocation2 + $0x4] sm:$0xf] %vm491_vm1, %v398_v33  ;;  %v3352_v33 = vpack.c.bf16 %v548_v19, %v548_v19  ;;  %v554_v19 = vld [vmem:[%s3074_s19 + $0x16a] sm:$0xff] }
  0x90   : > { %506 = vst.msk [vmem:[#allocation2 + $0x38] sm:$0xf] %vm491_vm1, %v424_v44 }
  0x91   : > { %289 = vst.msk [vmem:[#allocation2 + $0x58] sm:$0xf] %vm266_vm0, %v3346_v24 }
  0x92   : > { %288 = vst.msk [vmem:[#allocation2 + $0x54] sm:$0xf] %vm266_vm0, %v3349_v32 }
  0x93   : > { %654 = vrot.lane.b32.xlu1 %v573_v40, %s3023_s21  ;;  %652 = vrot.lane.b32.xlu0 %v572_v41, %s3023_s21  ;;  %v549_v40 = vld [vmem:[%s3074_s19 + $0x12a] sm:$0xff]  ;;  %v226_v41 = vld [vmem:[%s3074_s19 + $0x120] sm:$0xff] }
  0x94   : > { %656 = vrot.lane.b32.xlu2 %v3298_v47, %s3023_s21  ;;  %v581_v57 = vpack.c.bf16 %v549_v40, %v549_v40  ;;  %v3408_v40 = vpack.c.bf16 %v554_v19, %v554_v19 }
  0x95   : > { %v410_v52 = vpop.permute.xlu1 %409  ;;  %v408_v53 = vpop.permute.xlu0 %407 }
  0x96   : > { %499 = vst.msk [vmem:[#allocation2 + $0x1c] sm:$0xf] %vm491_vm1, %v410_v52  ;;  %v430_v63 = vpop.permute.xlu2 %429  ;;  %v3373_v52 = vpack.c.bf16 %v227_v50, %v227_v50 }
  0x97   : > { %498 = vst.msk [vmem:[#allocation2 + $0x18] sm:$0xf] %vm491_vm1, %v408_v53  ;;  %v582_v53 = vpack.c.bf16 %v550_v38, %v550_v38  ;;  %v3405_v38 = vpack.c.bf16 %v229_v5, %v229_v5 }
  0x98   : > { %509 = vst.msk [vmem:[#allocation2 + $0x44] sm:$0xf] %vm491_vm1, %v430_v63  ;;  %v231_v63 = vld [vmem:[%s3074_s19 + $0x158] sm:$0xff] }
  0x99   : > { %292 = vst.msk [vmem:[#allocation2 + $0x64] sm:$0xf] %vm266_vm0, %v3373_v52 }
  0x9a   : > { %294 = vst.msk [vmem:[#allocation2 + $0x6c] sm:$0xf] %vm266_vm0, %v3405_v38 }
  0x9b   : > { %660 = vrot.lane.b32.xlu1 %v576_v61, %s3023_s21  ;;  %658 = vrot.lane.b32.xlu0 %v575_v62, %s3023_s21  ;;  %v3376_v61 = vpack.c.bf16 %v226_v41, %v226_v41  ;;  %v3379_v62 = vpack.c.bf16 %v551_v51, %v551_v51  ;;  %v232_v41 = vld [vmem:[%s3074_s19 + $0x168] sm:$0xff]  ;;  %v233_v51 = vld [vmem:[%s3074_s19 + $0x170] sm:$0xff] }
  0x9c   : > { %662 = vrot.lane.b32.xlu2 %v3325_v1, %s3023_s21 }
  0x9d   : > { %v416_v10 = vpop.permute.xlu1 %415  ;;  %v414_v12 = vpop.permute.xlu0 %413  ;;  %291 = vst.msk [vmem:[#allocation2 + $0x60] sm:$0xf] %vm266_vm0, %v3376_v61 }
  0x9e   : > { %502 = vst.msk [vmem:[#allocation2 + $0x28] sm:$0xf] %vm491_vm1, %v416_v10  ;;  %v436_v30 = vpop.permute.xlu2 %435 }
  0x9f   : > { %501 = vst.msk [vmem:[#allocation2 + $0x24] sm:$0xf] %vm491_vm1, %v414_v12  ;;  %v3395_v12 = vpack.c.bf16 %v231_v63, %v231_v63 }
  0xa0   : > { %512 = vst.msk [vmem:[#allocation2 + $0x50] sm:$0xf] %vm491_vm1, %v436_v30  ;;  %v3403_v30 = vpack.c.bf16 %v552_v4, %v552_v4 }
  0xa1   : > { %296 = vst.msk [vmem:[#allocation2 + $0x74] sm:$0xf] %vm266_vm0, %v3395_v12 }
  0xa3   : > { %666 = vrot.lane.b32.xlu1 %v579_v26, %s3023_s21  ;;  %664 = vrot.lane.b32.xlu0 %v578_v27, %s3023_s21  ;;  %v3400_v26 = vpack.c.bf16 %v230_v18, %v230_v18  ;;  %v585_v27 = vpack.c.bf16 %v553_v3, %v553_v3  ;;  %v2687_v18 = vld [vmem:[%s3074_s19 + $0x188] sm:$0xff] }
  0xa4   : > { %668 = vrot.lane.b32.xlu2 %v3352_v33, %s3023_s21 }
  0xa5   : > { %v422_v44 = vpop.permute.xlu1 %421  ;;  %v420_v48 = vpop.permute.xlu0 %419  ;;  %295 = vst.msk [vmem:[#allocation2 + $0x70] sm:$0xf] %vm266_vm0, %v3400_v26 }
  0xa6   : > { %505 = vst.msk [vmem:[#allocation2 + $0x34] sm:$0xf] %vm491_vm1, %v422_v44  ;;  %v442_v58 = vpop.permute.xlu2 %441  ;;  %v555_v44 = vld [vmem:[%s3074_s19 + $0x172] sm:$0xff] }
  0xa7   : > { %504 = vst.msk [vmem:[#allocation2 + $0x30] sm:$0xf] %vm491_vm1, %v420_v48 }
  0xa8   : > { %515 = vst.msk [vmem:[#allocation2 + $0x5c] sm:$0xf] %vm491_vm1, %v442_v58  ;;  %v587_v58 = vpack.c.bf16 %v555_v44, %v555_v44 }
  0xab   : > { %672 = vrot.lane.b32.xlu1 %v582_v53, %s3023_s21  ;;  %670 = vrot.lane.b32.xlu0 %v581_v57, %s3023_s21  ;;  %v3425_v53 = vpack.c.bf16 %v233_v51, %v233_v51  ;;  %v3427_v57 = vpack.c.bf16 %v232_v41, %v232_v41  ;;  %v2693_v51 = vld [vmem:[%s3074_s19 + $0x51] sm:$0xff] }
  0xac   : > { %674 = vrot.lane.b32.xlu2 %v3379_v62, %s3023_s21 }
  0xad   : > { %v428_v6 = vpop.permute.xlu1 %427  ;;  %v426_v10 = vpop.permute.xlu0 %425  ;;  %298 = vst.msk [vmem:[#allocation2 + $0x7c] sm:$0xf] %vm266_vm0, %v3425_v53 }
  0xae   : > { %508 = vst.msk [vmem:[#allocation2 + $0x40] sm:$0xf] %vm491_vm1, %v428_v6  ;;  %v448_v37 = vpop.permute.xlu2 %447 }
  0xaf   : > { %507 = vst.msk [vmem:[#allocation2 + $0x3c] sm:$0xf] %vm491_vm1, %v426_v10 }
  0xb0   : > { %518 = vst.msk [vmem:[#allocation2 + $0x68] sm:$0xf] %vm491_vm1, %v448_v37 }
  0xb1   : > { %297 = vst.msk [vmem:[#allocation2 + $0x78] sm:$0xf] %vm266_vm0, %v3427_v57 }
  0xb3   : > { %678 = vrot.lane.b32.xlu1 %v585_v27, %s3023_s21  ;;  %676 = vrot.lane.b32.xlu0 %v3403_v30, %s3023_s21 }
  0xb4   : > { %680 = vrot.lane.b32.xlu2 %v3408_v40, %s3023_s21 }
  0xb5   : > { %v434_v48 = vpop.permute.xlu1 %433  ;;  %v432_v50 = vpop.permute.xlu0 %431 }
  0xb6   : > { %511 = vst.msk [vmem:[#allocation2 + $0x4c] sm:$0xf] %vm491_vm1, %v434_v48  ;;  %v454_v63 = vpop.permute.xlu2 %453 }
  0xb7   : > { %510 = vst.msk [vmem:[#allocation2 + $0x48] sm:$0xf] %vm491_vm1, %v432_v50 }
  0xb8   : > { %521 = vst.msk [vmem:[#allocation2 + $0x74] sm:$0xf] %vm491_vm1, %v454_v63 }
  0xbb   : > { %848 = vrot.lane.b32.xlu1 %v3186_v13, %s3024_s22  ;;  %682 = vrot.lane.b32.xlu0 %v587_v58, %s3023_s21  ;;  %v2696_v58 = vld [vmem:[%s3074_s19 + $0x79] sm:$0xff] }
  0xbc   : > { %850 = vrot.lane.b32.xlu2 %v3203_v31, %s3024_s22 }
  0xbd   : > { %v440_v3 = vpop.permute.xlu1 %439  ;;  %v438_v4 = vpop.permute.xlu0 %437 }
  0xbe   : > { %514 = vst.msk [vmem:[#allocation2 + $0x58] sm:$0xf] %vm491_vm1, %v440_v3  ;;  %v621_v5 = vpop.permute.xlu2 %620  ;;  %v1017_v3 = vpack.c.bf16 %v2696_v58, %v2696_v58 }
  0xbf   : > { %513 = vst.msk [vmem:[#allocation2 + $0x54] sm:$0xf] %vm491_vm1, %v438_v4  ;;  %v2699_v4 = vld [vmem:[%s3074_s19 + $0x99] sm:$0xff] }
  0xc0   : > { %717 = vst.msk [vmem:[#allocation2] sm:$0xf] %vm716_vm2, %v621_v5 }
  0xc3   : > { %854 = vrot.lane.b32.xlu1 %v3196_v25, %s3024_s22  ;;  %852 = vrot.lane.b32.xlu0 %v3178_v8, %s3024_s22 }
  0xc4   : > { %856 = vrot.lane.b32.xlu2 %v3217_v43, %s3024_s22 }
  0xc5   : > { %v446_v13 = vpop.permute.xlu1 %445  ;;  %v444_v6 = vpop.permute.xlu0 %443 }
  0xc6   : > { %517 = vst.msk [vmem:[#allocation2 + $0x64] sm:$0xf] %vm491_vm1, %v446_v13  ;;  %v627_v31 = vpop.permute.xlu2 %626  ;;  %v3567_v13 = vpack.c.bf16 %v2699_v4, %v2699_v4  ;;  %v2720_v4 = vld [vmem:[%s3074_s19 + $0x1a] sm:$0xff] }
  0xc7   : > { %516 = vst.msk [vmem:[#allocation2 + $0x60] sm:$0xf] %vm491_vm1, %v444_v6  ;;  %v2702_v6 = vld [vmem:[%s3074_s19 + $0xc1] sm:$0xff] }
  0xc8   : > { %720 = vst.msk [vmem:[#allocation2 + $0xc] sm:$0xf] %vm716_vm2, %v627_v31 }
  0xcb   : > { %860 = vrot.lane.b32.xlu1 %v3215_v42, %s3024_s22  ;;  %858 = vrot.lane.b32.xlu0 %v3224_v46, %s3024_s22 }
  0xcc   : > { %862 = vrot.lane.b32.xlu2 %v3239_v56, %s3024_s22 }
  0xcd   : > { %v452_v25 = vpop.permute.xlu1 %451  ;;  %v450_v8 = vpop.permute.xlu0 %449 }
  0xce   : > { %520 = vst.msk [vmem:[#allocation2 + $0x70] sm:$0xf] %vm491_vm1, %v452_v25  ;;  %v633_v43 = vpop.permute.xlu2 %632  ;;  %v3579_v25 = vpack.c.bf16 %v2702_v6, %v2702_v6  ;;  %v1234_v6 = vpack.c.bf16 %v2720_v4, %v2720_v4 }
  0xcf   : > { %519 = vst.msk [vmem:[#allocation2 + $0x6c] sm:$0xf] %vm491_vm1, %v450_v8 }
  0xd0   : > { %723 = vst.msk [vmem:[#allocation2 + $0x18] sm:$0xf] %vm716_vm2, %v633_v43  ;;  %v2705_v43 = vld [vmem:[%s3074_s19 + $0xe1] sm:$0xff] }
  0xd3   : > { %866 = vrot.lane.b32.xlu1 %v3237_v55, %s3024_s22  ;;  %864 = vrot.lane.b32.xlu0 %v3246_v59, %s3024_s22 }
  0xd4   : > { %868 = vrot.lane.b32.xlu2 %v3268_v20, %s3024_s22 }
  0xd5   : > { %v458_v42 = vpop.permute.xlu1 %457  ;;  %v456_v46 = vpop.permute.xlu0 %455 }
  0xd6   : > { %523 = vst.msk [vmem:[#allocation2 + $0x7c] sm:$0xf] %vm491_vm1, %v458_v42  ;;  %v639_v56 = vpop.permute.xlu2 %638 }
  0xd7   : > { %522 = vst.msk [vmem:[#allocation2 + $0x78] sm:$0xf] %vm491_vm1, %v456_v46 }
  0xd8   : > { %726 = vst.msk [vmem:[#allocation2 + $0x24] sm:$0xf] %vm716_vm2, %v639_v56  ;;  %v2706_v56 = vld [vmem:[%s3074_s19 + $0xf1] sm:$0xff] }
  0xdb   : > { %872 = vrot.lane.b32.xlu1 %v3260_v7, %s3024_s22  ;;  %870 = vrot.lane.b32.xlu0 %v3265_v14, %s3024_s22 }
  0xdc   : > { %874 = vrot.lane.b32.xlu2 %v3295_v45, %s3024_s22 }
  0xdd   : > { %v625_v55 = vpop.permute.xlu1 %624  ;;  %v623_v59 = vpop.permute.xlu0 %622 }
  0xde   : > { %719 = vst.msk [vmem:[#allocation2 + $0x8] sm:$0xf] %vm716_vm2, %v625_v55  ;;  %v645_v20 = vpop.permute.xlu2 %644 }
  0xdf   : > { %718 = vst.msk [vmem:[#allocation2 + $0x4] sm:$0xf] %vm716_vm2, %v623_v59 }
  0xe0   : > { %729 = vst.msk [vmem:[#allocation2 + $0x30] sm:$0xf] %vm716_vm2, %v645_v20  ;;  %v2708_v20 = vld [vmem:[%s3074_s19 + $0x109] sm:$0xff] }
  0xe3   : > { %878 = vrot.lane.b32.xlu1 %v3287_v36, %s3024_s22  ;;  %876 = vrot.lane.b32.xlu0 %v3292_v39, %s3024_s22 }
  0xe4   : > { %880 = vrot.lane.b32.xlu2 %v3322_v0, %s3024_s22 }
  0xe5   : > { %v631_v7 = vpop.permute.xlu1 %630  ;;  %v629_v14 = vpop.permute.xlu0 %628 }
  0xe6   : > { %722 = vst.msk [vmem:[#allocation2 + $0x14] sm:$0xf] %vm716_vm2, %v631_v7  ;;  %v651_v45 = vpop.permute.xlu2 %650 }
  0xe7   : > { %721 = vst.msk [vmem:[#allocation2 + $0x10] sm:$0xf] %vm716_vm2, %v629_v14  ;;  %v3603_v14 = vpack.c.bf16 %v2706_v56, %v2706_v56  ;;  %v2725_v56 = vld [vmem:[%s3074_s19 + $0x52] sm:$0xff] }
  0xe8   : > { %732 = vst.msk [vmem:[#allocation2 + $0x3c] sm:$0xf] %vm716_vm2, %v651_v45 }
  0xeb   : > { %884 = vrot.lane.b32.xlu1 %v3314_v54, %s3024_s22  ;;  %882 = vrot.lane.b32.xlu0 %v3319_v60, %s3024_s22 }
  0xec   : > { %886 = vrot.lane.b32.xlu2 %v3349_v32, %s3024_s22 }
  0xed   : > { %v637_v36 = vpop.permute.xlu1 %636  ;;  %v635_v39 = vpop.permute.xlu0 %634 }
  0xee   : > { %725 = vst.msk [vmem:[#allocation2 + $0x20] sm:$0xf] %vm716_vm2, %v637_v36  ;;  %v657_v0 = vpop.permute.xlu2 %656  ;;  %v2710_v36 = vld [vmem:[%s3074_s19 + $0x121] sm:$0xff] }
  0xef   : > { %724 = vst.msk [vmem:[#allocation2 + $0x1c] sm:$0xf] %vm716_vm2, %v635_v39  ;;  %v2709_v39 = vld [vmem:[%s3074_s19 + $0x111] sm:$0xff] }
  0xf0   : > { %735 = vst.msk [vmem:[#allocation2 + $0x48] sm:$0xf] %vm716_vm2, %v657_v0 }
  0xf3   : > { %890 = vrot.lane.b32.xlu1 %v3341_v15, %s3024_s22  ;;  %888 = vrot.lane.b32.xlu0 %v3346_v24, %s3024_s22 }
  0xf4   : > { %892 = vrot.lane.b32.xlu2 %v3376_v61, %s3024_s22 }
  0xf5   : > { %v643_v54 = vpop.permute.xlu1 %642  ;;  %v641_v60 = vpop.permute.xlu0 %640 }
  0xf6   : > { %728 = vst.msk [vmem:[#allocation2 + $0x2c] sm:$0xf] %vm716_vm2, %v643_v54  ;;  %v663_v32 = vpop.permute.xlu2 %662 }
  0xf7   : > { %727 = vst.msk [vmem:[#allocation2 + $0x28] sm:$0xf] %vm716_vm2, %v641_v60  ;;  %v2711_v60 = vld [vmem:[%s3074_s19 + $0x129] sm:$0xff] }
  0xf8   : > { %738 = vst.msk [vmem:[#allocation2 + $0x54] sm:$0xf] %vm716_vm2, %v663_v32  ;;  %v1031_v32 = vpack.c.bf16 %v2710_v36, %v2710_v36  ;;  %v3679_v36 = vpack.c.bf16 %v2725_v56, %v2725_v56 }
  0xfb   : > { %896 = vrot.lane.b32.xlu1 %v3368_v49, %s3024_s22  ;;  %894 = vrot.lane.b32.xlu0 %v3373_v52, %s3024_s22  ;;  %v2686_v49 = vld [vmem:[%s3074_s19 + $0x180] sm:$0xff] }
  0xfc   : > { %898 = vrot.lane.b32.xlu2 %v3405_v38, %s3024_s22  ;;  %v814_v19 = vpack.c.bf16 %v2686_v49, %v2686_v49  ;;  %v2690_v38 = vld [vmem:[%s3074_s19 + $0x31] sm:$0xff]  ;;  %v2713_v49 = vld [vmem:[%s3074_s19 + $0x141] sm:$0xff] }
  0xfd   : > { %v649_v15 = vpop.permute.xlu1 %648  ;;  %v647_v24 = vpop.permute.xlu0 %646  ;;  %v3534_v44 = vpack.c.bf16 %v2690_v38, %v2690_v38  ;;  %v2716_v38 = vld [vmem:[%s3074_s19 + $0x169] sm:$0xff] }
  0xfe   : > { %731 = vst.msk [vmem:[#allocation2 + $0x38] sm:$0xf] %vm716_vm2, %v649_v15  ;;  %v669_v61 = vpop.permute.xlu2 %668  ;;  %v3619_v15 = vpack.c.bf16 %v2709_v39, %v2709_v39 }
  0xff   : > { %730 = vst.msk [vmem:[#allocation2 + $0x34] sm:$0xf] %vm716_vm2, %v647_v24 }
 0x100   : > { %741 = vst.msk [vmem:[#allocation2 + $0x60] sm:$0xf] %vm716_vm2, %v669_v61  ;;  %v1032_v61 = vpack.c.bf16 %v2711_v60, %v2711_v60  ;;  %v2728_v60 = vld [vmem:[%s3074_s19 + $0x7a] sm:$0xff] }
 0x103   : > { %902 = vrot.lane.b32.xlu1 %v3395_v12, %s3024_s22  ;;  %900 = vrot.lane.b32.xlu0 %v3400_v26, %s3024_s22  ;;  %v815_v12 = vpack.c.bf16 %v2687_v18, %v2687_v18 }
 0x104   : > { %904 = vrot.lane.b32.xlu2 %v3427_v57, %s3024_s22  ;;  %v3546_v57 = vpack.c.bf16 %v2693_v51, %v2693_v51  ;;  %v2717_v51 = vld [vmem:[%s3074_s19 + $0x171] sm:$0xff] }
 0x105   : > { %v655_v52 = vpop.permute.xlu1 %654  ;;  %v653_v10 = vpop.permute.xlu0 %652  ;;  %v1038_v58 = vpack.c.bf16 %v2717_v51, %v2717_v51 }
 0x106   : > { %734 = vst.msk [vmem:[#allocation2 + $0x44] sm:$0xf] %vm716_vm2, %v655_v52  ;;  %v675_v27 = vpop.permute.xlu2 %674  ;;  %v2712_v52 = vld [vmem:[%s3074_s19 + $0x139] sm:$0xff] }
 0x107   : > { %733 = vst.msk [vmem:[#allocation2 + $0x40] sm:$0xf] %vm716_vm2, %v653_v10 }
 0x108   : > { %744 = vst.msk [vmem:[#allocation2 + $0x6c] sm:$0xf] %vm716_vm2, %v675_v27  ;;  %v1034_v27 = vpack.c.bf16 %v2713_v49, %v2713_v49  ;;  %v2729_v49 = vld [vmem:[%s3074_s19 + $0x82] sm:$0xff] }
 0x10b   : > { %908 = vrot.lane.b32.xlu1 %v814_v19, %s3024_s22  ;;  %906 = vrot.lane.b32.xlu0 %v3425_v53, %s3024_s22  ;;  %v2714_v19 = vld [vmem:[%s3074_s19 + $0x151] sm:$0xff] }
 0x10c   : > { %910 = vrot.lane.b32.xlu2 %v815_v12, %s3024_s22  ;;  %v1033_v12 = vpack.c.bf16 %v2712_v52, %v2712_v52  ;;  %v3697_v52 = vpack.c.bf16 %v2728_v60, %v2728_v60 }
 0x10d   : > { %v661_v26 = vpop.permute.xlu1 %660  ;;  %v659_v37 = vpop.permute.xlu0 %658 }
 0x10e   : > { %737 = vst.msk [vmem:[#allocation2 + $0x50] sm:$0xf] %vm716_vm2, %v661_v26  ;;  %v681_v41 = vpop.permute.xlu2 %680 }
 0x10f   : > { %736 = vst.msk [vmem:[#allocation2 + $0x4c] sm:$0xf] %vm716_vm2, %v659_v37  ;;  %v3632_v37 = vpack.c.bf16 %v2714_v19, %v2714_v19  ;;  %v3702_v19 = vpack.c.bf16 %v2729_v49, %v2729_v49 }
 0x110   : > { %747 = vst.msk [vmem:[#allocation2 + $0x78] sm:$0xf] %vm716_vm2, %v681_v41  ;;  %v2715_v41 = vld [vmem:[%s3074_s19 + $0x159] sm:$0xff] }
 0x113   : > { %1075 = vrot.lane.b32.xlu1 %v3088_v9, %s3025_s23  ;;  %1073 = vrot.lane.b32.xlu0 %v3078_v2, %s3025_s23 }
 0x114   : > { %1077 = vrot.lane.b32.xlu2 %v3534_v44, %s3025_s23 }
 0x115   : > { %v667_v48 = vpop.permute.xlu1 %666  ;;  %v665_v50 = vpop.permute.xlu0 %664 }
 0x116   : > { %740 = vst.msk [vmem:[#allocation2 + $0x5c] sm:$0xf] %vm716_vm2, %v667_v48  ;;  %v851_v53 = vpop.permute.xlu2 %850 }
 0x117   : > { %739 = vst.msk [vmem:[#allocation2 + $0x58] sm:$0xf] %vm716_vm2, %v665_v50 }
 0x118   : > { %946 = vst.msk [vmem:[#allocation2 + $0x4] sm:$0xf] %vm944_vm3, %v851_v53  ;;  %v1037_v53 = vpack.c.bf16 %v2716_v38, %v2716_v38 }
 0x11b   : > { %1081 = vrot.lane.b32.xlu1 %v3100_v16, %s3025_s23  ;;  %1079 = vrot.lane.b32.xlu0 %v3090_v11, %s3025_s23 }
 0x11c   : > { %1083 = vrot.lane.b32.xlu2 %v3546_v57, %s3025_s23 }
 0x11d   : > { %v673_v2 = vpop.permute.xlu1 %672  ;;  %v671_v9 = vpop.permute.xlu0 %670 }
 0x11e   : > { %743 = vst.msk [vmem:[#allocation2 + $0x68] sm:$0xf] %vm716_vm2, %v673_v2  ;;  %v857_v63 = vpop.permute.xlu2 %856  ;;  %v3643_v2 = vpack.c.bf16 %v2715_v41, %v2715_v41  ;;  %v2732_v41 = vld [vmem:[%s3074_s19 + $0xaa] sm:$0xff] }
 0x11f   : > { %742 = vst.msk [vmem:[#allocation2 + $0x64] sm:$0xf] %vm716_vm2, %v671_v9 }
 0x120   : > { %949 = vst.msk [vmem:[#allocation2 + $0x10] sm:$0xf] %vm944_vm3, %v857_v63  ;;  %v2719_v63 = vld [vmem:[%s3074_s19 + $0x189] sm:$0xff] }
 0x123   : > { %1087 = vrot.lane.b32.xlu1 %v3112_v22, %s3025_s23  ;;  %1085 = vrot.lane.b32.xlu0 %v3102_v17, %s3025_s23 }
 0x124   : > { %1089 = vrot.lane.b32.xlu2 %v1017_v3, %s3025_s23  ;;  %v2718_v3 = vld [vmem:[%s3074_s19 + $0x181] sm:$0xff] }
 0x125   : > { %v679_v11 = vpop.permute.xlu1 %678  ;;  %v677_v16 = vpop.permute.xlu0 %676 }
 0x126   : > { %746 = vst.msk [vmem:[#allocation2 + $0x74] sm:$0xf] %vm716_vm2, %v679_v11  ;;  %v863_v5 = vpop.permute.xlu2 %862 }
 0x127   : > { %745 = vst.msk [vmem:[#allocation2 + $0x70] sm:$0xf] %vm716_vm2, %v677_v16 }
 0x128   : > { %952 = vst.msk [vmem:[#allocation2 + $0x1c] sm:$0xf] %vm944_vm3, %v863_v5  ;;  %v1040_v5 = vpack.c.bf16 %v2719_v63, %v2719_v63 }
 0x12b   : > { %1093 = vrot.lane.b32.xlu1 %v3124_v28, %s3025_s23  ;;  %1091 = vrot.lane.b32.xlu0 %v3114_v23, %s3025_s23  ;;  %v2704_v23 = vld [vmem:[%s3074_s19 + $0xd9] sm:$0xff] }
 0x12c   : > { %1095 = vrot.lane.b32.xlu2 %v3567_v13, %s3025_s23  ;;  %v1025_v42 = vpack.c.bf16 %v2704_v23, %v2704_v23  ;;  %v2721_v23 = vld [vmem:[%s3074_s19 + $0x22] sm:$0xff] }
 0x12d   : > { %v849_v17 = vpop.permute.xlu1 %848  ;;  %v683_v22 = vpop.permute.xlu0 %682 }
 0x12e   : > { %945 = vst.msk [vmem:[#allocation2] sm:$0xf] %vm944_vm3, %v849_v17  ;;  %v869_v31 = vpop.permute.xlu2 %868  ;;  %v1039_v17 = vpack.c.bf16 %v2718_v3, %v2718_v3  ;;  %v2735_v3 = vld [vmem:[%s3074_s19 + $0xca] sm:$0xff] }
 0x12f   : > { %748 = vst.msk [vmem:[#allocation2 + $0x7c] sm:$0xf] %vm716_vm2, %v683_v22  ;;  %v3735_v4 = vpack.c.bf16 %v2735_v3, %v2735_v3 }
 0x130   : > { %955 = vst.msk [vmem:[#allocation2 + $0x28] sm:$0xf] %vm944_vm3, %v869_v31  ;;  %v2722_v31 = vld [vmem:[%s3074_s19 + $0x32] sm:$0xff] }
 0x133   : > { %1099 = vrot.lane.b32.xlu1 %v3136_v34, %s3025_s23  ;;  %1097 = vrot.lane.b32.xlu0 %v3126_v29, %s3025_s23  ;;  %v1026_v34 = vpack.c.bf16 %v2705_v43, %v2705_v43  ;;  %v2707_v29 = vld [vmem:[%s3074_s19 + $0xf9] sm:$0xff] }
 0x134   : > { %1101 = vrot.lane.b32.xlu2 %v3579_v25, %s3025_s23  ;;  %v3601_v7 = vpack.c.bf16 %v2707_v29, %v2707_v29  ;;  %v2723_v43 = vld [vmem:[%s3074_s19 + $0x3a] sm:$0xff] }
 0x135   : > { %v855_v28 = vpop.permute.xlu1 %854  ;;  %v853_v8 = vpop.permute.xlu0 %852  ;;  %v3667_v29 = vpack.c.bf16 %v2723_v43, %v2723_v43 }
 0x136   : > { %948 = vst.msk [vmem:[#allocation2 + $0xc] sm:$0xf] %vm944_vm3, %v855_v28  ;;  %v875_v46 = vpop.permute.xlu2 %874 }
 0x137   : > { %947 = vst.msk [vmem:[#allocation2 + $0x8] sm:$0xf] %vm944_vm3, %v853_v8 }
 0x138   : > { %958 = vst.msk [vmem:[#allocation2 + $0x34] sm:$0xf] %vm944_vm3, %v875_v46  ;;  %v1235_v46 = vpack.c.bf16 %v2721_v23, %v2721_v23 }
 0x13b   : > { %1105 = vrot.lane.b32.xlu1 %v1025_v42, %s3025_s23  ;;  %1103 = vrot.lane.b32.xlu0 %v3138_v35, %s3025_s23  ;;  %v3606_v35 = vpack.c.bf16 %v2708_v20, %v2708_v20  ;;  %v3664_v42 = vpack.c.bf16 %v2722_v31, %v2722_v31 }
 0x13c   : > { %1107 = vrot.lane.b32.xlu2 %v1026_v34, %s3025_s23 }
 0x13d   : > { %v861_v55 = vpop.permute.xlu1 %860  ;;  %v859_v59 = vpop.permute.xlu0 %858 }
 0x13e   : > { %951 = vst.msk [vmem:[#allocation2 + $0x18] sm:$0xf] %vm944_vm3, %v861_v55  ;;  %v881_v45 = vpop.permute.xlu2 %880  ;;  %v2724_v55 = vld [vmem:[%s3074_s19 + $0x4a] sm:$0xff] }
 0x13f   : > { %950 = vst.msk [vmem:[#allocation2 + $0x14] sm:$0xf] %vm944_vm3, %v859_v59  ;;  %v3681_v39 = vpack.c.bf16 %v2724_v55, %v2724_v55 }
 0x140   : > { %961 = vst.msk [vmem:[#allocation2 + $0x40] sm:$0xf] %vm944_vm3, %v881_v45  ;;  %v2726_v45 = vld [vmem:[%s3074_s19 + $0x62] sm:$0xff] }
 0x143   : > { %1111 = vrot.lane.b32.xlu1 %v3601_v7, %s3025_s23  ;;  %1109 = vrot.lane.b32.xlu0 %v3603_v14, %s3025_s23 }
 0x144   : > { %1113 = vrot.lane.b32.xlu2 %v3606_v35, %s3025_s23 }
 0x145   : > { %v867_v0 = vpop.permute.xlu1 %866  ;;  %v865_v54 = vpop.permute.xlu0 %864 }
 0x146   : > { %954 = vst.msk [vmem:[#allocation2 + $0x24] sm:$0xf] %vm944_vm3, %v867_v0  ;;  %v887_v24 = vpop.permute.xlu2 %886 }
 0x147   : > { %953 = vst.msk [vmem:[#allocation2 + $0x20] sm:$0xf] %vm944_vm3, %v865_v54  ;;  %v3684_v54 = vpack.c.bf16 %v2726_v45, %v2726_v45  ;;  %v2744_v45 = vld [vmem:[%s3074_s19 + $0x13a] sm:$0xff] }
 0x148   : > { %964 = vst.msk [vmem:[#allocation2 + $0x4c] sm:$0xf] %vm944_vm3, %v887_v24 }
 0x14b   : > { %1117 = vrot.lane.b32.xlu1 %v1031_v32, %s3025_s23  ;;  %1115 = vrot.lane.b32.xlu0 %v3619_v15, %s3025_s23  ;;  %v2727_v32 = vld [vmem:[%s3074_s19 + $0x6a] sm:$0xff] }
 0x14c   : > { %1119 = vrot.lane.b32.xlu2 %v1032_v61, %s3025_s23 }
 0x14d   : > { %v873_v10 = vpop.permute.xlu1 %872  ;;  %v871_v18 = vpop.permute.xlu0 %870 }
 0x14e   : > { %957 = vst.msk [vmem:[#allocation2 + $0x30] sm:$0xf] %vm944_vm3, %v873_v10  ;;  %v893_v26 = vpop.permute.xlu2 %892  ;;  %v3699_v10 = vpack.c.bf16 %v2727_v32, %v2727_v32  ;;  %v3780_v32 = vpack.c.bf16 %v2744_v45, %v2744_v45 }
 0x14f   : > { %956 = vst.msk [vmem:[#allocation2 + $0x2c] sm:$0xf] %vm944_vm3, %v871_v18 }
 0x150   : > { %967 = vst.msk [vmem:[#allocation2 + $0x58] sm:$0xf] %vm944_vm3, %v893_v26 }
 0x153   : > { %1123 = vrot.lane.b32.xlu1 %v1034_v27, %s3025_s23  ;;  %1121 = vrot.lane.b32.xlu0 %v1033_v12, %s3025_s23  ;;  %v2731_v27 = vld [vmem:[%s3074_s19 + $0x9a] sm:$0xff]  ;;  %v2730_v12 = vld [vmem:[%s3074_s19 + $0x92] sm:$0xff] }
 0x154   : > { %1125 = vrot.lane.b32.xlu2 %v3632_v37, %s3025_s23 }
 0x155   : > { %v879_v48 = vpop.permute.xlu1 %878  ;;  %v877_v50 = vpop.permute.xlu0 %876 }
 0x156   : > { %960 = vst.msk [vmem:[#allocation2 + $0x3c] sm:$0xf] %vm944_vm3, %v879_v48  ;;  %v899_v9 = vpop.permute.xlu2 %898  ;;  %v3715_v48 = vpack.c.bf16 %v2731_v27, %v2731_v27 }
 0x157   : > { %959 = vst.msk [vmem:[#allocation2 + $0x38] sm:$0xf] %vm944_vm3, %v877_v50  ;;  %v3717_v50 = vpack.c.bf16 %v2730_v12, %v2730_v12 }
 0x158   : > { %970 = vst.msk [vmem:[#allocation2 + $0x64] sm:$0xf] %vm944_vm3, %v899_v9  ;;  %v2734_v9 = vld [vmem:[%s3074_s19 + $0xc2] sm:$0xff] }
 0x15b   : > { %1129 = vrot.lane.b32.xlu1 %v1037_v53, %s3025_s23  ;;  %1127 = vrot.lane.b32.xlu0 %v3643_v2, %s3025_s23  ;;  %v3720_v53 = vpack.c.bf16 %v2732_v41, %v2732_v41 }
 0x15c   : > { %1131 = vrot.lane.b32.xlu2 %v1038_v58, %s3025_s23 }
 0x15d   : > { %v885_v11 = vpop.permute.xlu1 %884  ;;  %v883_v16 = vpop.permute.xlu0 %882 }
 0x15e   : > { %963 = vst.msk [vmem:[#allocation2 + $0x48] sm:$0xf] %vm944_vm3, %v885_v11  ;;  %v905_v22 = vpop.permute.xlu2 %904  ;;  %v3732_v11 = vpack.c.bf16 %v2734_v9, %v2734_v9 }
 0x15f   : > { %962 = vst.msk [vmem:[#allocation2 + $0x44] sm:$0xf] %vm944_vm3, %v883_v16 }
 0x160   : > { %973 = vst.msk [vmem:[#allocation2 + $0x70] sm:$0xf] %vm944_vm3, %v905_v22 }
 0x163   : > { %1135 = vrot.lane.b32.xlu1 %v1040_v5, %s3025_s23  ;;  %1133 = vrot.lane.b32.xlu0 %v1039_v17, %s3025_s23  ;;  %v2737_v5 = vld [vmem:[%s3074_s19 + $0xe2] sm:$0xff] }
 0x164   : > { %1298 = vrot.lane.b32.xlu2 %v1234_v6, %s3026_s24  ;;  %v2738_v6 = vld [vmem:[%s3074_s19 + $0xf2] sm:$0xff]  ;;  %v3747_v31 = vpack.c.bf16 %v2737_v5, %v2737_v5 }
 0x165   : > { %v891_v28 = vpop.permute.xlu1 %890  ;;  %v889_v8 = vpop.permute.xlu0 %888  ;;  %v2755_v5 = vld [vmem:[%s3074_s19 + $0x50] sm:$0xff] }
 0x166   : > { %966 = vst.msk [vmem:[#allocation2 + $0x54] sm:$0xf] %vm944_vm3, %v891_v28  ;;  %v911_v34 = vpop.permute.xlu2 %910  ;;  %v3750_v28 = vpack.c.bf16 %v2738_v6, %v2738_v6  ;;  %v2761_v6 = vld [vmem:[%s3074_s19 + $0x98] sm:$0xff] }
 0x167   : > { %965 = vst.msk [vmem:[#allocation2 + $0x50] sm:$0xf] %vm944_vm3, %v889_v8 }
 0x168   : > { %976 = vst.msk [vmem:[#allocation2 + $0x7c] sm:$0xf] %vm944_vm3, %v911_v34 }
 0x16b   : > { %1302 = vrot.lane.b32.xlu1 %v3664_v42, %s3026_s24  ;;  %1300 = vrot.lane.b32.xlu0 %v1235_v46, %s3026_s24  ;;  %v2741_v46 = vld [vmem:[%s3074_s19 + $0x112] sm:$0xff] }
 0x16c   : > { %1304 = vrot.lane.b32.xlu2 %v3667_v29, %s3026_s24  ;;  %v3765_v55 = vpack.c.bf16 %v2741_v46, %v2741_v46 }
 0x16d   : > { %v897_v59 = vpop.permute.xlu1 %896  ;;  %v895_v20 = vpop.permute.xlu0 %894 }
 0x16e   : > { %969 = vst.msk [vmem:[#allocation2 + $0x60] sm:$0xf] %vm944_vm3, %v897_v59  ;;  %v1078_v0 = vpop.permute.xlu2 %1077 }
 0x16f   : > { %968 = vst.msk [vmem:[#allocation2 + $0x5c] sm:$0xf] %vm944_vm3, %v895_v20 }
 0x170   : > { %1172 = vst.msk [vmem:[#allocation2 + $0x8] sm:$0xf] %vm1169_vm4, %v1078_v0 }
 0x173   : > { %1308 = vrot.lane.b32.xlu1 %v3679_v36, %s3026_s24  ;;  %1306 = vrot.lane.b32.xlu0 %v3681_v39, %s3026_s24 }
 0x174   : > { %1310 = vrot.lane.b32.xlu2 %v3684_v54, %s3026_s24 }
 0x175   : > { %v903_v24 = vpop.permute.xlu1 %902  ;;  %v901_v61 = vpop.permute.xlu0 %900 }
 0x176   : > { %972 = vst.msk [vmem:[#allocation2 + $0x6c] sm:$0xf] %vm944_vm3, %v903_v24  ;;  %v1084_v18 = vpop.permute.xlu2 %1083 }
 0x177   : > { %971 = vst.msk [vmem:[#allocation2 + $0x68] sm:$0xf] %vm944_vm3, %v901_v61  ;;  %v2747_v61 = vld [vmem:[%s3074_s19 + $0x15a] sm:$0xff] }
 0x178   : > { %1175 = vst.msk [vmem:[#allocation2 + $0x14] sm:$0xf] %vm1169_vm4, %v1084_v18  ;;  %v3792_v18 = vpack.c.bf16 %v2747_v61, %v2747_v61 }
 0x17b   : > { %1314 = vrot.lane.b32.xlu1 %v3697_v52, %s3026_s24  ;;  %1312 = vrot.lane.b32.xlu0 %v3699_v10, %s3026_s24 }
 0x17c   : > { %1316 = vrot.lane.b32.xlu2 %v3702_v19, %s3026_s24 }
 0x17d   : > { %v909_v26 = vpop.permute.xlu1 %908  ;;  %v907_v38 = vpop.permute.xlu0 %906 }
 0x17e   : > { %975 = vst.msk [vmem:[#allocation2 + $0x78] sm:$0xf] %vm944_vm3, %v909_v26  ;;  %v1090_v51 = vpop.permute.xlu2 %1089  ;;  %v2753_v26 = vld [vmem:[%s3074_s19 + $0x38] sm:$0xff] }
 0x17f   : > { %974 = vst.msk [vmem:[#allocation2 + $0x74] sm:$0xf] %vm944_vm3, %v907_v38 }
 0x180   : > { %1178 = vst.msk [vmem:[#allocation2 + $0x20] sm:$0xf] %vm1169_vm4, %v1090_v51 }
 0x183   : > { %1320 = vrot.lane.b32.xlu1 %v3715_v48, %s3026_s24  ;;  %1318 = vrot.lane.b32.xlu0 %v3717_v50, %s3026_s24 }
 0x184   : > { %1322 = vrot.lane.b32.xlu2 %v3720_v53, %s3026_s24 }
 0x185   : > { %v1076_v58 = vpop.permute.xlu1 %1075  ;;  %v1074_v63 = vpop.permute.xlu0 %1073 }
 0x186   : > { %1171 = vst.msk [vmem:[#allocation2 + $0x4] sm:$0xf] %vm1169_vm4, %v1076_v58  ;;  %v1096_v16 = vpop.permute.xlu2 %1095 }
 0x187   : > { %1170 = vst.msk [vmem:[#allocation2] sm:$0xf] %vm1169_vm4, %v1074_v63 }
 0x188   : > { %1181 = vst.msk [vmem:[#allocation2 + $0x2c] sm:$0xf] %vm1169_vm4, %v1096_v16 }
 0x18b   : > { %1326 = vrot.lane.b32.xlu1 %v3732_v11, %s3026_s24  ;;  %1324 = vrot.lane.b32.xlu0 %v3271_v21, %s3026_s24  ;;  %v2740_v21 = vld [vmem:[%s3074_s19 + $0x10a] sm:$0xff] }
 0x18c   : > { %1328 = vrot.lane.b32.xlu2 %v3735_v4, %s3026_s24  ;;  %v3762_v34 = vpack.c.bf16 %v2740_v21, %v2740_v21 }
 0x18d   : > { %v1082_v17 = vpop.permute.xlu1 %1081  ;;  %v1080_v22 = vpop.permute.xlu0 %1079 }
 0x18e   : > { %1174 = vst.msk [vmem:[#allocation2 + $0x10] sm:$0xf] %vm1169_vm4, %v1082_v17  ;;  %v1102_v23 = vpop.permute.xlu2 %1101 }
 0x18f   : > { %1173 = vst.msk [vmem:[#allocation2 + $0xc] sm:$0xf] %vm1169_vm4, %v1080_v22 }
 0x190   : > { %1184 = vst.msk [vmem:[#allocation2 + $0x38] sm:$0xf] %vm1169_vm4, %v1102_v23 }
 0x193   : > { %1332 = vrot.lane.b32.xlu1 %v3747_v31, %s3026_s24  ;;  %1330 = vrot.lane.b32.xlu0 %v3298_v47, %s3026_s24  ;;  %v2743_v47 = vld [vmem:[%s3074_s19 + $0x12a] sm:$0xff] }
 0x194   : > { %1334 = vrot.lane.b32.xlu2 %v3750_v28, %s3026_s24  ;;  %v3777_v0 = vpack.c.bf16 %v2743_v47, %v2743_v47 }
 0x195   : > { %v1088_v8 = vpop.permute.xlu1 %1087  ;;  %v1086_v43 = vpop.permute.xlu0 %1085 }
 0x196   : > { %1177 = vst.msk [vmem:[#allocation2 + $0x1c] sm:$0xf] %vm1169_vm4, %v1088_v8  ;;  %v1108_v56 = vpop.permute.xlu2 %1107  ;;  %v2786_v8 = vld [vmem:[%s3074_s19 + $0x49] sm:$0xff] }
 0x197   : > { %1176 = vst.msk [vmem:[#allocation2 + $0x18] sm:$0xf] %vm1169_vm4, %v1086_v43  ;;  %v1471_v43 = vpack.c.bf16 %v2761_v6, %v2761_v6  ;;  %v1689_v47 = vpack.c.bf16 %v2786_v8, %v2786_v8  ;;  %v2789_v6 = vld [vmem:[%s3074_s19 + $0x69] sm:$0xff] }
 0x198   : > { %1187 = vst.msk [vmem:[#allocation2 + $0x44] sm:$0xf] %vm1169_vm4, %v1108_v56 }
 0x19b   : > { %1338 = vrot.lane.b32.xlu1 %v3762_v34, %s3026_s24  ;;  %1336 = vrot.lane.b32.xlu0 %v3325_v1, %s3026_s24 }
 0x19c   : > { %1340 = vrot.lane.b32.xlu2 %v3765_v55, %s3026_s24 }
 0x19d   : > { %v1094_v59 = vpop.permute.xlu1 %1093  ;;  %v1092_v20 = vpop.permute.xlu0 %1091 }
 0x19e   : > { %1180 = vst.msk [vmem:[#allocation2 + $0x28] sm:$0xf] %vm1169_vm4, %v1094_v59  ;;  %v1114_v60 = vpop.permute.xlu2 %1113 }
 0x19f   : > { %1179 = vst.msk [vmem:[#allocation2 + $0x24] sm:$0xf] %vm1169_vm4, %v1092_v20 }
 0x1a0   : > { %1190 = vst.msk [vmem:[#allocation2 + $0x50] sm:$0xf] %vm1169_vm4, %v1114_v60 }
 0x1a3   : > { %1344 = vrot.lane.b32.xlu1 %v3777_v0, %s3026_s24  ;;  %1342 = vrot.lane.b32.xlu0 %v3352_v33, %s3026_s24  ;;  %v2752_v33 = vld [vmem:[%s3074_s19 + $0x30] sm:$0xff] }
 0x1a4   : > { %1346 = vrot.lane.b32.xlu2 %v3780_v32, %s3026_s24  ;;  %v1462_v38 = vpack.c.bf16 %v2752_v33, %v2752_v33 }
 0x1a5   : > { %v1100_v1 = vpop.permute.xlu1 %1099  ;;  %v1098_v24 = vpop.permute.xlu0 %1097 }
 0x1a6   : > { %1183 = vst.msk [vmem:[#allocation2 + $0x34] sm:$0xf] %vm1169_vm4, %v1100_v1  ;;  %v1120_v49 = vpop.permute.xlu2 %1119 }
 0x1a7   : > { %1182 = vst.msk [vmem:[#allocation2 + $0x30] sm:$0xf] %vm1169_vm4, %v1098_v24 }
 0x1a8   : > { %1193 = vst.msk [vmem:[#allocation2 + $0x5c] sm:$0xf] %vm1169_vm4, %v1120_v49  ;;  %v2768_v49 = vld [vmem:[%s3074_s19 + $0xf0] sm:$0xff] }
 0x1ab   : > { %1350 = vrot.lane.b32.xlu1 %v3403_v30, %s3026_s24  ;;  %1348 = vrot.lane.b32.xlu0 %v3379_v62, %s3026_s24  ;;  %v1463_v30 = vpack.c.bf16 %v2753_v26, %v2753_v26  ;;  %v2785_v62 = vld [vmem:[%s3074_s19 + $0x39] sm:$0xff] }
 0x1ac   : > { %1352 = vrot.lane.b32.xlu2 %v3792_v18, %s3026_s24  ;;  %v1688_v58 = vpack.c.bf16 %v2785_v62, %v2785_v62  ;;  %v2757_v62 = vld [vmem:[%s3074_s19 + $0x68] sm:$0xff] }
 0x1ad   : > { %v1106_v27 = vpop.permute.xlu1 %1105  ;;  %v1104_v12 = vpop.permute.xlu0 %1103 }
 0x1ae   : > { %1186 = vst.msk [vmem:[#allocation2 + $0x40] sm:$0xf] %vm1169_vm4, %v1106_v27  ;;  %v1126_v41 = vpop.permute.xlu2 %1125  ;;  %v1478_v27 = vpack.c.bf16 %v2768_v49, %v2768_v49 }
 0x1af   : > { %1185 = vst.msk [vmem:[#allocation2 + $0x3c] sm:$0xf] %vm1169_vm4, %v1104_v12 }
 0x1b0   : > { %1196 = vst.msk [vmem:[#allocation2 + $0x68] sm:$0xf] %vm1169_vm4, %v1126_v41 }
 0x1b3   : > { %1526 = vrot.lane.b32.xlu1 %v1462_v38, %s3027_s25  ;;  %1354 = vrot.lane.b32.xlu0 %v3408_v40, %s3026_s24  ;;  %v2754_v40 = vld [vmem:[%s3074_s19 + $0x48] sm:$0xff]  ;;  %v2833_v38 = vld [vmem:[%s3074_s19 + $0xfa] sm:$0xff] }
 0x1b4   : > { %1528 = vrot.lane.b32.xlu2 %v1463_v30, %s3027_s25  ;;  %v1464_v17 = vpack.c.bf16 %v2754_v40, %v2754_v40 }
 0x1b5   : > { %v1112_v51 = vpop.permute.xlu1 %1111  ;;  %v1110_v9 = vpop.permute.xlu0 %1109 }
 0x1b6   : > { %1189 = vst.msk [vmem:[#allocation2 + $0x4c] sm:$0xf] %vm1169_vm4, %v1112_v51  ;;  %v1132_v63 = vpop.permute.xlu2 %1131 }
 0x1b7   : > { %1188 = vst.msk [vmem:[#allocation2 + $0x48] sm:$0xf] %vm1169_vm4, %v1110_v9 }
 0x1b8   : > { %1199 = vst.msk [vmem:[#allocation2 + $0x74] sm:$0xf] %vm1169_vm4, %v1132_v63 }
 0x1bb   : > { %1753 = vrot.lane.b32.xlu1 %v1688_v58, %s3028_s26  ;;  %1751 = vrot.lane.b32.xlu0 %v3534_v44, %s3028_s26  ;;  %v1465_v44 = vpack.c.bf16 %v2755_v5, %v2755_v5  ;;  %v2763_v58 = vld [vmem:[%s3074_s19 + $0xb0] sm:$0xff] }
 0x1bc   : > { %1976 = vrot.lane.b32.xlu2 %v3664_v42, %s3029_s27  ;;  %v2760_v42 = vld [vmem:[%s3074_s19 + $0x90] sm:$0xff] }
 0x1bd   : > { %v1118_v3 = vpop.permute.xlu1 %1117  ;;  %v1116_v16 = vpop.permute.xlu0 %1115  ;;  %v1470_v46 = vpack.c.bf16 %v2760_v42, %v2760_v42 }
 0x1be   : > { %1192 = vst.msk [vmem:[#allocation2 + $0x58] sm:$0xf] %vm1169_vm4, %v1118_v3  ;;  %v1299_v22 = vpop.permute.xlu2 %1298  ;;  %v2788_v3 = vld [vmem:[%s3074_s19 + $0x61] sm:$0xff] }
 0x1bf   : > { %1191 = vst.msk [vmem:[#allocation2 + $0x54] sm:$0xf] %vm1169_vm4, %v1116_v16  ;;  %v1473_v16 = vpack.c.bf16 %v2763_v58, %v2763_v58 }
 0x1c0   : > { %1395 = vst.msk [vmem:[#allocation2] sm:$0xf] %vm1394_vm5, %v1299_v22  ;;  %v1691_v22 = vpack.c.bf16 %v2788_v3, %v2788_v3  ;;  %v2764_v3 = vld [vmem:[%s3074_s19 + $0xc0] sm:$0xff] }
 0x1c3   : > { %1530 = vrot.lane.b32.xlu1 %v1464_v17, %s3027_s25  ;;  %1978 = vrot.lane.b32.xlu0 %v3667_v29, %s3029_s27  ;;  %v2792_v29 = vld [vmem:[%s3074_s19 + $0x91] sm:$0xff] }
 0x1c4   : > { %1532 = vrot.lane.b32.xlu2 %v1465_v44, %s3027_s25  ;;  %v1695_v45 = vpack.c.bf16 %v2792_v29, %v2792_v29  ;;  %v2794_v44 = vld [vmem:[%s3074_s19 + $0xa9] sm:$0xff] }
 0x1c5   : > { %v1124_v23 = vpop.permute.xlu1 %1123  ;;  %v1122_v21 = vpop.permute.xlu0 %1121  ;;  %v1697_v8 = vpack.c.bf16 %v2794_v44, %v2794_v44  ;;  %v1474_v44 = vpack.c.bf16 %v2764_v3, %v2764_v3 }
 0x1c6   : > { %1195 = vst.msk [vmem:[#allocation2 + $0x64] sm:$0xf] %vm1169_vm4, %v1124_v23  ;;  %v1305_v56 = vpop.permute.xlu2 %1304 }
 0x1c7   : > { %1194 = vst.msk [vmem:[#allocation2 + $0x60] sm:$0xf] %vm1169_vm4, %v1122_v21  ;;  %v2795_v21 = vld [vmem:[%s3074_s19 + $0xb1] sm:$0xff] }
 0x1c8   : > { %1398 = vst.msk [vmem:[#allocation2 + $0xc] sm:$0xf] %vm1394_vm5, %v1305_v56  ;;  %v1698_v56 = vpack.c.bf16 %v2795_v21, %v2795_v21 }
 0x1cb   : > { %1544 = vrot.lane.b32.xlu1 %v1471_v43, %s3027_s25  ;;  %1542 = vrot.lane.b32.xlu0 %v1470_v46, %s3027_s25  ;;  %v1692_v43 = vpack.c.bf16 %v2789_v6, %v2789_v6 }
 0x1cc   : > { %1755 = vrot.lane.b32.xlu2 %v1689_v47, %s3028_s26 }
 0x1cd   : > { %v1130_v59 = vpop.permute.xlu1 %1129  ;;  %v1128_v20 = vpop.permute.xlu0 %1127 }
 0x1ce   : > { %1198 = vst.msk [vmem:[#allocation2 + $0x70] sm:$0xf] %vm1169_vm4, %v1130_v59  ;;  %v1311_v60 = vpop.permute.xlu2 %1310 }
 0x1cf   : > { %1197 = vst.msk [vmem:[#allocation2 + $0x6c] sm:$0xf] %vm1169_vm4, %v1128_v20  ;;  %v2770_v20 = vld [vmem:[%s3074_s19 + $0x108] sm:$0xff] }
 0x1d0   : > { %1401 = vst.msk [vmem:[#allocation2 + $0x18] sm:$0xf] %vm1394_vm5, %v1311_v60 }
 0x1d3   : > { %1767 = vrot.lane.b32.xlu1 %v1695_v45, %s3028_s26  ;;  %1757 = vrot.lane.b32.xlu0 %v3546_v57, %s3028_s26  ;;  %v2827_v45 = vld [vmem:[%s3074_s19 + $0xb2] sm:$0xff] }
 0x1d4   : > { %1769 = vrot.lane.b32.xlu2 %v3567_v13, %s3028_s26  ;;  %v2769_v13 = vld [vmem:[%s3074_s19 + $0xf8] sm:$0xff] }
 0x1d5   : > { %v1136_v1 = vpop.permute.xlu1 %1135  ;;  %v1134_v24 = vpop.permute.xlu0 %1133 }
 0x1d6   : > { %1201 = vst.msk [vmem:[#allocation2 + $0x7c] sm:$0xf] %vm1169_vm4, %v1136_v1  ;;  %v1317_v61 = vpop.permute.xlu2 %1316 }
 0x1d7   : > { %1200 = vst.msk [vmem:[#allocation2 + $0x78] sm:$0xf] %vm1169_vm4, %v1134_v24  ;;  %v2771_v24 = vld [vmem:[%s3074_s19 + $0x110] sm:$0xff] }
 0x1d8   : > { %1404 = vst.msk [vmem:[#allocation2 + $0x24] sm:$0xf] %vm1394_vm5, %v1317_v61  ;;  %v1480_v61 = vpack.c.bf16 %v2770_v20, %v2770_v20 }
 0x1db   : > { %1982 = vrot.lane.b32.xlu1 %v3679_v36, %s3029_s27  ;;  %1980 = vrot.lane.b32.xlu0 %v3681_v39, %s3029_s27  ;;  %v1479_v36 = vpack.c.bf16 %v2769_v13, %v2769_v13  ;;  %v2777_v13 = vld [vmem:[%s3074_s19 + $0x158] sm:$0xff] }
 0x1dc   : > { %1992 = vrot.lane.b32.xlu2 %v3717_v50, %s3029_s27 }
 0x1dd   : > { %v1303_v57 = vpop.permute.xlu1 %1302  ;;  %v1301_v33 = vpop.permute.xlu0 %1300 }
 0x1de   : > { %1397 = vst.msk [vmem:[#allocation2 + $0x8] sm:$0xf] %vm1394_vm5, %v1303_v57  ;;  %v1323_v12 = vpop.permute.xlu2 %1322 }
 0x1df   : > { %1396 = vst.msk [vmem:[#allocation2 + $0x4] sm:$0xf] %vm1394_vm5, %v1301_v33  ;;  %v1481_v33 = vpack.c.bf16 %v2771_v24, %v2771_v24 }
 0x1e0   : > { %1407 = vst.msk [vmem:[#allocation2 + $0x30] sm:$0xf] %vm1394_vm5, %v1323_v12 }
 0x1e3   : > { %1558 = vrot.lane.b32.xlu1 %v1478_v27, %s3027_s25  ;;  %1994 = vrot.lane.b32.xlu0 %v3715_v48, %s3029_s27  ;;  %v2756_v48 = vld [vmem:[%s3074_s19 + $0x60] sm:$0xff]  ;;  %v2776_v27 = vld [vmem:[%s3074_s19 + $0x150] sm:$0xff] }
 0x1e4   : > { %1560 = vrot.lane.b32.xlu2 %v1479_v36, %s3027_s25  ;;  %v1466_v51 = vpack.c.bf16 %v2756_v48, %v2756_v48 }
 0x1e5   : > { %v1309_v39 = vpop.permute.xlu1 %1308  ;;  %v1307_v50 = vpop.permute.xlu0 %1306 }
 0x1e6   : > { %1400 = vst.msk [vmem:[#allocation2 + $0x14] sm:$0xf] %vm1394_vm5, %v1309_v39  ;;  %v1329_v26 = vpop.permute.xlu2 %1328 }
 0x1e7   : > { %1399 = vst.msk [vmem:[#allocation2 + $0x10] sm:$0xf] %vm1394_vm5, %v1307_v50  ;;  %v1487_v50 = vpack.c.bf16 %v2777_v13, %v2777_v13 }
 0x1e8   : > { %1410 = vst.msk [vmem:[#allocation2 + $0x3c] sm:$0xf] %vm1394_vm5, %v1329_v26  ;;  %v1486_v26 = vpack.c.bf16 %v2776_v27, %v2776_v27  ;;  %v2810_v27 = vld [vmem:[%s3074_s19 + $0x169] sm:$0xff] }
 0x1eb   : > { %1785 = vrot.lane.b32.xlu1 %v3601_v7, %s3028_s26  ;;  %1783 = vrot.lane.b32.xlu0 %v3603_v14, %s3028_s26  ;;  %v1929_v7 = vpack.c.bf16 %v2833_v38, %v2833_v38  ;;  %v1467_v14 = vpack.c.bf16 %v2757_v62, %v2757_v62  ;;  %v2955_v38 = vld [vmem:[%s4256_s1 + $0x8] sm:$0xff] }
 0x1ec   : > { %2008 = vrot.lane.b32.xlu2 %v3750_v28, %s3029_s27  ;;  %v2762_v28 = vld [vmem:[%s3074_s19 + $0xa8] sm:$0xff] }
 0x1ed   : > { %v1315_v41 = vpop.permute.xlu1 %1314  ;;  %v1313_v30 = vpop.permute.xlu0 %1312  ;;  %v1472_v5 = vpack.c.bf16 %v2762_v28, %v2762_v28  ;;  %v2759_v28 = vld [vmem:[%s3074_s19 + $0x80] sm:$0xff] }
 0x1ee   : > { %1403 = vst.msk [vmem:[#allocation2 + $0x20] sm:$0xf] %vm1394_vm5, %v1315_v41  ;;  %v1335_v9 = vpop.permute.xlu2 %1334  ;;  %v2954_v41 = vld [vmem:[%s4256_s1] sm:$0xff] }
 0x1ef   : > { %1402 = vst.msk [vmem:[#allocation2 + $0x1c] sm:$0xf] %vm1394_vm5, %v1313_v30 }
 0x1f0   : > { %1413 = vst.msk [vmem:[#allocation2 + $0x48] sm:$0xf] %vm1394_vm5, %v1335_v9  ;;  %v2840_v9 = vld [vmem:[%s3074_s19 + $0x152] sm:$0xff] }
 0x1f1   : > { %v1936_v58 = vpack.c.bf16 %v2840_v9, %v2840_v9 }
 0x1f3   : > { %1534 = vrot.lane.b32.xlu1 %v1466_v51, %s3027_s25  ;;  %2010 = vrot.lane.b32.xlu0 %v1929_v7, %s3029_s27 }
 0x1f4   : > { %1536 = vrot.lane.b32.xlu2 %v1467_v14, %s3027_s25 }
 0x1f5   : > { %v1321_v63 = vpop.permute.xlu1 %1320  ;;  %v1319_v40 = vpop.permute.xlu0 %1318 }
 0x1f6   : > { %1406 = vst.msk [vmem:[#allocation2 + $0x2c] sm:$0xf] %vm1394_vm5, %v1321_v63  ;;  %v1341_v17 = vpop.permute.xlu2 %1340 }
 0x1f7   : > { %1405 = vst.msk [vmem:[#allocation2 + $0x28] sm:$0xf] %vm1394_vm5, %v1319_v40  ;;  %v2765_v40 = vld [vmem:[%s3074_s19 + $0xc8] sm:$0xff] }
 0x1f8   : > { %1416 = vst.msk [vmem:[#allocation2 + $0x54] sm:$0xf] %vm1394_vm5, %v1341_v17  ;;  %v2790_v17 = vld [vmem:[%s3074_s19 + $0x79] sm:$0xff] }
 0x1fb   : > { %1548 = vrot.lane.b32.xlu1 %v1473_v16, %s3027_s25  ;;  %1546 = vrot.lane.b32.xlu0 %v1472_v5, %s3027_s25 }
 0x1fc   : > { %1759 = vrot.lane.b32.xlu2 %v1691_v22, %s3028_s26  ;;  %v1475_v22 = vpack.c.bf16 %v2765_v40, %v2765_v40 }
 0x1fd   : > { %v1327_v42 = vpop.permute.xlu1 %1326  ;;  %v1325_v23 = vpop.permute.xlu0 %1324 }
 0x1fe   : > { %1409 = vst.msk [vmem:[#allocation2 + $0x38] sm:$0xf] %vm1394_vm5, %v1327_v42  ;;  %v1347_v46 = vpop.permute.xlu2 %1346  ;;  %v1693_v42 = vpack.c.bf16 %v2790_v17, %v2790_v17 }
 0x1ff   : > { %1408 = vst.msk [vmem:[#allocation2 + $0x34] sm:$0xf] %vm1394_vm5, %v1325_v23 }
 0x200   : > { %1419 = vst.msk [vmem:[#allocation2 + $0x60] sm:$0xf] %vm1394_vm5, %v1347_v46 }
 0x203   : > { %1771 = vrot.lane.b32.xlu1 %v1697_v8, %s3028_s26  ;;  %1761 = vrot.lane.b32.xlu0 %v1692_v43, %s3028_s26  ;;  %v2797_v43 = vld [vmem:[%s3074_s19 + $0xc9] sm:$0xff] }
 0x204   : > { %1773 = vrot.lane.b32.xlu2 %v1698_v56, %s3028_s26 }
 0x205   : > { %v1333_v47 = vpop.permute.xlu1 %1332  ;;  %v1331_v29 = vpop.permute.xlu0 %1330 }
 0x206   : > { %1412 = vst.msk [vmem:[#allocation2 + $0x44] sm:$0xf] %vm1394_vm5, %v1333_v47  ;;  %v1353_v59 = vpop.permute.xlu2 %1352  ;;  %v1700_v47 = vpack.c.bf16 %v2797_v43, %v2797_v43  ;;  %v2774_v43 = vld [vmem:[%s3074_s19 + $0x138] sm:$0xff] }
 0x207   : > { %1411 = vst.msk [vmem:[#allocation2 + $0x40] sm:$0xf] %vm1394_vm5, %v1331_v29 }
 0x208   : > { %1422 = vst.msk [vmem:[#allocation2 + $0x6c] sm:$0xf] %vm1394_vm5, %v1353_v59 }
 0x20b   : > { %1986 = vrot.lane.b32.xlu1 %v3699_v10, %s3029_s27  ;;  %1984 = vrot.lane.b32.xlu0 %v3684_v54, %s3029_s27  ;;  %v1923_v10 = vpack.c.bf16 %v2827_v45, %v2827_v45  ;;  %v2141_v54 = vld [vmem:[%s4256_s1 + $0x10] sm:$0x3] }
 0x20c   : > { %1996 = vrot.lane.b32.xlu2 %v3720_v53, %s3029_s27  ;;  %v2231_v57 = vunpack.c.l.b16 %v2141_v54 }
 0x20d   : > { %v1339_v60 = vpop.permute.xlu1 %1338  ;;  %v1337_v1 = vpop.permute.xlu0 %1336 }
 0x20e   : > { %1415 = vst.msk [vmem:[#allocation2 + $0x50] sm:$0xf] %vm1394_vm5, %v1339_v60  ;;  %v1529_v49 = vpop.permute.xlu2 %1528  ;;  %v2234_v53 = vpack.c.b16 %v2231_v57, %v2231_v57  ;;  %v2804_v57 = vld [vmem:[%s3074_s19 + $0x121] sm:$0xff] }
 0x20f   : > { %1414 = vst.msk [vmem:[#allocation2 + $0x4c] sm:$0xf] %vm1394_vm5, %v1337_v1  ;;  %v2773_v1 = vld [vmem:[%s3074_s19 + $0x128] sm:$0xff] }
 0x210   : > { %1624 = vst.msk [vmem:[#allocation2 + $0x4] sm:$0xf] %vm1622_vm6, %v1529_v49  ;;  %v2288_v12 = vsel %vm2286_vm7, %v2234_v53, 0 }
 0x211   : > { %2295 = vmatpush.bf16.msra.mxu0 %v2288_v12  ;;  %2956 = vmatpush.bf16.msra.mxu1 %v2288_v12 }
 0x212   : > { %2957 = vmatpush.bf16.msra.mxu2 %v2288_v12  ;;  %2958 = vmatpush.bf16.msra.mxu3 %v2288_v12  ;;  %v2805_v12 = vld [vmem:[%s3074_s19 + $0x129] sm:$0xff] }
 0x213   : > { %1562 = vrot.lane.b32.xlu1 %v1480_v61, %s3027_s25  ;;  %1998 = vrot.lane.b32.xlu0 %v1923_v10, %s3029_s27  ;;  %v2778_v10 = vld [vmem:[%s3074_s19 + $0x168] sm:$0xff] }
 0x214   : > { %1564 = vrot.lane.b32.xlu2 %v1481_v33, %s3027_s25  ;;  %v1488_v53 = vpack.c.bf16 %v2778_v10, %v2778_v10 }
 0x215   : > { %v1345_v36 = vpop.permute.xlu1 %1344  ;;  %v1343_v39 = vpop.permute.xlu0 %1342  ;;  %2296 = vmatpush.bf16.msra.mxu0 %v2955_v38  ;;  %2959 = vmatpush.bf16.msra.mxu1 %v2955_v38 }
 0x216   : > { %1418 = vst.msk [vmem:[#allocation2 + $0x5c] sm:$0xf] %vm1394_vm5, %v1345_v36  ;;  %v1977_v48 = vpop.permute.xlu2 %1976  ;;  %2960 = vmatpush.bf16.msra.mxu2 %v2955_v38  ;;  %2961 = vmatpush.bf16.msra.mxu3 %v2955_v38  ;;  %v1708_v38 = vpack.c.bf16 %v2805_v12, %v2805_v12  ;;  %v2839_v12 = vld [vmem:[%s3074_s19 + $0x142] sm:$0xff] }
 0x217   : > { %1417 = vst.msk [vmem:[#allocation2 + $0x58] sm:$0xf] %vm1394_vm5, %v1343_v39 }
 0x219   : > { %2297 = vmatpush.bf16.msra.mxu0 %v2954_v41  ;;  %2962 = vmatpush.bf16.msra.mxu1 %v2954_v41 }
 0x21a   : > { %2963 = vmatpush.bf16.msra.mxu2 %v2954_v41  ;;  %2964 = vmatpush.bf16.msra.mxu3 %v2954_v41 }
 0x21b   : > { %1576 = vrot.lane.b32.xlu1 %v1487_v50, %s3027_s25  ;;  %1574 = vrot.lane.b32.xlu0 %v1486_v26, %s3027_s25  ;;  %v2811_v26 = vld [vmem:[%s3074_s19 + $0x171] sm:$0xff] }
 0x21c   : > { %1787 = vrot.lane.b32.xlu2 %v3606_v35, %s3028_s26 }
 0x21d   : > { %v1351_v30 = vpop.permute.xlu1 %1350  ;;  %v1349_v62 = vpop.permute.xlu0 %1348 }
 0x21e   : > { %1421 = vst.msk [vmem:[#allocation2 + $0x68] sm:$0xf] %vm1394_vm5, %v1351_v30  ;;  %v1533_v51 = vpop.permute.xlu2 %1532  ;;  %v1714_v30 = vpack.c.bf16 %v2811_v26, %v2811_v26  ;;  %v2845_v26 = vld [vmem:[%s3074_s19 + $0x18a] sm:$0xff] }
 0x21f   : > { %1420 = vst.msk [vmem:[#allocation2 + $0x64] sm:$0xf] %vm1394_vm5, %v1349_v62  ;;  %v2836_v62 = vld [vmem:[%s3074_s19 + $0x122] sm:$0xff] }
 0x220   : > { %1626 = vst.msk [vmem:[#allocation2 + $0xc] sm:$0xf] %vm1622_vm6, %v1533_v51  ;;  %v1932_v9 = vpack.c.bf16 %v2836_v62, %v2836_v62 }
 0x223   : > { %1799 = vrot.lane.b32.xlu1 %v3632_v37, %s3028_s26  ;;  %1789 = vrot.lane.b32.xlu0 %v3619_v15, %s3028_s26  ;;  %v2758_v15 = vld [vmem:[%s3074_s19 + $0x78] sm:$0xff] }
 0x224   : > { %1801 = vrot.lane.b32.xlu2 %v3643_v2, %s3028_s26  ;;  %v1468_v63 = vpack.c.bf16 %v2758_v15, %v2758_v15  ;;  %v2766_v15 = vld [vmem:[%s3074_s19 + $0xd8] sm:$0xff] }
 0x225   : > { %v1527_v7 = vpop.permute.xlu1 %1526  ;;  %v1355_v35 = vpop.permute.xlu0 %1354 }
 0x226   : > { %1623 = vst.msk [vmem:[#allocation2] sm:$0xf] %vm1622_vm6, %v1527_v7  ;;  %v1756_v14 = vpop.permute.xlu2 %1755 }
 0x227   : > { %1423 = vst.msk [vmem:[#allocation2 + $0x70] sm:$0xf] %vm1394_vm5, %v1355_v35  ;;  %v2842_v35 = vld [vmem:[%s3074_s19 + $0x16a] sm:$0xff] }
 0x22b   : > { %2014 = vrot.lane.b32.xlu1 %v3765_v55, %s3029_s27  ;;  %2012 = vrot.lane.b32.xlu0 %v3762_v34, %s3029_s27  ;;  %v1469_v34 = vpack.c.bf16 %v2759_v28, %v2759_v28 }
 0x22c   : > { %2024 = vrot.lane.b32.xlu2 %v1936_v58, %s3029_s27  ;;  %v1938_v58 = vpack.c.bf16 %v2842_v35, %v2842_v35 }
 0x22d   : > { %v1754_v37 = vpop.permute.xlu1 %1753  ;;  %v1752_v2 = vpop.permute.xlu0 %1751 }
 0x22e   : > { %1849 = vst.msk [vmem:[#allocation2 + $0x4] sm:$0xf] %vm1847_vm8, %v1754_v37  ;;  %v1770_v55 = vpop.permute.xlu2 %1769  ;;  %v2843_v37 = vld [vmem:[%s3074_s19 + $0x172] sm:$0xff] }
 0x22f   : > { %1848 = vst.msk [vmem:[#allocation2] sm:$0xf] %vm1847_vm8, %v1752_v2  ;;  %v1939_v40 = vpack.c.bf16 %v2843_v37, %v2843_v37 }
 0x230   : > { %2073 = vst.msk [vmem:[#allocation2] sm:$0xf] %vm2072_vm9, %v1977_v48  ;;  %v1713_v48 = vpack.c.bf16 %v2810_v27, %v2810_v27 }
 0x233   : > { %1538 = vrot.lane.b32.xlu1 %v1468_v63, %s3027_s25  ;;  %2026 = vrot.lane.b32.xlu0 %v3792_v18, %s3029_s27  ;;  %v2791_v18 = vld [vmem:[%s3074_s19 + $0x81] sm:$0xff] }
 0x234   : > { %1540 = vrot.lane.b32.xlu2 %v1469_v34, %s3027_s25  ;;  %v1694_v46 = vpack.c.bf16 %v2791_v18, %v2791_v18  ;;  %v1476_v34 = vpack.c.bf16 %v2766_v15, %v2766_v15  ;;  %v2783_v15 = vld [vmem:[%s3074_s19 + $0x1a0] sm:$0xff] }
 0x235   : > { %v1531_v16 = vpop.permute.xlu1 %1530  ;;  %v1979_v5 = vpop.permute.xlu0 %1978  ;;  %v1493_v37 = vpack.c.bf16 %v2783_v15, %v2783_v15 }
 0x236   : > { %1625 = vst.msk [vmem:[#allocation2 + $0x8] sm:$0xf] %vm1622_vm6, %v1531_v16  ;;  %v1993_v6 = vpop.permute.xlu2 %1992  ;;  %v2799_v16 = vld [vmem:[%s3074_s19 + $0xe1] sm:$0xff] }
 0x237   : > { %2074 = vst.msk [vmem:[#allocation2 + $0x4] sm:$0xf] %vm2072_vm9, %v1979_v5  ;;  %v2798_v5 = vld [vmem:[%s3074_s19 + $0xd9] sm:$0xff] }
 0x238   : > { %1850 = vst.msk [vmem:[#allocation2 + $0x8] sm:$0xf] %vm1847_vm8, %v1756_v14 }
 0x23b   : > { %1552 = vrot.lane.b32.xlu1 %v1475_v22, %s3027_s25  ;;  %1550 = vrot.lane.b32.xlu0 %v1474_v44, %s3027_s25  ;;  %v2830_v44 = vld [vmem:[%s3074_s19 + $0xda] sm:$0xff] }
 0x23c   : > { %1763 = vrot.lane.b32.xlu2 %v1693_v42, %s3028_s26  ;;  %v1701_v42 = vpack.c.bf16 %v2798_v5, %v2798_v5 }
 0x23d   : > { %v1545_v23 = vpop.permute.xlu1 %1544  ;;  %v1543_v21 = vpop.permute.xlu0 %1542 }
 0x23e   : > { %1632 = vst.msk [vmem:[#allocation2 + $0x24] sm:$0xf] %vm1622_vm6, %v1545_v23  ;;  %v2938_v8 = vld [vmem:[#allocation2] sm:$0xff]  ;;  %v1561_v56 = vpop.permute.xlu2 %1560  ;;  %v1926_v23 = vpack.c.bf16 %v2830_v44, %v2830_v44 }
 0x23f   : > { %1631 = vst.msk [vmem:[#allocation2 + $0x20] sm:$0xf] %vm1622_vm6, %v1543_v21  ;;  %2920 = vmatmul.msk.bf16.vlgmr.msra.gmra.mxu0 %vm2237_vm10, %v2938_v8 }
 0x240   : > { %1857 = vst.msk [vmem:[#allocation2 + $0x24] sm:$0xf] %vm1847_vm8, %v1770_v55  ;;  %v2767_v55 = vld [vmem:[%s3074_s19 + $0xe0] sm:$0xff] }
 0x241   : > { %1640 = vst.msk [vmem:[#allocation2 + $0x44] sm:$0xf] %vm1622_vm6, %v1561_v56  ;;  %v1477_v3 = vpack.c.bf16 %v2767_v55, %v2767_v55  ;;  %v1484_v56 = vpack.c.bf16 %v2774_v43, %v2774_v43 }
 0x243   : > { %1775 = vrot.lane.b32.xlu1 %v3579_v25, %s3028_s26  ;;  %1765 = vrot.lane.b32.xlu0 %v1694_v46, %s3028_s26  ;;  %v2772_v25 = vld [vmem:[%s3074_s19 + $0x120] sm:$0xff] }
 0x244   : > { %1777 = vrot.lane.b32.xlu2 %v1700_v47, %s3028_s26  ;;  %v1482_v24 = vpack.c.bf16 %v2772_v25, %v2772_v25  ;;  %v2780_v47 = vld [vmem:[%s3074_s19 + $0x180] sm:$0xff] }
 0x245   : > { %v1768_v29 = vpop.permute.xlu1 %1767  ;;  %v1758_v59 = vpop.permute.xlu0 %1757 }
 0x246   : > { %1856 = vst.msk [vmem:[#allocation2 + $0x20] sm:$0xf] %vm1847_vm8, %v1768_v29  ;;  %v2009_v20 = vpop.permute.xlu2 %2008  ;;  %v2775_v29 = vld [vmem:[%s3074_s19 + $0x140] sm:$0xff] }
 0x247   : > { %1851 = vst.msk [vmem:[#allocation2 + $0xc] sm:$0xf] %vm1847_vm8, %v1758_v59 }
 0x248   : > { %2081 = vst.msk [vmem:[#allocation2 + $0x20] sm:$0xf] %vm2072_vm9, %v1993_v6  ;;  %v1702_v6 = vpack.c.bf16 %v2799_v16, %v2799_v16  ;;  %v2846_v16 = vld [vmem:[%s3074_s19 + $0x19a] sm:$0xff] }
 0x249   : > { %v1942_v5 = vpack.c.bf16 %v2846_v16, %v2846_v16 }
 0x24b   : > { %1990 = vrot.lane.b32.xlu1 %v3702_v19, %s3029_s27  ;;  %1988 = vrot.lane.b32.xlu0 %v3697_v52, %s3029_s27  ;;  %v1483_v19 = vpack.c.bf16 %v2773_v1, %v2773_v1  ;;  %v2779_v52 = vld [vmem:[%s3074_s19 + $0x170] sm:$0xff]  ;;  %v1485_v1 = vpack.c.bf16 %v2775_v29, %v2775_v29 }
 0x24c   : > { %2000 = vrot.lane.b32.xlu2 %v3732_v11, %s3029_s27  ;;  %v1489_v33 = vpack.c.bf16 %v2779_v52, %v2779_v52 }
 0x24d   : > { %v1983_v45 = vpop.permute.xlu1 %1982  ;;  %v1981_v60 = vpop.permute.xlu0 %1980 }
 0x24e   : > { %2076 = vst.msk [vmem:[#allocation2 + $0xc] sm:$0xf] %vm2072_vm9, %v1983_v45  ;;  %v1537_v61 = vpop.permute.xlu2 %1536  ;;  %v2781_v45 = vld [vmem:[%s3074_s19 + $0x188] sm:$0xff] }
 0x24f   : > { %2075 = vst.msk [vmem:[#allocation2 + $0x8] sm:$0xf] %vm2072_vm9, %v1981_v60  ;;  %v1490_v60 = vpack.c.bf16 %v2780_v47, %v2780_v47 }
 0x250   : > { %1628 = vst.msk [vmem:[#allocation2 + $0x14] sm:$0xf] %vm1622_vm6, %v1537_v61  ;;  %v2807_v61 = vld [vmem:[%s3074_s19 + $0x141] sm:$0xff] }
 0x253   : > { %1566 = vrot.lane.b32.xlu1 %v1482_v24, %s3027_s25  ;;  %2002 = vrot.lane.b32.xlu0 %v3735_v4, %s3029_s27  ;;  %v1707_v4 = vpack.c.bf16 %v2804_v57, %v2804_v57 }
 0x254   : > { %1568 = vrot.lane.b32.xlu2 %v1483_v19, %s3027_s25  ;;  %v2806_v19 = vld [vmem:[%s3074_s19 + $0x139] sm:$0xff] }
 0x255   : > { %v1559_v11 = vpop.permute.xlu1 %1558  ;;  %v1995_v49 = vpop.permute.xlu0 %1994  ;;  %v1709_v57 = vpack.c.bf16 %v2806_v19, %v2806_v19 }
 0x256   : > { %1639 = vst.msk [vmem:[#allocation2 + $0x40] sm:$0xf] %vm1622_vm6, %v1559_v11  ;;  %v2939_v54 = vld [vmem:[#allocation2 + $0x8] sm:$0xff]  ;;  %v1760_v13 = vpop.permute.xlu2 %1759 }
 0x257   : > { %2082 = vst.msk [vmem:[#allocation2 + $0x24] sm:$0xf] %vm2072_vm9, %v1995_v49  ;;  %2921 = vmatmul.msk.bf16.gmra.mxu0 %vm2237_vm10, %v2939_v54  ;;  %v2812_v49 = vld [vmem:[%s3074_s19 + $0x181] sm:$0xff]  ;;  %v1710_v54 = vpack.c.bf16 %v2807_v61, %v2807_v61 }
 0x25b   : > { %1580 = vrot.lane.b32.xlu1 %v1489_v33, %s3027_s25  ;;  %1578 = vrot.lane.b32.xlu0 %v1488_v53, %s3027_s25  ;;  %v1715_v53 = vpack.c.bf16 %v2812_v49, %v2812_v49 }
 0x25c   : > { %1791 = vrot.lane.b32.xlu2 %v1707_v4, %s3028_s26 }
 0x25d   : > { %v1786_v36 = vpop.permute.xlu1 %1785  ;;  %v1784_v39 = vpop.permute.xlu0 %1783 }
 0x25e   : > { %1865 = vst.msk [vmem:[#allocation2 + $0x44] sm:$0xf] %vm1847_vm8, %v1786_v36  ;;  %v2942_v50 = vld [vmem:[#allocation2 + $0x20] sm:$0xff]  ;;  %v1774_v41 = vpop.permute.xlu2 %1773 }
 0x25f   : > { %1864 = vst.msk [vmem:[#allocation2 + $0x40] sm:$0xf] %vm1847_vm8, %v1784_v39  ;;  %2924 = vmatmul.msk.bf16.vlgmr.msra.gmra.mxu1 %vm2237_vm10, %v2942_v50  ;;  %v1935_v50 = vpack.c.bf16 %v2839_v12, %v2839_v12 }
 0x260   : > { %2089 = vst.msk [vmem:[#allocation2 + $0x40] sm:$0xf] %vm2072_vm9, %v2009_v20 }
 0x263   : > { %1803 = vrot.lane.b32.xlu1 %v1713_v48, %s3028_s26  ;;  %1793 = vrot.lane.b32.xlu0 %v1708_v38, %s3028_s26  ;;  %v2844_v48 = vld [vmem:[%s3074_s19 + $0x182] sm:$0xff] }
 0x264   : > { %1805 = vrot.lane.b32.xlu2 %v1714_v30, %s3028_s26  ;;  %v1941_v30 = vpack.c.bf16 %v2845_v26, %v2845_v26  ;;  %v1940_v62 = vpack.c.bf16 %v2844_v48, %v2844_v48 }
 0x265   : > { %v1535_v51 = vpop.permute.xlu1 %1534  ;;  %v2011_v7 = vpop.permute.xlu0 %2010 }
 0x266   : > { %1627 = vst.msk [vmem:[#allocation2 + $0x10] sm:$0xf] %vm1622_vm6, %v1535_v51  ;;  %v1997_v14 = vpop.permute.xlu2 %1996 }
 0x267   : > { %2090 = vst.msk [vmem:[#allocation2 + $0x44] sm:$0xf] %vm2072_vm9, %v2011_v7 }
 0x268   : > { %1852 = vst.msk [vmem:[#allocation2 + $0x10] sm:$0xf] %vm1847_vm8, %v1760_v13  ;;  %v2813_v13 = vld [vmem:[%s3074_s19 + $0x189] sm:$0xff] }
 0x269   : > { %v1716_v36 = vpack.c.bf16 %v2813_v13, %v2813_v13 }
 0x26b   : > { %2018 = vrot.lane.b32.xlu1 %v3777_v0, %s3029_s27  ;;  %2016 = vrot.lane.b32.xlu0 %v1932_v9, %s3029_s27 }
 0x26c   : > { %2028 = vrot.lane.b32.xlu2 %v1938_v58, %s3029_s27 }
 0x26d   : > { %v1549_v2 = vpop.permute.xlu1 %1548  ;;  %v1547_v28 = vpop.permute.xlu0 %1546 }
 0x26e   : > { %1634 = vst.msk [vmem:[#allocation2 + $0x2c] sm:$0xf] %vm1622_vm6, %v1549_v2  ;;  %v2946_v63 = vld [vmem:[#allocation2 + $0x40] sm:$0xff]  ;;  %v1565_v0 = vpop.permute.xlu2 %1564 }
 0x26f   : > { %1633 = vst.msk [vmem:[#allocation2 + $0x28] sm:$0xf] %vm1622_vm6, %v1547_v28  ;;  %2928 = vmatmul.msk.bf16.vlgmr.msra.gmra.mxu2 %vm2237_vm10, %v2946_v63  ;;  %v2814_v2 = vld [vmem:[%s3074_s19 + $0x199] sm:$0xff]  ;;  %v2815_v28 = vld [vmem:[%s3074_s19 + $0x1a1] sm:$0xff] }
 0x270   : > { %1859 = vst.msk [vmem:[#allocation2 + $0x2c] sm:$0xf] %vm1847_vm8, %v1774_v41 }
 0x271   : > { %1642 = vst.msk [vmem:[#allocation2 + $0x4c] sm:$0xf] %vm1622_vm6, %v1565_v0  ;;  %v1718_v0 = vpack.c.bf16 %v2815_v28, %v2815_v28 }
 0x273   : > { %1554 = vrot.lane.b32.xlu1 %v1476_v34, %s3027_s25  ;;  %2030 = vrot.lane.b32.xlu0 %v1939_v40, %s3029_s27 }
 0x274   : > { %1556 = vrot.lane.b32.xlu2 %v1477_v3, %s3027_s25 }
 0x275   : > { %v1772_v17 = vpop.permute.xlu1 %1771  ;;  %v1762_v22 = vpop.permute.xlu0 %1761 }
 0x276   : > { %1858 = vst.msk [vmem:[#allocation2 + $0x28] sm:$0xf] %vm1847_vm8, %v1772_v17  ;;  %v1788_v18 = vpop.permute.xlu2 %1787  ;;  %v2847_v17 = vld [vmem:[%s3074_s19 + $0x1a2] sm:$0xff] }
 0x277   : > { %1853 = vst.msk [vmem:[#allocation2 + $0x14] sm:$0xf] %vm1847_vm8, %v1762_v22 }
 0x278   : > { %2083 = vst.msk [vmem:[#allocation2 + $0x28] sm:$0xf] %vm2072_vm9, %v1997_v14 }
 0x27b   : > { %1781 = vrot.lane.b32.xlu1 %v1702_v6, %s3028_s26  ;;  %1779 = vrot.lane.b32.xlu0 %v1701_v42, %s3028_s26  ;;  %v1943_v6 = vpack.c.bf16 %v2847_v17, %v2847_v17 }
 0x27c   : > { %2004 = vrot.lane.b32.xlu2 %v1926_v23, %s3029_s27 }
 0x27d   : > { %v1987_v21 = vpop.permute.xlu1 %1986  ;;  %v1985_v8 = vpop.permute.xlu0 %1984 }
 0x27e   : > { %2078 = vst.msk [vmem:[#allocation2 + $0x14] sm:$0xf] %vm2072_vm9, %v1987_v21  ;;  %v1802_v46 = vpop.permute.xlu2 %1801 }
 0x27f   : > { %2077 = vst.msk [vmem:[#allocation2 + $0x10] sm:$0xf] %vm2072_vm9, %v1985_v8 }
 0x283   : > { %1356 = vrot.lane.b32.xlu1 %v1939_v40, %s3026_s24  ;;  %2006 = vrot.lane.b32.xlu0 %v3747_v31, %s3029_s27  ;;  %v1491_v31 = vpack.c.bf16 %v2781_v45, %v2781_v45  ;;  %v1717_v40 = vpack.c.bf16 %v2814_v2, %v2814_v2 }
 0x284   : > { %1570 = vrot.lane.b32.xlu2 %v1484_v56, %s3027_s25 }
 0x285   : > { %v1563_v59 = vpop.permute.xlu1 %1562  ;;  %v1999_v20 = vpop.permute.xlu0 %1998 }
 0x286   : > { %1641 = vst.msk [vmem:[#allocation2 + $0x48] sm:$0xf] %vm1622_vm6, %v1563_v59  ;;  %v2940_v25 = vld [vmem:[#allocation2 + $0x10] sm:$0xff]  ;;  %v2025_v24 = vpop.permute.xlu2 %2024 }
 0x287   : > { %2084 = vst.msk [vmem:[#allocation2 + $0x2c] sm:$0xf] %vm2072_vm9, %v1999_v20  ;;  %2922 = vmatmul.msk.bf16.gmra.mxu0 %vm2237_vm10, %v2940_v25 }
 0x288   : > { %1866 = vst.msk [vmem:[#allocation2 + $0x48] sm:$0xf] %vm1847_vm8, %v1788_v18 }
 0x28b   : > { %1582 = vrot.lane.b32.xlu1 %v1490_v60, %s3027_s25  ;;  %1572 = vrot.lane.b32.xlu0 %v1485_v1, %s3027_s25 }
 0x28c   : > { %1584 = vrot.lane.b32.xlu2 %v1491_v31, %s3027_s25 }
 0x28d   : > { %v1577_v52 = vpop.permute.xlu1 %1576  ;;  %v1575_v10 = vpop.permute.xlu0 %1574 }
 0x28e   : > { %1648 = vst.msk [vmem:[#allocation2 + $0x64] sm:$0xf] %vm1622_vm6, %v1577_v52  ;;  %v2943_v11 = vld [vmem:[#allocation2 + $0x28] sm:$0xff]  ;;  %v1541_v33 = vpop.permute.xlu2 %1540 }
 0x28f   : > { %1647 = vst.msk [vmem:[#allocation2 + $0x60] sm:$0xf] %vm1622_vm6, %v1575_v10  ;;  %2925 = vmatmul.msk.bf16.gmra.mxu1 %vm2237_vm10, %v2943_v11 }
 0x290   : > { %1873 = vst.msk [vmem:[#allocation2 + $0x64] sm:$0xf] %vm1847_vm8, %v1802_v46 }
 0x291   : > { %1630 = vst.msk [vmem:[#allocation2 + $0x1c] sm:$0xf] %vm1622_vm6, %v1541_v33 }
 0x293   : > { %1797 = vrot.lane.b32.xlu1 %v1710_v54, %s3028_s26  ;;  %1795 = vrot.lane.b32.xlu0 %v1709_v57, %s3028_s26 }
 0x294   : > { %1807 = vrot.lane.b32.xlu2 %v1715_v53, %s3028_s26 }
 0x295   : > { %v1800_v4 = vpop.permute.xlu1 %1799  ;;  %v1790_v27 = vpop.permute.xlu0 %1789 }
 0x296   : > { %1872 = vst.msk [vmem:[#allocation2 + $0x60] sm:$0xf] %vm1847_vm8, %v1800_v4  ;;  %v1764_v39 = vpop.permute.xlu2 %1763 }
 0x297   : > { %1867 = vst.msk [vmem:[#allocation2 + $0x4c] sm:$0xf] %vm1847_vm8, %v1790_v27 }
 0x298   : > { %2097 = vst.msk [vmem:[#allocation2 + $0x60] sm:$0xf] %vm2072_vm9, %v2025_v24 }
 0x29b   : > { %2020 = vrot.lane.b32.xlu1 %v3780_v32, %s3029_s27  ;;  %1809 = vrot.lane.b32.xlu0 %v1716_v36, %s3028_s26  ;;  %v2782_v32 = vld [vmem:[%s3074_s19 + $0x198] sm:$0xff] }
 0x29c   : > { %2022 = vrot.lane.b32.xlu2 %v1935_v50, %s3029_s27  ;;  %v1492_v14 = vpack.c.bf16 %v2782_v32, %v2782_v32 }
 0x29d   : > { %v2015_v38 = vpop.permute.xlu1 %2014  ;;  %v2013_v41 = vpop.permute.xlu0 %2012 }
 0x29e   : > { %2092 = vst.msk [vmem:[#allocation2 + $0x4c] sm:$0xf] %vm2072_vm9, %v2015_v38  ;;  %v1778_v51 = vpop.permute.xlu2 %1777 }
 0x29f   : > { %2091 = vst.msk [vmem:[#allocation2 + $0x48] sm:$0xf] %vm2072_vm9, %v2013_v41 }
 0x2a3   : > { %2034 = vrot.lane.b32.xlu1 %v1941_v30, %s3029_s27  ;;  %2032 = vrot.lane.b32.xlu0 %v1940_v62, %s3029_s27 }
 0x2a4   : > { %1358 = vrot.lane.b32.xlu2 %v1940_v62, %s3026_s24 }
 0x2a5   : > { %v1539_v7 = vpop.permute.xlu1 %1538  ;;  %v2027_v35 = vpop.permute.xlu0 %2026 }
 0x2a6   : > { %1629 = vst.msk [vmem:[#allocation2 + $0x18] sm:$0xf] %vm1622_vm6, %v1539_v7  ;;  %v2947_v9 = vld [vmem:[#allocation2 + $0x48] sm:$0xff]  ;;  %v2001_v58 = vpop.permute.xlu2 %2000 }
 0x2a7   : > { %2098 = vst.msk [vmem:[#allocation2 + $0x64] sm:$0xf] %vm2072_vm9, %v2027_v35  ;;  %2929 = vmatmul.msk.bf16.gmra.mxu2 %vm2237_vm10, %v2947_v9 }
 0x2a8   : > { %1854 = vst.msk [vmem:[#allocation2 + $0x18] sm:$0xf] %vm1847_vm8, %v1764_v39 }
 0x2ab   : > { %1360 = vrot.lane.b32.xlu0 %v1941_v30, %s3026_s24  ;;  %1586 = vrot.lane.b32.xlu1 %v1492_v14, %s3027_s25 }
 0x2ac   : > { %1588 = vrot.lane.b32.xlu2 %v1493_v37, %s3027_s25 }
 0x2ad   : > { %v1553_v63 = vpop.permute.xlu1 %1552  ;;  %v1551_v55 = vpop.permute.xlu0 %1550 }
 0x2ae   : > { %1636 = vst.msk [vmem:[#allocation2 + $0x34] sm:$0xf] %vm1622_vm6, %v1553_v63  ;;  %v2950_v34 = vld [vmem:[#allocation2 + $0x60] sm:$0xff]  ;;  %v1569_v3 = vpop.permute.xlu2 %1568 }
 0x2af   : > { %1635 = vst.msk [vmem:[#allocation2 + $0x30] sm:$0xf] %vm1622_vm6, %v1551_v55  ;;  %2932 = vmatmul.msk.bf16.vlgmr.msra.gmra.mxu3 %vm2237_vm10, %v2950_v34 }
 0x2b0   : > { %1861 = vst.msk [vmem:[#allocation2 + $0x34] sm:$0xf] %vm1847_vm8, %v1778_v51 }
 0x2b1   : > { %1644 = vst.msk [vmem:[#allocation2 + $0x54] sm:$0xf] %vm1622_vm6, %v1569_v3 }
 0x2b3   : > { %1811 = vrot.lane.b32.xlu0 %v1717_v40, %s3028_s26  ;;  %1813 = vrot.lane.b32.xlu1 %v1718_v0, %s3028_s26 }
 0x2b4   : > { %2036 = vrot.lane.b32.xlu2 %v1942_v5, %s3029_s27 }
 0x2b5   : > { %v1776_v22 = vpop.permute.xlu1 %1775  ;;  %v1766_v44 = vpop.permute.xlu0 %1765 }
 0x2b6   : > { %1860 = vst.msk [vmem:[#allocation2 + $0x30] sm:$0xf] %vm1847_vm8, %v1776_v22  ;;  %v1792_v42 = vpop.permute.xlu2 %1791 }
 0x2b7   : > { %1855 = vst.msk [vmem:[#allocation2 + $0x1c] sm:$0xf] %vm1847_vm8, %v1766_v44 }
 0x2b8   : > { %2085 = vst.msk [vmem:[#allocation2 + $0x30] sm:$0xf] %vm2072_vm9, %v2001_v58 }
 0x2bb   : > { %2038 = vrot.lane.b32.xlu0 %v1943_v6, %s3029_s27 }
 0x2bc   : > { %v2299_v58 = vpop.f32.mrf.mxu0 }
 0x2bd   : > { %v1991_v18 = vpop.permute.xlu1 %1990  ;;  %v1989_v23 = vpop.permute.xlu0 %1988  ;;  %v2451_v17 = vmul.f32 %v2299_v58, %v2299_v58  ;;  %v2380_v6 = vsel %vm2379_vm11, %v2299_v58, 0.0 }
 0x2be   : > { %2080 = vst.msk [vmem:[#allocation2 + $0x1c] sm:$0xf] %vm2072_vm9, %v1991_v18  ;;  %v1806_v21 = vpop.permute.xlu2 %1805 }
 0x2bf   : > { %2079 = vst.msk [vmem:[#allocation2 + $0x18] sm:$0xf] %vm2072_vm9, %v1989_v23 }
 0x2c4   : > { %v2301_v37 = vpop.f32.mrf.mxu0 }
 0x2c5   : > { %v1567_v8 = vpop.permute.xlu1 %1566  ;;  %v2003_v43 = vpop.permute.xlu0 %2002  ;;  %v2452_v5 = vmul.f32 %v2301_v37, %v2301_v37  ;;  %v2381_v22 = vsel %vm2379_vm11, %v2301_v37, 0.0 }
 0x2c6   : > { %1643 = vst.msk [vmem:[#allocation2 + $0x50] sm:$0xf] %vm1622_vm6, %v1567_v8  ;;  %v2941_v46 = vld [vmem:[#allocation2 + $0x18] sm:$0xff]  ;;  %v2029_v56 = vpop.permute.xlu2 %2028  ;;  %v2382_v8 = vadd.f32 %v2381_v22, %v2380_v6 }
 0x2c7   : > { %2086 = vst.msk [vmem:[#allocation2 + $0x34] sm:$0xf] %vm2072_vm9, %v2003_v43  ;;  %2923 = vmatmul.msk.bf16.gmra.mxu0 %vm2237_vm10, %v2941_v46  ;;  %v2483_v46 = vsel %vm2379_vm11, %v2451_v17, 0.0 }
 0x2c8   : > { %1868 = vst.msk [vmem:[#allocation2 + $0x50] sm:$0xf] %vm1847_vm8, %v1792_v42  ;;  %v2484_v42 = vsel %vm2379_vm11, %v2452_v5, 0.0 }
 0x2cd   : > { %v1581_v47 = vpop.permute.xlu1 %1580  ;;  %v1579_v29 = vpop.permute.xlu0 %1578 }
 0x2ce   : > { %1650 = vst.msk [vmem:[#allocation2 + $0x6c] sm:$0xf] %vm1622_vm6, %v1581_v47  ;;  %v2944_v59 = vld [vmem:[#allocation2 + $0x30] sm:$0xff]  ;;  %v1557_v20 = vpop.permute.xlu2 %1556 }
 0x2cf   : > { %1649 = vst.msk [vmem:[#allocation2 + $0x68] sm:$0xf] %vm1622_vm6, %v1579_v29  ;;  %2926 = vmatmul.msk.bf16.gmra.mxu1 %vm2237_vm10, %v2944_v59  ;;  %v2485_v59 = vadd.f32 %v2484_v42, %v2483_v46 }
 0x2d0   : > { %1875 = vst.msk [vmem:[#allocation2 + $0x6c] sm:$0xf] %vm1847_vm8, %v1806_v21 }
 0x2d1   : > { %1638 = vst.msk [vmem:[#allocation2 + $0x3c] sm:$0xf] %vm1622_vm6, %v1557_v20 }
 0x2d4   : > { %v2304_v28 = vpop.f32.mrf.mxu0 }
 0x2d5   : > { %v1804_v25 = vpop.permute.xlu1 %1803  ;;  %v1794_v45 = vpop.permute.xlu0 %1793  ;;  %v2453_v44 = vmul.f32 %v2304_v28, %v2304_v28  ;;  %v2383_v18 = vsel %vm2379_vm11, %v2304_v28, 0.0 }
 0x2d6   : > { %1874 = vst.msk [vmem:[#allocation2 + $0x68] sm:$0xf] %vm1847_vm8, %v1804_v25  ;;  %v2005_v60 = vpop.permute.xlu2 %2004  ;;  %v2384_v20 = vadd.f32 %v2383_v18, %v2382_v8 }
 0x2d7   : > { %1869 = vst.msk [vmem:[#allocation2 + $0x54] sm:$0xf] %vm1847_vm8, %v1794_v45 }
 0x2d8   : > { %2099 = vst.msk [vmem:[#allocation2 + $0x68] sm:$0xf] %vm2072_vm9, %v2029_v56  ;;  %v2486_v56 = vsel %vm2379_vm11, %v2453_v44, 0.0 }
 0x2dc   : > { %v2306_v63 = vpop.f32.mrf.mxu0  ;;  %v2319_v55 = vpop.f32.mrf.mxu1 }
 0x2dd   : > { %v2019_v1 = vpop.permute.xlu1 %2018  ;;  %v2017_v24 = vpop.permute.xlu0 %2016  ;;  %v2454_v23 = vmul.f32 %v2306_v63, %v2306_v63  ;;  %v2385_v47 = vsel %vm2379_vm11, %v2306_v63, 0.0 }
 0x2de   : > { %2094 = vst.msk [vmem:[#allocation2 + $0x54] sm:$0xf] %vm2072_vm9, %v2019_v1  ;;  %v1571_v31 = vpop.permute.xlu2 %1570  ;;  %v2487_v1 = vadd.f32 %v2486_v56, %v2485_v59 }
 0x2df   : > { %2093 = vst.msk [vmem:[#allocation2 + $0x50] sm:$0xf] %vm2072_vm9, %v2017_v24  ;;  %v2488_v25 = vsel %vm2379_vm11, %v2454_v23, 0.0  ;;  %v2386_v24 = vadd.f32 %v2385_v47, %v2384_v20 }
 0x2e0   : > { %1645 = vst.msk [vmem:[#allocation2 + $0x58] sm:$0xf] %vm1622_vm6, %v1571_v31 }
 0x2e4   : > { %v2321_v40 = vpop.f32.mrf.mxu1 }
 0x2e5   : > { %v1555_v61 = vpop.permute.xlu1 %1554  ;;  %v2031_v19 = vpop.permute.xlu0 %2030 }
 0x2e6   : > { %1637 = vst.msk [vmem:[#allocation2 + $0x38] sm:$0xf] %vm1622_vm6, %v1555_v61  ;;  %v2948_v52 = vld [vmem:[#allocation2 + $0x50] sm:$0xff]  ;;  %v1585_v10 = vpop.permute.xlu2 %1584 }
 0x2e7   : > { %2100 = vst.msk [vmem:[#allocation2 + $0x6c] sm:$0xf] %vm2072_vm9, %v2031_v19  ;;  %2930 = vmatmul.msk.bf16.gmra.mxu2 %vm2237_vm10, %v2948_v52 }
 0x2ed   : > { %v1782_v11 = vpop.permute.xlu1 %1781  ;;  %v1780_v49 = vpop.permute.xlu0 %1779 }
 0x2ee   : > { %1863 = vst.msk [vmem:[#allocation2 + $0x3c] sm:$0xf] %vm1847_vm8, %v1782_v11  ;;  %v2951_v54 = vld [vmem:[#allocation2 + $0x68] sm:$0xff]  ;;  %v1808_v57 = vpop.permute.xlu2 %1807 }
 0x2ef   : > { %1862 = vst.msk [vmem:[#allocation2 + $0x38] sm:$0xf] %vm1847_vm8, %v1780_v49  ;;  %2933 = vmatmul.msk.bf16.gmra.mxu3 %vm2237_vm10, %v2951_v54 }
 0x2f0   : > { %2087 = vst.msk [vmem:[#allocation2 + $0x38] sm:$0xf] %vm2072_vm9, %v2005_v60 }
 0x2f2   : > { %v4168_v43 = vpop.f32.mrf.mxu2 }
 0x2f5   : > { %v1357_v33 = vpop.permute.xlu1 %1356  ;;  %v2007_v53 = vpop.permute.xlu0 %2006 }
 0x2f6   : > { %1424 = vst.msk [vmem:[#allocation2 + $0x74] sm:$0xf] %vm1394_vm5, %v1357_v33  ;;  %v2023_v13 = vpop.permute.xlu2 %2022 }
 0x2f7   : > { %2088 = vst.msk [vmem:[#allocation2 + $0x3c] sm:$0xf] %vm2072_vm9, %v2007_v53 }
 0x2f8   : > { %1652 = vst.msk [vmem:[#allocation2 + $0x74] sm:$0xf] %vm1622_vm6, %v1585_v10  ;;  %v2489_v10 = vadd.f32 %v2488_v25, %v2487_v1 }
 0x2fd   : > { %v1583_v4 = vpop.permute.xlu1 %1582  ;;  %v1573_v27 = vpop.permute.xlu0 %1572 }
 0x2fe   : > { %1651 = vst.msk [vmem:[#allocation2 + $0x70] sm:$0xf] %vm1622_vm6, %v1583_v4  ;;  %v2945_v12 = vld [vmem:[#allocation2 + $0x38] sm:$0xff]  ;;  %v1359_v36 = vpop.permute.xlu2 %1358 }
 0x2ff   : > { %1646 = vst.msk [vmem:[#allocation2 + $0x5c] sm:$0xf] %vm1622_vm6, %v1573_v27  ;;  %2927 = vmatmul.msk.bf16.gmra.mxu1 %vm2237_vm10, %v2945_v12  ;;  %v2341_v12 = vpop.f32.mrf.mxu2 }
 0x300   : > { %1876 = vst.msk [vmem:[#allocation2 + $0x70] sm:$0xf] %vm1847_vm8, %v1808_v57 }
 0x301   : > { %1425 = vst.msk [vmem:[#allocation2 + $0x78] sm:$0xf] %vm1394_vm5, %v1359_v36 }
 0x304   : > { %v2309_v34 = vpop.f32.mrf.mxu0 }
 0x305   : > { %v1798_v39 = vpop.permute.xlu1 %1797  ;;  %v1796_v50 = vpop.permute.xlu0 %1795  ;;  %v2455_v29 = vmul.f32 %v2309_v34, %v2309_v34  ;;  %v2387_v45 = vsel %vm2379_vm11, %v2309_v34, 0.0 }
 0x306   : > { %1871 = vst.msk [vmem:[#allocation2 + $0x5c] sm:$0xf] %vm1847_vm8, %v1798_v39  ;;  %v1589_v62 = vpop.permute.xlu2 %1588  ;;  %v2388_v11 = vadd.f32 %v2387_v45, %v2386_v24 }
 0x307   : > { %1870 = vst.msk [vmem:[#allocation2 + $0x58] sm:$0xf] %vm1847_vm8, %v1796_v50  ;;  %v2490_v61 = vsel %vm2379_vm11, %v2455_v29, 0.0 }
 0x308   : > { %2096 = vst.msk [vmem:[#allocation2 + $0x5c] sm:$0xf] %vm2072_vm9, %v2023_v13  ;;  %v2491_v53 = vadd.f32 %v2490_v61, %v2489_v10  ;;  %v2467_v10 = vmul.f32 %v4168_v43, %v4168_v43 }
 0x30c   : > { %v2311_v0 = vpop.f32.mrf.mxu0  ;;  %v2324_v3 = vpop.f32.mrf.mxu1 }
 0x30d   : > { %v2021_v26 = vpop.permute.xlu1 %2020  ;;  %v1810_v48 = vpop.permute.xlu0 %1809  ;;  %v2456_v60 = vmul.f32 %v2311_v0, %v2311_v0  ;;  %v2389_v19 = vsel %vm2379_vm11, %v2311_v0, 0.0  ;;  %v2461_v37 = vmul.f32 %v2324_v3, %v2324_v3  ;;  %v2399_v28 = vsel %vm2379_vm11, %v2324_v3, 0.0 }
 0x30e   : > { %2095 = vst.msk [vmem:[#allocation2 + $0x58] sm:$0xf] %vm2072_vm9, %v2021_v26  ;;  %v2037_v35 = vpop.permute.xlu2 %2036  ;;  %v2390_v13 = vadd.f32 %v2389_v19, %v2388_v11 }
 0x30f   : > { %1877 = vst.msk [vmem:[#allocation2 + $0x74] sm:$0xf] %vm1847_vm8, %v1810_v48  ;;  %v2492_v49 = vsel %vm2379_vm11, %v2456_v60, 0.0  ;;  %v2502_v34 = vsel %vm2379_vm11, %v2461_v37, 0.0 }
 0x310   : > { %v2493_v36 = vadd.f32 %v2492_v49, %v2491_v53  ;;  %v2468_v53 = vmul.f32 %v2341_v12, %v2341_v12 }
 0x314   : > { %v2326_v21 = vpop.f32.mrf.mxu1 }
 0x315   : > { %v2035_v38 = vpop.permute.xlu1 %2034  ;;  %v2033_v41 = vpop.permute.xlu0 %2032  ;;  %v2949_v30 = vld [vmem:[#allocation2 + $0x58] sm:$0xff]  ;;  %v2401_v5 = vsel %vm2379_vm11, %v2326_v21, 0.0 }
 0x316   : > { %2102 = vst.msk [vmem:[#allocation2 + $0x74] sm:$0xf] %vm2072_vm9, %v2035_v38  ;;  %2931 = vmatmul.msk.bf16.gmra.mxu2 %vm2237_vm10, %v2949_v30  ;;  %v2459_v38 = vmul.f32 %v2319_v55, %v2319_v55  ;;  %v2395_v30 = vsel %vm2379_vm11, %v2319_v55, 0.0  ;;  %v2462_v55 = vmul.f32 %v2326_v21, %v2326_v21 }
 0x317   : > { %2101 = vst.msk [vmem:[#allocation2 + $0x70] sm:$0xf] %vm2072_vm9, %v2033_v41 }
 0x318   : > { %v2504_v44 = vsel %vm2379_vm11, %v2462_v55, 0.0 }
 0x31d   : > { %v1361_v51 = vpop.permute.xlu0 %1360  ;;  %v1587_v32 = vpop.permute.xlu1 %1586 }
 0x31e   : > { %1426 = vst.msk [vmem:[#allocation2 + $0x7c] sm:$0xf] %vm1394_vm5, %v1361_v51  ;;  %v2952_v7 = vld [vmem:[#allocation2 + $0x70] sm:$0xff]  ;;  %v2498_v51 = vsel %vm2379_vm11, %v2459_v38, 0.0 }
 0x31f   : > { %1653 = vst.msk [vmem:[#allocation2 + $0x78] sm:$0xf] %vm1622_vm6, %v1587_v32  ;;  %2934 = vmatmul.msk.bf16.gmra.mxu3 %vm2237_vm10, %v2952_v7  ;;  %v2460_v32 = vmul.f32 %v2321_v40, %v2321_v40 }
 0x320   : > { %1654 = vst.msk [vmem:[#allocation2 + $0x7c] sm:$0xf] %vm1622_vm6, %v1589_v62 }
 0x325   : > { %v1812_v9 = vpop.permute.xlu0 %1811  ;;  %v1814_v14 = vpop.permute.xlu1 %1813 }
 0x326   : > { %1878 = vst.msk [vmem:[#allocation2 + $0x78] sm:$0xf] %vm1847_vm8, %v1812_v9 }
 0x327   : > { %1879 = vst.msk [vmem:[#allocation2 + $0x7c] sm:$0xf] %vm1847_vm8, %v1814_v14  ;;  %v2397_v14 = vsel %vm2379_vm11, %v2321_v40, 0.0 }
 0x328   : > { %2103 = vst.msk [vmem:[#allocation2 + $0x78] sm:$0xf] %vm2072_vm9, %v2037_v35 }
 0x32a   : > { %v2344_v35 = vpop.f32.mrf.mxu2 }
 0x32b   : > { %v2415_v38 = vsel %vm2379_vm11, %v2344_v35, 0.0 }
 0x32d   : > { %v2039_v15 = vpop.permute.xlu0 %2038 }
 0x32e   : > { %2104 = vst.msk [vmem:[#allocation2 + $0x7c] sm:$0xf] %vm2072_vm9, %v2039_v15  ;;  %v2500_v15 = vsel %vm2379_vm11, %v2460_v32, 0.0 }
 0x332   : > { %v2346_v17 = vpop.f32.mrf.mxu2  ;;  %v4191_v18 = vpop.f32.mrf.mxu3 }
 0x333   : > { %v2417_v32 = vsel %vm2379_vm11, %v2346_v17, 0.0 }
 0x335   : > { %v2953_v2 = vld [vmem:[#allocation2 + $0x78] sm:$0xff] }
 0x336   : > { %2935 = vmatmul.msk.bf16.gmra.mxu3 %vm2237_vm10, %v2953_v2 }
 0x33a   : > { %v2361_v11 = vpop.f32.mrf.mxu3 }
 0x344   : > { %v2314_v16 = vpop.f32.mrf.mxu0 }
 0x345   : > { %v2457_v52 = vmul.f32 %v2314_v16, %v2314_v16  ;;  %v2391_v54 = vsel %vm2379_vm11, %v2314_v16, 0.0 }
 0x346   : > { %v2392_v39 = vadd.f32 %v2391_v54, %v2390_v13  ;;  %v2411_v54 = vsel %vm2379_vm11, %v4168_v43, 0.0  ;;  %v2470_v43 = vmul.f32 %v2346_v17, %v2346_v17 }
 0x347   : > { %v2494_v4 = vsel %vm2379_vm11, %v2457_v52, 0.0 }
 0x348   : > { %v2495_v26 = vadd.f32 %v2494_v4, %v2493_v36 }
 0x34c   : > { %v2316_v31 = vpop.f32.mrf.mxu0  ;;  %v2329_v33 = vpop.f32.mrf.mxu1 }
 0x34d   : > { %v2458_v57 = vmul.f32 %v2316_v31, %v2316_v31  ;;  %v2393_v27 = vsel %vm2379_vm11, %v2316_v31, 0.0  ;;  %v2463_v40 = vmul.f32 %v2329_v33, %v2329_v33  ;;  %v2403_v42 = vsel %vm2379_vm11, %v2329_v33, 0.0 }
 0x34e   : > { %v2394_v48 = vadd.f32 %v2393_v27, %v2392_v39  ;;  %v2514_v33 = vsel %vm2379_vm11, %v2467_v10, 0.0  ;;  %v2413_v27 = vsel %vm2379_vm11, %v2341_v12, 0.0  ;;  %v2516_v39 = vsel %vm2379_vm11, %v2468_v53, 0.0 }
 0x34f   : > { %v2496_v50 = vsel %vm2379_vm11, %v2458_v57, 0.0  ;;  %v2506_v3 = vsel %vm2379_vm11, %v2463_v40, 0.0 }
 0x350   : > { %v2497_v41 = vadd.f32 %v2496_v50, %v2495_v26  ;;  %v2396_v62 = vadd.f32 %v2395_v30, %v2394_v48  ;;  %v2469_v50 = vmul.f32 %v2344_v35, %v2344_v35 }
 0x352   : > { %v2499_v9 = vadd.f32 %v2498_v51, %v2497_v41  ;;  %v2398_v58 = vadd.f32 %v2397_v14, %v2396_v62  ;;  %v2518_v30 = vsel %vm2379_vm11, %v2469_v50, 0.0 }
 0x354   : > { %v2331_v7 = vpop.f32.mrf.mxu1  ;;  %v2501_v2 = vadd.f32 %v2500_v15, %v2499_v9  ;;  %v2400_v63 = vadd.f32 %v2399_v28, %v2398_v58  ;;  %v2520_v9 = vsel %vm2379_vm11, %v2470_v43, 0.0 }
 0x355   : > { %v2464_v8 = vmul.f32 %v2331_v7, %v2331_v7  ;;  %v2405_v29 = vsel %vm2379_vm11, %v2331_v7, 0.0 }
 0x356   : > { %v2503_v16 = vadd.f32 %v2502_v34, %v2501_v2  ;;  %v2402_v22 = vadd.f32 %v2401_v5, %v2400_v63 }
 0x357   : > { %v2508_v45 = vsel %vm2379_vm11, %v2464_v8, 0.0 }
 0x358   : > { %v2505_v6 = vadd.f32 %v2504_v44, %v2503_v16  ;;  %v2404_v23 = vadd.f32 %v2403_v42, %v2402_v22 }
 0x35a   : > { %v2507_v47 = vadd.f32 %v2506_v3, %v2505_v6  ;;  %v2406_v20 = vadd.f32 %v2405_v29, %v2404_v23 }
 0x35c   : > { %v2509_v24 = vadd.f32 %v2508_v45, %v2507_v47  ;;  %v2427_v47 = vsel %vm2379_vm11, %v4191_v18, 0.0 }
 0x36a   : > { %v2349_v25 = vpop.f32.mrf.mxu2 }
 0x36b   : > { %v2471_v12 = vmul.f32 %v2349_v25, %v2349_v25  ;;  %v2419_v58 = vsel %vm2379_vm11, %v2349_v25, 0.0  ;;  %v2429_v25 = vsel %vm2379_vm11, %v2361_v11, 0.0 }
 0x36d   : > { %v2522_v2 = vsel %vm2379_vm11, %v2471_v12, 0.0 }
 0x372   : > { %v2351_v13 = vpop.f32.mrf.mxu2  ;;  %v2364_v26 = vpop.f32.mrf.mxu3 }
 0x373   : > { %v2472_v35 = vmul.f32 %v2351_v13, %v2351_v13  ;;  %v2421_v55 = vsel %vm2379_vm11, %v2351_v13, 0.0 }
 0x375   : > { %v2524_v17 = vsel %vm2379_vm11, %v2472_v35, 0.0 }
 0x37a   : > { %v2366_v15 = vpop.f32.mrf.mxu3 }
 0x37b   : > { %v2478_v10 = vmul.f32 %v2366_v15, %v2366_v15 }
 0x37c   : > { %v2334_v0 = vpop.f32.mrf.mxu1 }
 0x37d   : > { %v2465_v46 = vmul.f32 %v2334_v0, %v2334_v0  ;;  %v2407_v21 = vsel %vm2379_vm11, %v2334_v0, 0.0 }
 0x37e   : > { %v2408_v31 = vadd.f32 %v2407_v21, %v2406_v20 }
 0x37f   : > { %v2510_v60 = vsel %vm2379_vm11, %v2465_v46, 0.0  ;;  %v2475_v46 = vmul.f32 %v4191_v18, %v4191_v18 }
 0x380   : > { %v2511_v19 = vadd.f32 %v2510_v60, %v2509_v24 }
 0x381   : > { %v2530_v21 = vsel %vm2379_vm11, %v2475_v46, 0.0 }
 0x384   : > { %v2336_v56 = vpop.f32.mrf.mxu1 }
 0x385   : > { %v2466_v59 = vmul.f32 %v2336_v56, %v2336_v56  ;;  %v2409_v1 = vsel %vm2379_vm11, %v2336_v56, 0.0 }
 0x386   : > { %v2410_v52 = vadd.f32 %v2409_v1, %v2408_v31  ;;  %v2477_v1 = vmul.f32 %v2364_v26, %v2364_v26 }
 0x387   : > { %v2512_v61 = vsel %vm2379_vm11, %v2466_v59, 0.0  ;;  %v2476_v59 = vmul.f32 %v2361_v11, %v2361_v11 }
 0x388   : > { %v2513_v49 = vadd.f32 %v2512_v61, %v2511_v19  ;;  %v2412_v57 = vadd.f32 %v2411_v54, %v2410_v52  ;;  %v2431_v61 = vsel %vm2379_vm11, %v2364_v26, 0.0  ;;  %v2534_v52 = vsel %vm2379_vm11, %v2477_v1, 0.0 }
 0x389   : > { %v2532_v60 = vsel %vm2379_vm11, %v2476_v59, 0.0 }
 0x38a   : > { %v2515_v4 = vadd.f32 %v2514_v33, %v2513_v49  ;;  %v2414_v36 = vadd.f32 %v2413_v27, %v2412_v57  ;;  %v2433_v49 = vsel %vm2379_vm11, %v2366_v15, 0.0  ;;  %v2536_v57 = vsel %vm2379_vm11, %v2478_v10, 0.0 }
 0x38c   : > { %v2517_v48 = vadd.f32 %v2516_v39, %v2515_v4  ;;  %v2416_v41 = vadd.f32 %v2415_v38, %v2414_v36 }
 0x38e   : > { %v2519_v62 = vadd.f32 %v2518_v30, %v2517_v48  ;;  %v2418_v7 = vadd.f32 %v2417_v32, %v2416_v41 }
 0x390   : > { %v2521_v14 = vadd.f32 %v2520_v9, %v2519_v62  ;;  %v2420_v37 = vadd.f32 %v2419_v58, %v2418_v7 }
 0x392   : > { %v2523_v63 = vadd.f32 %v2522_v2, %v2521_v14  ;;  %v2422_v5 = vadd.f32 %v2421_v55, %v2420_v37 }
 0x394   : > { %v2525_v6 = vadd.f32 %v2524_v17, %v2523_v63 }
 0x399   : > { %v2354_v51 = vpop.f32.mrf.mxu2 }
 0x39a   : > { %v2473_v28 = vmul.f32 %v2354_v51, %v2354_v51  ;;  %v2423_v0 = vsel %vm2379_vm11, %v2354_v51, 0.0 }
 0x39b   : > { %v2424_v40 = vadd.f32 %v2423_v0, %v2422_v5 }
 0x39c   : > { %v2526_v22 = vsel %vm2379_vm11, %v2473_v28, 0.0 }
 0x39d   : > { %v2527_v23 = vadd.f32 %v2526_v22, %v2525_v6 }
 0x3a1   : > { %v2356_v34 = vpop.f32.mrf.mxu2 }
 0x3a2   : > { %v2474_v16 = vmul.f32 %v2356_v34, %v2356_v34  ;;  %v2425_v44 = vsel %vm2379_vm11, %v2356_v34, 0.0  ;;  %v2369_v8 = vpop.f32.mrf.mxu3 }
 0x3a3   : > { %v2426_v3 = vadd.f32 %v2425_v44, %v2424_v40  ;;  %v2479_v33 = vmul.f32 %v2369_v8, %v2369_v8  ;;  %v2435_v13 = vsel %vm2379_vm11, %v2369_v8, 0.0 }
 0x3a4   : > { %v2528_v42 = vsel %vm2379_vm11, %v2474_v16, 0.0 }
 0x3a5   : > { %v2529_v56 = vadd.f32 %v2528_v42, %v2527_v23  ;;  %v2428_v29 = vadd.f32 %v2427_v47, %v2426_v3  ;;  %v2538_v27 = vsel %vm2379_vm11, %v2479_v33, 0.0 }
 0x3a7   : > { %v2531_v20 = vadd.f32 %v2530_v21, %v2529_v56  ;;  %v2430_v45 = vadd.f32 %v2429_v25, %v2428_v29 }
 0x3a9   : > { %v2533_v24 = vadd.f32 %v2532_v60, %v2531_v20  ;;  %v2432_v19 = vadd.f32 %v2431_v61, %v2430_v45 }
 0x3aa   : > { %v2371_v31 = vpop.f32.mrf.mxu3 }
 0x3ab   : > { %v2535_v18 = vadd.f32 %v2534_v52, %v2533_v24  ;;  %v2434_v54 = vadd.f32 %v2433_v49, %v2432_v19  ;;  %v2480_v36 = vmul.f32 %v2371_v31, %v2371_v31  ;;  %v2437_v26 = vsel %vm2379_vm11, %v2371_v31, 0.0 }
 0x3ad   : > { %v2537_v11 = vadd.f32 %v2536_v57, %v2535_v18  ;;  %v2436_v4 = vadd.f32 %v2435_v13, %v2434_v54  ;;  %v2540_v41 = vsel %vm2379_vm11, %v2480_v36, 0.0 }
 0x3af   : > { %v2539_v50 = vadd.f32 %v2538_v27, %v2537_v11  ;;  %v2438_v38 = vadd.f32 %v2437_v26, %v2436_v4 }
 0x3b1   : > { %v2541_v43 = vadd.f32 %v2540_v41, %v2539_v50 }
 0x3b9   : > { %v2374_v53 = vpop.f32.mrf.mxu3 }
 0x3ba   : > { %v2481_v39 = vmul.f32 %v2374_v53, %v2374_v53  ;;  %v2439_v48 = vsel %vm2379_vm11, %v2374_v53, 0.0 }
 0x3bb   : > { %v2440_v62 = vadd.f32 %v2439_v48, %v2438_v38 }
 0x3bc   : > { %v2542_v30 = vsel %vm2379_vm11, %v2481_v39, 0.0 }
 0x3bd   : > { %v2543_v9 = vadd.f32 %v2542_v30, %v2541_v43 }
 0x3c1   : > { %v2376_v51 = vpop.f32.mrf.mxu3 }
 0x3c2   : > { %v2441_v32 = vsel %vm2379_vm11, %v2376_v51, 0.0  ;;  %v2482_v7 = vmul.f32 %v2376_v51, %v2376_v51 }
 0x3c3   : > { %v2442_v12 = vadd.f32 %v2441_v32, %v2440_v62 }
 0x3c4   : > { %v2544_v14 = vsel %vm2379_vm11, %v2482_v7, 0.0 }
 0x3c5   : > { %v2443_v58 = vrot.slane %v2442_v12, 4  ;;  %v2545_v15 = vadd.f32 %v2544_v14, %v2543_v9 }
 0x3c7   : > { %v2444_v37 = vadd.f32 %v2443_v58, %v2442_v12  ;;  %v2546_v2 = vrot.slane %v2545_v15, 4 }
 0x3c9   : > { %v2445_v35 = vrot.slane %v2444_v37, 2  ;;  %v2547_v28 = vadd.f32 %v2546_v2, %v2545_v15 }
 0x3cb   : > { %v2446_v63 = vadd.f32 %v2445_v35, %v2444_v37  ;;  %v2548_v34 = vrot.slane %v2547_v28, 2 }
 0x3cd   : > { %v2447_v55 = vrot.slane %v2446_v63, 1  ;;  %v2549_v0 = vadd.f32 %v2548_v34, %v2547_v28 }
 0x3cf   : > { %v2448_v16 = vadd.f32 %v2447_v55, %v2446_v63  ;;  %v2550_v5 = vrot.slane %v2549_v0, 1 }
 0x3d1   : > { %2450 = vst.msk [vmem:[%s191_s9] sm:$0x1] %vm2449_vm12, %v2448_v16  ;;  %v2551_v17 = vadd.f32 %v2550_v5, %v2549_v0 }
 0x3d3   : > { %2552 = vst.msk [vmem:[%s196_s16] sm:$0x1] %vm2449_vm12, %v2551_v17 }
 0x3d4 PF: > { %s14_s14 = sadd.s32 1, %s3020_s14   ;;  %s4259_s12 = smov %s3016_s13 }
 0x3d5   : > { %p11_p5 = scmp.ge.s32.totalorder %s14_s14, 4   ;;  %s4260_s13 = smov %s4262_s15 }
 0x3d7   :  { %13 = sbr.rel (!%p11_p5) target bundleno = 2 (0x2), region = 73 }

// kernel: base_conv_forward.3
= control target key start
LH: loop header
LB: loop body
LE: loop exit
PB: predicated region body
PF: predicated region fallthrough
CT: control target
= control target key end

     0   :  { %s3040_s15 = smov 0   ;;  %s3042_s16 = smov 0   ;;  %s4316_s0 = inlined_call_operand.vmem [shape: f32[2,18,18,4], index: 0, kind: input, shape index: {}]   ;;  %s4317_s1 = inlined_call_operand.vmem [shape: bf16[36,8], index: 1, kind: input, shape index: {}]   ;;  %s4318_s2 = inlined_call_operand.vmem [shape: f32[1,8], index: 2, kind: input, shape index: {}]   ;;  %s4319_s3 = inlined_call_operand.vmem [shape: f32[1,8], index: 3, kind: input, shape index: {}]   ;;  %s4320_s4 = inlined_call_operand.vmem [shape: f32[2,256,8], index: 4, kind: output, shape index: {}]  }
   0x1   :  { %s3044_s17 = smov 0  }
   0x2 LB: > { %s26_s18 = sadd.s32 1, %s3001_s16  ;;  %p2634_p0 = scmp.ge.s32.totalorder %s3005_s17, 1  ;;  %s3005_s17 = sphi %s3044_s17, %s14_s17   ;;  %s3001_s16 = sphi %s3042_s16, %s4322_s16   ;;  %s2997_s15 = sphi %s3040_s15, %s4321_s15  }
   0x3   : > { %p28_p1 = scmp.ge.s32.totalorder %s26_s18, 2  ;;  %p176_p2 = scmp.lt.s32.totalorder %s3005_s17, 3 }
   0x5   : > { %s4324_s18 = smov (%p28_p1, %s26_s18), 0  ;;  %p177_p3 = pnand %p2634_p0, %p176_p2 }
   0x6   : > { %p206_p4 = scmp.lt.s32.totalorder (!%p177_p3), %s2997_s15, 1  ;;  %s3007_s23 = smov (!%p177_p3), 4  }
   0x7   : > { %180 = sbr.rel (%p177_p3) target bundleno = 963 (0x3c3), region = 36  ;;  %s3008_s24 = smov (!%p177_p3), 8  }
   0x8   : > { %s3009_s25 = smov (!%p177_p3), 12   ;;  %s3010_s26 = smov (!%p177_p3), 16  }
   0x9   : > { %s3011_s27 = smov (!%p177_p3), 20   ;;  %s3012_s28 = smov (!%p177_p3), 24  }
   0xa   : > { %s3013_s29 = smov (!%p177_p3), 28   ;;  %s3014_s30 = smov (!%p177_p3), 32  }
   0xc   : > { %s4326_s15 = smov (!%p206_p4, %s2997_s15), 1  ;;  %vm289_vm0 = vcmask 27648   ;;  %vm514_vm1 = vcmask 60448   ;;  %vm739_vm2 = vcmask 93248   ;;  %vm967_vm3 = vcmask 126048  }
   0xd   : > { %s2948_s19 = smul.u32 432, %s4326_s15  ;;  %vm1192_vm4 = vcmask 158848   ;;  %vm1417_vm5 = vcmask 191648   ;;  %vm1645_vm6 = vcmask 224448   ;;  %vm2309_vm7 = vcmask 1041408  }
   0xe   : > { %vm1870_vm8 = vcmask 257248   ;;  %vm2095_vm9 = vcmask 290048   ;;  %vm2260_vm10 = vcmask 293888   ;;  %vm2506_vm11 = vcmask 64512  }
   0xf   : > { %s3064_s22 = scalar_lea.vmem %s4316_s0, %s2948_s19  ;;  %s2920_s19 = sshll.u32 %s4326_s15, 8 }
  0x10   : > { %v324_v0 = vld [vmem:[%s3064_s22 + $0x19] sm:$0xff]  ;;  %v322_v1 = vld [vmem:[%s3064_s22 + $0x1] sm:$0xff]  ;;  %v326_v4 = vld [vmem:[%s3064_s22 + $0x31] sm:$0xff] }
  0x11   : > { %v3068_v2 = vpack.c.bf16 %v324_v0, %v324_v0  ;;  %v354_v3 = vpack.c.bf16 %v322_v1, %v322_v1  ;;  %v358_v5 = vpack.c.bf16 %v326_v4, %v326_v4  ;;  %v325_v6 = vld [vmem:[%s3064_s22 + $0x21] sm:$0xff]  ;;  %v323_v7 = vld [vmem:[%s3064_s22 + $0x9] sm:$0xff]  ;;  %v327_v8 = vld [vmem:[%s3064_s22 + $0x39] sm:$0xff] }
  0x12   : > { %v3078_v9 = vpack.c.bf16 %v325_v6, %v325_v6  ;;  %v355_v10 = vpack.c.bf16 %v323_v7, %v323_v7  ;;  %v3080_v11 = vpack.c.bf16 %v327_v8, %v327_v8  ;;  %v329_v12 = vld [vmem:[%s3064_s22 + $0x51] sm:$0xff]  ;;  %v328_v13 = vld [vmem:[%s3064_s22 + $0x49] sm:$0xff]  ;;  %v330_v14 = vld [vmem:[%s3064_s22 + $0x61] sm:$0xff] }
  0x13   : > { %422 = vrot.lane.b32.xlu1 %v3068_v2, %s3007_s23  ;;  %418 = vrot.lane.b32.xlu0 %v354_v3, %s3007_s23  ;;  %v361_v15 = vpack.c.bf16 %v329_v12, %v329_v12  ;;  %v3090_v16 = vpack.c.bf16 %v328_v13, %v328_v13  ;;  %v3092_v17 = vpack.c.bf16 %v330_v14, %v330_v14  ;;  %v332_v18 = vld [vmem:[%s3064_s22 + $0x79] sm:$0xff]  ;;  %v331_v19 = vld [vmem:[%s3064_s22 + $0x69] sm:$0xff] }
  0x14   : > { %426 = vrot.lane.b32.xlu2 %v358_v5, %s3007_s23  ;;  %v333_v20 = vld [vmem:[%s3064_s22 + $0x81] sm:$0xff]  ;;  %v364_v21 = vpack.c.bf16 %v332_v18, %v332_v18  ;;  %v3102_v22 = vpack.c.bf16 %v331_v19, %v331_v19  ;;  %v335_v24 = vld [vmem:[%s3064_s22 + $0x99] sm:$0xff]  ;;  %v334_v25 = vld [vmem:[%s3064_s22 + $0x91] sm:$0xff] }
  0x15   : > { %v3104_v23 = vpack.c.bf16 %v333_v20, %v333_v20  ;;  %v336_v26 = vld [vmem:[%s3064_s22 + $0xa9] sm:$0xff]  ;;  %v367_v27 = vpack.c.bf16 %v335_v24, %v335_v24  ;;  %v3114_v28 = vpack.c.bf16 %v334_v25, %v334_v25  ;;  %v338_v30 = vld [vmem:[%s3064_s22 + $0xc1] sm:$0xff]  ;;  %v337_v31 = vld [vmem:[%s3064_s22 + $0xb1] sm:$0xff] }
  0x16   : > { %v3116_v29 = vpack.c.bf16 %v336_v26, %v336_v26  ;;  %v339_v32 = vld [vmem:[%s3064_s22 + $0xc9] sm:$0xff]  ;;  %v370_v33 = vpack.c.bf16 %v338_v30, %v338_v30  ;;  %v3126_v34 = vpack.c.bf16 %v337_v31, %v337_v31  ;;  %v341_v36 = vld [vmem:[%s3064_s22 + $0xe1] sm:$0xff]  ;;  %v340_v37 = vld [vmem:[%s3064_s22 + $0xd9] sm:$0xff] }
  0x17   : > { %v3128_v35 = vpack.c.bf16 %v339_v32, %v339_v32  ;;  %v342_v38 = vld [vmem:[%s3064_s22 + $0xf1] sm:$0xff]  ;;  %v373_v39 = vpack.c.bf16 %v341_v36, %v341_v36  ;;  %v372_v40 = vpack.c.bf16 %v340_v37, %v340_v37  ;;  %v344_v42 = vld [vmem:[%s3064_s22 + $0x109] sm:$0xff]  ;;  %v343_v43 = vld [vmem:[%s3064_s22 + $0xf9] sm:$0xff] }
  0x18   : > { %v374_v41 = vpack.c.bf16 %v342_v38, %v342_v38  ;;  %v345_v44 = vld [vmem:[%s3064_s22 + $0x111] sm:$0xff]  ;;  %v376_v45 = vpack.c.bf16 %v344_v42, %v344_v42  ;;  %v375_v46 = vpack.c.bf16 %v343_v43, %v343_v43  ;;  %v347_v48 = vld [vmem:[%s3064_s22 + $0x129] sm:$0xff]  ;;  %v346_v49 = vld [vmem:[%s3064_s22 + $0x121] sm:$0xff] }
  0x19   : > { %v377_v47 = vpack.c.bf16 %v345_v44, %v345_v44  ;;  %v348_v50 = vld [vmem:[%s3064_s22 + $0x139] sm:$0xff]  ;;  %v379_v51 = vpack.c.bf16 %v347_v48, %v347_v48  ;;  %v378_v52 = vpack.c.bf16 %v346_v49, %v346_v49  ;;  %v350_v54 = vld [vmem:[%s3064_s22 + $0x151] sm:$0xff]  ;;  %v349_v55 = vld [vmem:[%s3064_s22 + $0x141] sm:$0xff] }
  0x1a   : > { %v380_v53 = vpack.c.bf16 %v348_v50, %v348_v50  ;;  %v351_v56 = vld [vmem:[%s3064_s22 + $0x159] sm:$0xff]  ;;  %v382_v57 = vpack.c.bf16 %v350_v54, %v350_v54  ;;  %v381_v58 = vpack.c.bf16 %v349_v55, %v349_v55  ;;  %v353_v60 = vld [vmem:[%s3064_s22 + $0x171] sm:$0xff]  ;;  %v352_v61 = vld [vmem:[%s3064_s22 + $0x169] sm:$0xff] }
  0x1b   : > { %424 = vrot.lane.b32.xlu1 %v3078_v9, %s3007_s23  ;;  %420 = vrot.lane.b32.xlu0 %v355_v10, %s3007_s23  ;;  %v383_v59 = vpack.c.bf16 %v351_v56, %v351_v56  ;;  %v547_v62 = vld [vmem:[%s3064_s22 + $0x2] sm:$0xff]  ;;  %v385_v63 = vpack.c.bf16 %v353_v60, %v353_v60  ;;  %v384_v0 = vpack.c.bf16 %v352_v61, %v352_v61  ;;  %v229_v4 = vld [vmem:[%s3064_s22 + $0x30] sm:$0xff] }
  0x1c   : > { %428 = vrot.lane.b32.xlu2 %v3080_v11, %s3007_s23  ;;  %v579_v1 = vpack.c.bf16 %v547_v62, %v547_v62  ;;  %v225_v3 = vld [vmem:[%s3064_s22] sm:$0xff]  ;;  %v548_v7 = vld [vmem:[%s3064_s22 + $0xa] sm:$0xff]  ;;  %v3168_v8 = vpack.c.bf16 %v229_v4, %v229_v4  ;;  %v227_v10 = vld [vmem:[%s3064_s22 + $0x18] sm:$0xff] }
  0x1d   : > { %v257_v5 = vpack.c.bf16 %v225_v3, %v225_v3  ;;  %v549_v6 = vld [vmem:[%s3064_s22 + $0x1a] sm:$0xff]  ;;  %v550_v12 = vld [vmem:[%s3064_s22 + $0x22] sm:$0xff]  ;;  %v3176_v13 = vpack.c.bf16 %v227_v10, %v227_v10  ;;  %v551_v24 = vld [vmem:[%s3064_s22 + $0x32] sm:$0xff] }
  0x1e   : > { %294 = vst.msk [vmem:[#allocation2 + $0x10] sm:$0xf] %vm289_vm0, %v3168_v8  ;;  %v581_v14 = vpack.c.bf16 %v549_v6, %v549_v6  ;;  %v582_v18 = vpack.c.bf16 %v550_v12, %v550_v12  ;;  %v230_v19 = vld [vmem:[%s3064_s22 + $0x38] sm:$0xff]  ;;  %v226_v20 = vld [vmem:[%s3064_s22 + $0x8] sm:$0xff]  ;;  %v233_v38 = vld [vmem:[%s3064_s22 + $0x60] sm:$0xff] }
  0x1f   : > { %290 = vst.msk [vmem:[#allocation2] sm:$0xf] %vm289_vm0, %v257_v5  ;;  %v3186_v25 = vpack.c.bf16 %v230_v19, %v230_v19  ;;  %v258_v26 = vpack.c.bf16 %v226_v20, %v226_v20  ;;  %v553_v30 = vld [vmem:[%s3064_s22 + $0x4a] sm:$0xff]  ;;  %v3205_v42 = vpack.c.bf16 %v233_v38, %v233_v38  ;;  %v557_v54 = vld [vmem:[%s3064_s22 + $0x7a] sm:$0xff]  ;;  %v562_v12 = vld [vmem:[%s3064_s22 + $0xb2] sm:$0xff] }
  0x20   : > { %292 = vst.msk [vmem:[#allocation2 + $0x8] sm:$0xf] %vm289_vm0, %v3176_v13  ;;  %v585_v37 = vpack.c.bf16 %v553_v30, %v553_v30  ;;  %v232_v44 = vld [vmem:[%s3064_s22 + $0x50] sm:$0xff]  ;;  %v589_v61 = vpack.c.bf16 %v557_v54, %v557_v54  ;;  %v560_v3 = vld [vmem:[%s3064_s22 + $0x9a] sm:$0xff] }
  0x21   : > { %295 = vst.msk [vmem:[#allocation2 + $0x14] sm:$0xf] %vm289_vm0, %v3186_v25  ;;  %v237_v4 = vld [vmem:[%s3064_s22 + $0x90] sm:$0xff]  ;;  %v238_v10 = vld [vmem:[%s3064_s22 + $0x98] sm:$0xff] }
  0x22   : > { %291 = vst.msk [vmem:[#allocation2 + $0x4] sm:$0xf] %vm289_vm0, %v258_v26  ;;  %v3258_v20 = vpack.c.bf16 %v237_v4, %v237_v4  ;;  %v564_v26 = vld [vmem:[%s3064_s22 + $0xca] sm:$0xff]  ;;  %v565_v38 = vld [vmem:[%s3064_s22 + $0xda] sm:$0xff]  ;;  %v570_v4 = vld [vmem:[%s3064_s22 + $0x112] sm:$0xff] }
  0x23   : > { %432 = vrot.lane.b32.xlu1 %v361_v15, %s3007_s23  ;;  %430 = vrot.lane.b32.xlu0 %v3090_v16, %s3007_s23  ;;  %v580_v15 = vpack.c.bf16 %v548_v7, %v548_v7  ;;  %298 = vst.msk [vmem:[#allocation2 + $0x20] sm:$0xf] %vm289_vm0, %v3205_v42  ;;  %v240_v30 = vld [vmem:[%s3064_s22 + $0xb0] sm:$0xff] }
  0x24   : > { %434 = vrot.lane.b32.xlu2 %v3092_v17, %s3007_s23  ;;  %302 = vst.msk [vmem:[#allocation2 + $0x30] sm:$0xf] %vm289_vm0, %v3258_v20 }
  0x2b   : > { %438 = vrot.lane.b32.xlu1 %v364_v21, %s3007_s23  ;;  %436 = vrot.lane.b32.xlu0 %v3102_v22, %s3007_s23  ;;  %v552_v21 = vld [vmem:[%s3064_s22 + $0x3a] sm:$0xff] }
  0x2c   : > { %440 = vrot.lane.b32.xlu2 %v3104_v23, %s3007_s23  ;;  %v584_v32 = vpack.c.bf16 %v552_v21, %v552_v21  ;;  %v3261_v21 = vpack.c.bf16 %v562_v12, %v562_v12 }
  0x33   : > { %444 = vrot.lane.b32.xlu1 %v367_v27, %s3007_s23  ;;  %442 = vrot.lane.b32.xlu0 %v3114_v28, %s3007_s23  ;;  %v228_v27 = vld [vmem:[%s3064_s22 + $0x20] sm:$0xff] }
  0x34   : > { %446 = vrot.lane.b32.xlu2 %v3116_v29, %s3007_s23  ;;  %v3193_v31 = vpack.c.bf16 %v228_v27, %v228_v27  ;;  %v563_v27 = vld [vmem:[%s3064_s22 + $0xc2] sm:$0xff] }
  0x36   : > { %293 = vst.msk [vmem:[#allocation2 + $0xc] sm:$0xf] %vm289_vm0, %v3193_v31 }
  0x3b   : > { %450 = vrot.lane.b32.xlu1 %v370_v33, %s3007_s23  ;;  %448 = vrot.lane.b32.xlu0 %v3126_v34, %s3007_s23  ;;  %v583_v33 = vpack.c.bf16 %v551_v24, %v551_v24  ;;  %v242_v24 = vld [vmem:[%s3064_s22 + $0xc8] sm:$0xff] }
  0x3c   : > { %452 = vrot.lane.b32.xlu2 %v3128_v35, %s3007_s23 }
  0x43   : > { %456 = vrot.lane.b32.xlu1 %v373_v39, %s3007_s23  ;;  %454 = vrot.lane.b32.xlu0 %v372_v40, %s3007_s23  ;;  %v231_v39 = vld [vmem:[%s3064_s22 + $0x48] sm:$0xff] }
  0x44   : > { %458 = vrot.lane.b32.xlu2 %v374_v41, %s3007_s23  ;;  %v555_v40 = vld [vmem:[%s3064_s22 + $0x62] sm:$0xff]  ;;  %v554_v41 = vld [vmem:[%s3064_s22 + $0x52] sm:$0xff]  ;;  %v3207_v43 = vpack.c.bf16 %v231_v39, %v231_v39 }
  0x45   : > { %v586_v48 = vpack.c.bf16 %v554_v41, %v554_v41  ;;  %v595_v41 = vpack.c.bf16 %v563_v27, %v563_v27 }
  0x46   : > { %296 = vst.msk [vmem:[#allocation2 + $0x18] sm:$0xf] %vm289_vm0, %v3207_v43 }
  0x4b   : > { %462 = vrot.lane.b32.xlu1 %v376_v45, %s3007_s23  ;;  %460 = vrot.lane.b32.xlu0 %v375_v46, %s3007_s23  ;;  %v556_v45 = vld [vmem:[%s3064_s22 + $0x6a] sm:$0xff]  ;;  %v3214_v46 = vpack.c.bf16 %v232_v44, %v232_v44 }
  0x4c   : > { %464 = vrot.lane.b32.xlu2 %v377_v47, %s3007_s23  ;;  %v587_v47 = vpack.c.bf16 %v555_v40, %v555_v40  ;;  %v588_v50 = vpack.c.bf16 %v556_v45, %v556_v45  ;;  %v596_v40 = vpack.c.bf16 %v564_v26, %v564_v26  ;;  %v3285_v45 = vpack.c.bf16 %v240_v30, %v240_v30 }
  0x4d   : > { %297 = vst.msk [vmem:[#allocation2 + $0x1c] sm:$0xf] %vm289_vm0, %v3214_v46  ;;  %v602_v26 = vpack.c.bf16 %v570_v4, %v570_v4  ;;  %v575_v4 = vld [vmem:[%s3064_s22 + $0x152] sm:$0xff] }
  0x4e   : > { %305 = vst.msk [vmem:[#allocation2 + $0x3c] sm:$0xf] %vm289_vm0, %v3285_v45 }
  0x53   : > { %468 = vrot.lane.b32.xlu1 %v379_v51, %s3007_s23  ;;  %466 = vrot.lane.b32.xlu0 %v378_v52, %s3007_s23  ;;  %v236_v51 = vld [vmem:[%s3064_s22 + $0x80] sm:$0xff]  ;;  %v234_v52 = vld [vmem:[%s3064_s22 + $0x68] sm:$0xff] }
  0x54   : > { %470 = vrot.lane.b32.xlu2 %v380_v53, %s3007_s23  ;;  %v558_v53 = vld [vmem:[%s3064_s22 + $0x82] sm:$0xff]  ;;  %v3227_v55 = vpack.c.bf16 %v236_v51, %v236_v51  ;;  %v3229_v56 = vpack.c.bf16 %v234_v52, %v234_v52  ;;  %v243_v51 = vld [vmem:[%s3064_s22 + $0xd8] sm:$0xff] }
  0x55   : > { %v590_v60 = vpack.c.bf16 %v558_v53, %v558_v53 }
  0x56   : > { %301 = vst.msk [vmem:[#allocation2 + $0x2c] sm:$0xf] %vm289_vm0, %v3227_v55 }
  0x57   : > { %299 = vst.msk [vmem:[#allocation2 + $0x24] sm:$0xf] %vm289_vm0, %v3229_v56 }
  0x5b   : > { %474 = vrot.lane.b32.xlu1 %v382_v57, %s3007_s23  ;;  %472 = vrot.lane.b32.xlu0 %v381_v58, %s3007_s23  ;;  %v235_v57 = vld [vmem:[%s3064_s22 + $0x78] sm:$0xff] }
  0x5c   : > { %476 = vrot.lane.b32.xlu2 %v383_v59, %s3007_s23  ;;  %v559_v58 = vld [vmem:[%s3064_s22 + $0x92] sm:$0xff]  ;;  %v3236_v59 = vpack.c.bf16 %v235_v57, %v235_v57  ;;  %v244_v57 = vld [vmem:[%s3064_s22 + $0xe0] sm:$0xff] }
  0x5e   : > { %300 = vst.msk [vmem:[#allocation2 + $0x28] sm:$0xf] %vm289_vm0, %v3236_v59 }
  0x63   : > { %480 = vrot.lane.b32.xlu1 %v385_v63, %s3007_s23  ;;  %478 = vrot.lane.b32.xlu0 %v384_v0, %s3007_s23  ;;  %v591_v63 = vpack.c.bf16 %v559_v58, %v559_v58  ;;  %v239_v0 = vld [vmem:[%s3064_s22 + $0xa8] sm:$0xff]  ;;  %v568_v58 = vld [vmem:[%s3064_s22 + $0xfa] sm:$0xff] }
  0x64   : > { %643 = vrot.lane.b32.xlu2 %v579_v1, %s3008_s24  ;;  %v561_v1 = vld [vmem:[%s3064_s22 + $0xaa] sm:$0xff]  ;;  %v3250_v7 = vpack.c.bf16 %v239_v0, %v239_v0  ;;  %v3312_v0 = vpack.c.bf16 %v243_v51, %v243_v51  ;;  %v574_v51 = vld [vmem:[%s3064_s22 + $0x142] sm:$0xff] }
  0x66   : > { %304 = vst.msk [vmem:[#allocation2 + $0x38] sm:$0xf] %vm289_vm0, %v3250_v7 }
  0x67   : > { %308 = vst.msk [vmem:[#allocation2 + $0x48] sm:$0xf] %vm289_vm0, %v3312_v0 }
  0x6b   : > { %647 = vrot.lane.b32.xlu1 %v581_v14, %s3008_s24  ;;  %645 = vrot.lane.b32.xlu0 %v580_v15, %s3008_s24  ;;  %v3255_v14 = vpack.c.bf16 %v238_v10, %v238_v10  ;;  %v593_v15 = vpack.c.bf16 %v561_v1, %v561_v1  ;;  %v3315_v1 = vpack.c.bf16 %v568_v58, %v568_v58 }
  0x6c   : > { %649 = vrot.lane.b32.xlu2 %v582_v18, %s3008_s24  ;;  %v592_v18 = vpack.c.bf16 %v560_v3, %v560_v3  ;;  %v248_v3 = vld [vmem:[%s3064_s22 + $0x110] sm:$0xff] }
  0x6d   : > { %303 = vst.msk [vmem:[#allocation2 + $0x34] sm:$0xf] %vm289_vm0, %v3255_v14 }
  0x6e   : > { %v427_v36 = vpop.permute.xlu2 %426 }
  0x6f   : > { %519 = vst.msk [vmem:[#allocation2 + $0x10] sm:$0xf] %vm514_vm1, %v427_v36  ;;  %v3277_v36 = vpack.c.bf16 %v242_v24, %v242_v24 }
  0x71   : > { %307 = vst.msk [vmem:[#allocation2 + $0x44] sm:$0xf] %vm289_vm0, %v3277_v36 }
  0x73   : > { %653 = vrot.lane.b32.xlu1 %v584_v32, %s3008_s24  ;;  %651 = vrot.lane.b32.xlu0 %v583_v33, %s3008_s24 }
  0x74   : > { %655 = vrot.lane.b32.xlu2 %v585_v37, %s3008_s24  ;;  %v241_v37 = vld [vmem:[%s3064_s22 + $0xc0] sm:$0xff] }
  0x75   : > { %v3282_v39 = vpack.c.bf16 %v241_v37, %v241_v37  ;;  %v251_v37 = vld [vmem:[%s3064_s22 + $0x138] sm:$0xff] }
  0x76   : > { %v429_v49 = vpop.permute.xlu2 %428 }
  0x77   : > { %520 = vst.msk [vmem:[#allocation2 + $0x14] sm:$0xf] %vm514_vm1, %v429_v49  ;;  %v567_v49 = vld [vmem:[%s3064_s22 + $0xf2] sm:$0xff] }
  0x78   : > { %306 = vst.msk [vmem:[#allocation2 + $0x40] sm:$0xf] %vm289_vm0, %v3282_v39 }
  0x7b   : > { %659 = vrot.lane.b32.xlu1 %v587_v47, %s3008_s24  ;;  %657 = vrot.lane.b32.xlu0 %v586_v48, %s3008_s24  ;;  %v3288_v47 = vpack.c.bf16 %v565_v38, %v565_v38  ;;  %v245_v48 = vld [vmem:[%s3064_s22 + $0xf0] sm:$0xff]  ;;  %v573_v38 = vld [vmem:[%s3064_s22 + $0x13a] sm:$0xff] }
  0x7c   : > { %661 = vrot.lane.b32.xlu2 %v588_v50, %s3008_s24  ;;  %v566_v50 = vld [vmem:[%s3064_s22 + $0xe2] sm:$0xff]  ;;  %v3304_v54 = vpack.c.bf16 %v245_v48, %v245_v48 }
  0x7e   : > { %v435_v62 = vpop.permute.xlu2 %434  ;;  %310 = vst.msk [vmem:[#allocation2 + $0x50] sm:$0xf] %vm289_vm0, %v3304_v54 }
  0x7f   : > { %523 = vst.msk [vmem:[#allocation2 + $0x20] sm:$0xf] %vm514_vm1, %v435_v62  ;;  %v598_v62 = vpack.c.bf16 %v566_v50, %v566_v50  ;;  %v250_v50 = vld [vmem:[%s3064_s22 + $0x128] sm:$0xff] }
  0x83   : > { %665 = vrot.lane.b32.xlu1 %v590_v60, %s3008_s24  ;;  %663 = vrot.lane.b32.xlu0 %v589_v61, %s3008_s24  ;;  %v3309_v60 = vpack.c.bf16 %v244_v57, %v244_v57  ;;  %v599_v61 = vpack.c.bf16 %v567_v49, %v567_v49  ;;  %v3358_v49 = vpack.c.bf16 %v251_v37, %v251_v37 }
  0x84   : > { %667 = vrot.lane.b32.xlu2 %v591_v63, %s3008_s24 }
  0x85   : > { %v423_v5 = vpop.permute.xlu1 %422  ;;  %v419_v6 = vpop.permute.xlu0 %418  ;;  %309 = vst.msk [vmem:[#allocation2 + $0x4c] sm:$0xf] %vm289_vm0, %v3309_v60 }
  0x86   : > { %517 = vst.msk [vmem:[#allocation2 + $0x8] sm:$0xf] %vm514_vm1, %v423_v5  ;;  %v441_v19 = vpop.permute.xlu2 %440  ;;  %v569_v5 = vld [vmem:[%s3064_s22 + $0x10a] sm:$0xff] }
  0x87   : > { %515 = vst.msk [vmem:[#allocation2] sm:$0xf] %vm514_vm1, %v419_v6  ;;  %v246_v6 = vld [vmem:[%s3064_s22 + $0xf8] sm:$0xff]  ;;  %v601_v27 = vpack.c.bf16 %v569_v5, %v569_v5  ;;  %v252_v5 = vld [vmem:[%s3064_s22 + $0x140] sm:$0xff] }
  0x88   : > { %526 = vst.msk [vmem:[#allocation2 + $0x2c] sm:$0xf] %vm514_vm1, %v441_v19  ;;  %v571_v19 = vld [vmem:[%s3064_s22 + $0x122] sm:$0xff] }
  0x89   : > { %316 = vst.msk [vmem:[#allocation2 + $0x68] sm:$0xf] %vm289_vm0, %v3358_v49 }
  0x8b   : > { %671 = vrot.lane.b32.xlu1 %v593_v15, %s3008_s24  ;;  %669 = vrot.lane.b32.xlu0 %v592_v18, %s3008_s24  ;;  %v3331_v15 = vpack.c.bf16 %v248_v3, %v248_v3  ;;  %v247_v18 = vld [vmem:[%s3064_s22 + $0x108] sm:$0xff]  ;;  %v576_v3 = vld [vmem:[%s3064_s22 + $0x15a] sm:$0xff] }
  0x8c   : > { %673 = vrot.lane.b32.xlu2 %v3261_v21, %s3008_s24  ;;  %v3336_v24 = vpack.c.bf16 %v247_v18, %v247_v18  ;;  %v253_v18 = vld [vmem:[%s3064_s22 + $0x150] sm:$0xff] }
  0x8d   : > { %v425_v32 = vpop.permute.xlu1 %424  ;;  %v421_v33 = vpop.permute.xlu0 %420  ;;  %313 = vst.msk [vmem:[#allocation2 + $0x5c] sm:$0xf] %vm289_vm0, %v3331_v15 }
  0x8e   : > { %518 = vst.msk [vmem:[#allocation2 + $0xc] sm:$0xf] %vm514_vm1, %v425_v32  ;;  %v447_v44 = vpop.permute.xlu2 %446  ;;  %v3339_v32 = vpack.c.bf16 %v246_v6, %v246_v6 }
  0x8f   : > { %516 = vst.msk [vmem:[#allocation2 + $0x4] sm:$0xf] %vm514_vm1, %v421_v33  ;;  %v3342_v33 = vpack.c.bf16 %v571_v19, %v571_v19  ;;  %v577_v19 = vld [vmem:[%s3064_s22 + $0x16a] sm:$0xff] }
  0x90   : > { %529 = vst.msk [vmem:[#allocation2 + $0x38] sm:$0xf] %vm514_vm1, %v447_v44 }
  0x91   : > { %312 = vst.msk [vmem:[#allocation2 + $0x58] sm:$0xf] %vm289_vm0, %v3336_v24 }
  0x92   : > { %311 = vst.msk [vmem:[#allocation2 + $0x54] sm:$0xf] %vm289_vm0, %v3339_v32 }
  0x93   : > { %677 = vrot.lane.b32.xlu1 %v596_v40, %s3008_s24  ;;  %675 = vrot.lane.b32.xlu0 %v595_v41, %s3008_s24  ;;  %v572_v40 = vld [vmem:[%s3064_s22 + $0x12a] sm:$0xff]  ;;  %v249_v41 = vld [vmem:[%s3064_s22 + $0x120] sm:$0xff] }
  0x94   : > { %679 = vrot.lane.b32.xlu2 %v3288_v47, %s3008_s24  ;;  %v604_v57 = vpack.c.bf16 %v572_v40, %v572_v40  ;;  %v3398_v40 = vpack.c.bf16 %v577_v19, %v577_v19 }
  0x95   : > { %v433_v52 = vpop.permute.xlu1 %432  ;;  %v431_v53 = vpop.permute.xlu0 %430 }
  0x96   : > { %522 = vst.msk [vmem:[#allocation2 + $0x1c] sm:$0xf] %vm514_vm1, %v433_v52  ;;  %v453_v63 = vpop.permute.xlu2 %452  ;;  %v3363_v52 = vpack.c.bf16 %v250_v50, %v250_v50 }
  0x97   : > { %521 = vst.msk [vmem:[#allocation2 + $0x18] sm:$0xf] %vm514_vm1, %v431_v53  ;;  %v605_v53 = vpack.c.bf16 %v573_v38, %v573_v38  ;;  %v3395_v38 = vpack.c.bf16 %v252_v5, %v252_v5 }
  0x98   : > { %532 = vst.msk [vmem:[#allocation2 + $0x44] sm:$0xf] %vm514_vm1, %v453_v63  ;;  %v254_v63 = vld [vmem:[%s3064_s22 + $0x158] sm:$0xff] }
  0x99   : > { %315 = vst.msk [vmem:[#allocation2 + $0x64] sm:$0xf] %vm289_vm0, %v3363_v52 }
  0x9a   : > { %317 = vst.msk [vmem:[#allocation2 + $0x6c] sm:$0xf] %vm289_vm0, %v3395_v38 }
  0x9b   : > { %683 = vrot.lane.b32.xlu1 %v599_v61, %s3008_s24  ;;  %681 = vrot.lane.b32.xlu0 %v598_v62, %s3008_s24  ;;  %v3366_v61 = vpack.c.bf16 %v249_v41, %v249_v41  ;;  %v3369_v62 = vpack.c.bf16 %v574_v51, %v574_v51  ;;  %v255_v41 = vld [vmem:[%s3064_s22 + $0x168] sm:$0xff]  ;;  %v256_v51 = vld [vmem:[%s3064_s22 + $0x170] sm:$0xff] }
  0x9c   : > { %685 = vrot.lane.b32.xlu2 %v3315_v1, %s3008_s24 }
  0x9d   : > { %v439_v10 = vpop.permute.xlu1 %438  ;;  %v437_v12 = vpop.permute.xlu0 %436  ;;  %314 = vst.msk [vmem:[#allocation2 + $0x60] sm:$0xf] %vm289_vm0, %v3366_v61 }
  0x9e   : > { %525 = vst.msk [vmem:[#allocation2 + $0x28] sm:$0xf] %vm514_vm1, %v439_v10  ;;  %v459_v30 = vpop.permute.xlu2 %458 }
  0x9f   : > { %524 = vst.msk [vmem:[#allocation2 + $0x24] sm:$0xf] %vm514_vm1, %v437_v12  ;;  %v3385_v12 = vpack.c.bf16 %v254_v63, %v254_v63 }
  0xa0   : > { %535 = vst.msk [vmem:[#allocation2 + $0x50] sm:$0xf] %vm514_vm1, %v459_v30  ;;  %v3393_v30 = vpack.c.bf16 %v575_v4, %v575_v4 }
  0xa1   : > { %319 = vst.msk [vmem:[#allocation2 + $0x74] sm:$0xf] %vm289_vm0, %v3385_v12 }
  0xa3   : > { %689 = vrot.lane.b32.xlu1 %v602_v26, %s3008_s24  ;;  %687 = vrot.lane.b32.xlu0 %v601_v27, %s3008_s24  ;;  %v3390_v26 = vpack.c.bf16 %v253_v18, %v253_v18  ;;  %v608_v27 = vpack.c.bf16 %v576_v3, %v576_v3  ;;  %v2669_v18 = vld [vmem:[%s3064_s22 + $0x188] sm:$0xff] }
  0xa4   : > { %691 = vrot.lane.b32.xlu2 %v3342_v33, %s3008_s24 }
  0xa5   : > { %v445_v44 = vpop.permute.xlu1 %444  ;;  %v443_v48 = vpop.permute.xlu0 %442  ;;  %318 = vst.msk [vmem:[#allocation2 + $0x70] sm:$0xf] %vm289_vm0, %v3390_v26 }
  0xa6   : > { %528 = vst.msk [vmem:[#allocation2 + $0x34] sm:$0xf] %vm514_vm1, %v445_v44  ;;  %v465_v58 = vpop.permute.xlu2 %464  ;;  %v578_v44 = vld [vmem:[%s3064_s22 + $0x172] sm:$0xff] }
  0xa7   : > { %527 = vst.msk [vmem:[#allocation2 + $0x30] sm:$0xf] %vm514_vm1, %v443_v48 }
  0xa8   : > { %538 = vst.msk [vmem:[#allocation2 + $0x5c] sm:$0xf] %vm514_vm1, %v465_v58  ;;  %v3420_v58 = vpack.c.bf16 %v578_v44, %v578_v44 }
  0xab   : > { %695 = vrot.lane.b32.xlu1 %v605_v53, %s3008_s24  ;;  %693 = vrot.lane.b32.xlu0 %v604_v57, %s3008_s24  ;;  %v3415_v53 = vpack.c.bf16 %v256_v51, %v256_v51  ;;  %v3417_v57 = vpack.c.bf16 %v255_v41, %v255_v41  ;;  %v2675_v51 = vld [vmem:[%s3064_s22 + $0x51] sm:$0xff] }
  0xac   : > { %697 = vrot.lane.b32.xlu2 %v3369_v62, %s3008_s24 }
  0xad   : > { %v451_v6 = vpop.permute.xlu1 %450  ;;  %v449_v10 = vpop.permute.xlu0 %448  ;;  %321 = vst.msk [vmem:[#allocation2 + $0x7c] sm:$0xf] %vm289_vm0, %v3415_v53 }
  0xae   : > { %531 = vst.msk [vmem:[#allocation2 + $0x40] sm:$0xf] %vm514_vm1, %v451_v6  ;;  %v471_v37 = vpop.permute.xlu2 %470 }
  0xaf   : > { %530 = vst.msk [vmem:[#allocation2 + $0x3c] sm:$0xf] %vm514_vm1, %v449_v10 }
  0xb0   : > { %541 = vst.msk [vmem:[#allocation2 + $0x68] sm:$0xf] %vm514_vm1, %v471_v37 }
  0xb1   : > { %320 = vst.msk [vmem:[#allocation2 + $0x78] sm:$0xf] %vm289_vm0, %v3417_v57 }
  0xb3   : > { %701 = vrot.lane.b32.xlu1 %v608_v27, %s3008_s24  ;;  %699 = vrot.lane.b32.xlu0 %v3393_v30, %s3008_s24 }
  0xb4   : > { %703 = vrot.lane.b32.xlu2 %v3398_v40, %s3008_s24 }
  0xb5   : > { %v457_v48 = vpop.permute.xlu1 %456  ;;  %v455_v50 = vpop.permute.xlu0 %454 }
  0xb6   : > { %534 = vst.msk [vmem:[#allocation2 + $0x4c] sm:$0xf] %vm514_vm1, %v457_v48  ;;  %v477_v63 = vpop.permute.xlu2 %476 }
  0xb7   : > { %533 = vst.msk [vmem:[#allocation2 + $0x48] sm:$0xf] %vm514_vm1, %v455_v50 }
  0xb8   : > { %544 = vst.msk [vmem:[#allocation2 + $0x74] sm:$0xf] %vm514_vm1, %v477_v63  ;;  %v2678_v63 = vld [vmem:[%s3064_s22 + $0x79] sm:$0xff] }
  0xbb   : > { %871 = vrot.lane.b32.xlu1 %v3176_v13, %s3009_s25  ;;  %705 = vrot.lane.b32.xlu0 %v3420_v58, %s3008_s24 }
  0xbc   : > { %873 = vrot.lane.b32.xlu2 %v3193_v31, %s3009_s25 }
  0xbd   : > { %v463_v3 = vpop.permute.xlu1 %462  ;;  %v461_v4 = vpop.permute.xlu0 %460 }
  0xbe   : > { %537 = vst.msk [vmem:[#allocation2 + $0x58] sm:$0xf] %vm514_vm1, %v463_v3  ;;  %v644_v5 = vpop.permute.xlu2 %643 }
  0xbf   : > { %536 = vst.msk [vmem:[#allocation2 + $0x54] sm:$0xf] %vm514_vm1, %v461_v4  ;;  %v1040_v4 = vpack.c.bf16 %v2678_v63, %v2678_v63 }
  0xc0   : > { %740 = vst.msk [vmem:[#allocation2] sm:$0xf] %vm739_vm2, %v644_v5  ;;  %v2681_v5 = vld [vmem:[%s3064_s22 + $0x99] sm:$0xff] }
  0xc3   : > { %877 = vrot.lane.b32.xlu1 %v3186_v25, %s3009_s25  ;;  %875 = vrot.lane.b32.xlu0 %v3168_v8, %s3009_s25 }
  0xc4   : > { %879 = vrot.lane.b32.xlu2 %v3207_v43, %s3009_s25 }
  0xc5   : > { %v469_v13 = vpop.permute.xlu1 %468  ;;  %v467_v6 = vpop.permute.xlu0 %466 }
  0xc6   : > { %540 = vst.msk [vmem:[#allocation2 + $0x64] sm:$0xf] %vm514_vm1, %v469_v13  ;;  %v650_v31 = vpop.permute.xlu2 %649 }
  0xc7   : > { %539 = vst.msk [vmem:[#allocation2 + $0x60] sm:$0xf] %vm514_vm1, %v467_v6  ;;  %v3560_v6 = vpack.c.bf16 %v2681_v5, %v2681_v5 }
  0xc8   : > { %743 = vst.msk [vmem:[#allocation2 + $0xc] sm:$0xf] %vm739_vm2, %v650_v31  ;;  %v2684_v31 = vld [vmem:[%s3064_s22 + $0xc1] sm:$0xff] }
  0xcb   : > { %883 = vrot.lane.b32.xlu1 %v3205_v42, %s3009_s25  ;;  %881 = vrot.lane.b32.xlu0 %v3214_v46, %s3009_s25 }
  0xcc   : > { %885 = vrot.lane.b32.xlu2 %v3229_v56, %s3009_s25 }
  0xcd   : > { %v475_v25 = vpop.permute.xlu1 %474  ;;  %v473_v8 = vpop.permute.xlu0 %472 }
  0xce   : > { %543 = vst.msk [vmem:[#allocation2 + $0x70] sm:$0xf] %vm514_vm1, %v475_v25  ;;  %v656_v43 = vpop.permute.xlu2 %655 }
  0xcf   : > { %542 = vst.msk [vmem:[#allocation2 + $0x6c] sm:$0xf] %vm514_vm1, %v473_v8  ;;  %v1046_v8 = vpack.c.bf16 %v2684_v31, %v2684_v31 }
  0xd0   : > { %746 = vst.msk [vmem:[#allocation2 + $0x18] sm:$0xf] %vm739_vm2, %v656_v43 }
  0xd3   : > { %889 = vrot.lane.b32.xlu1 %v3227_v55, %s3009_s25  ;;  %887 = vrot.lane.b32.xlu0 %v3236_v59, %s3009_s25 }
  0xd4   : > { %891 = vrot.lane.b32.xlu2 %v3258_v20, %s3009_s25 }
  0xd5   : > { %v481_v42 = vpop.permute.xlu1 %480  ;;  %v479_v46 = vpop.permute.xlu0 %478 }
  0xd6   : > { %546 = vst.msk [vmem:[#allocation2 + $0x7c] sm:$0xf] %vm514_vm1, %v481_v42  ;;  %v662_v56 = vpop.permute.xlu2 %661  ;;  %v2687_v42 = vld [vmem:[%s3064_s22 + $0xe1] sm:$0xff] }
  0xd7   : > { %545 = vst.msk [vmem:[#allocation2 + $0x78] sm:$0xf] %vm514_vm1, %v479_v46 }
  0xd8   : > { %749 = vst.msk [vmem:[#allocation2 + $0x24] sm:$0xf] %vm739_vm2, %v662_v56 }
  0xdb   : > { %895 = vrot.lane.b32.xlu1 %v3250_v7, %s3009_s25  ;;  %893 = vrot.lane.b32.xlu0 %v3255_v14, %s3009_s25 }
  0xdc   : > { %897 = vrot.lane.b32.xlu2 %v3285_v45, %s3009_s25 }
  0xdd   : > { %v648_v55 = vpop.permute.xlu1 %647  ;;  %v646_v59 = vpop.permute.xlu0 %645 }
  0xde   : > { %742 = vst.msk [vmem:[#allocation2 + $0x8] sm:$0xf] %vm739_vm2, %v648_v55  ;;  %v668_v20 = vpop.permute.xlu2 %667  ;;  %v2688_v55 = vld [vmem:[%s3064_s22 + $0xf1] sm:$0xff] }
  0xdf   : > { %741 = vst.msk [vmem:[#allocation2 + $0x4] sm:$0xf] %vm739_vm2, %v646_v59 }
  0xe0   : > { %752 = vst.msk [vmem:[#allocation2 + $0x30] sm:$0xf] %vm739_vm2, %v668_v20 }
  0xe3   : > { %901 = vrot.lane.b32.xlu1 %v3277_v36, %s3009_s25  ;;  %899 = vrot.lane.b32.xlu0 %v3282_v39, %s3009_s25 }
  0xe4   : > { %903 = vrot.lane.b32.xlu2 %v3312_v0, %s3009_s25 }
  0xe5   : > { %v654_v7 = vpop.permute.xlu1 %653  ;;  %v652_v14 = vpop.permute.xlu0 %651 }
  0xe6   : > { %745 = vst.msk [vmem:[#allocation2 + $0x14] sm:$0xf] %vm739_vm2, %v654_v7  ;;  %v674_v45 = vpop.permute.xlu2 %673  ;;  %v2690_v7 = vld [vmem:[%s3064_s22 + $0x109] sm:$0xff] }
  0xe7   : > { %744 = vst.msk [vmem:[#allocation2 + $0x10] sm:$0xf] %vm739_vm2, %v652_v14 }
  0xe8   : > { %755 = vst.msk [vmem:[#allocation2 + $0x3c] sm:$0xf] %vm739_vm2, %v674_v45  ;;  %v3593_v45 = vpack.c.bf16 %v2688_v55, %v2688_v55  ;;  %v2707_v55 = vld [vmem:[%s3064_s22 + $0x52] sm:$0xff] }
  0xeb   : > { %907 = vrot.lane.b32.xlu1 %v3304_v54, %s3009_s25  ;;  %905 = vrot.lane.b32.xlu0 %v3309_v60, %s3009_s25 }
  0xec   : > { %909 = vrot.lane.b32.xlu2 %v3339_v32, %s3009_s25 }
  0xed   : > { %v660_v36 = vpop.permute.xlu1 %659  ;;  %v658_v39 = vpop.permute.xlu0 %657 }
  0xee   : > { %748 = vst.msk [vmem:[#allocation2 + $0x20] sm:$0xf] %vm739_vm2, %v660_v36  ;;  %v680_v0 = vpop.permute.xlu2 %679 }
  0xef   : > { %747 = vst.msk [vmem:[#allocation2 + $0x1c] sm:$0xf] %vm739_vm2, %v658_v39  ;;  %v2692_v39 = vld [vmem:[%s3064_s22 + $0x121] sm:$0xff] }
  0xf0   : > { %758 = vst.msk [vmem:[#allocation2 + $0x48] sm:$0xf] %vm739_vm2, %v680_v0  ;;  %v2691_v0 = vld [vmem:[%s3064_s22 + $0x111] sm:$0xff] }
  0xf3   : > { %913 = vrot.lane.b32.xlu1 %v3331_v15, %s3009_s25  ;;  %911 = vrot.lane.b32.xlu0 %v3336_v24, %s3009_s25 }
  0xf4   : > { %915 = vrot.lane.b32.xlu2 %v3366_v61, %s3009_s25 }
  0xf5   : > { %v666_v54 = vpop.permute.xlu1 %665  ;;  %v664_v60 = vpop.permute.xlu0 %663 }
  0xf6   : > { %751 = vst.msk [vmem:[#allocation2 + $0x2c] sm:$0xf] %vm739_vm2, %v666_v54  ;;  %v686_v32 = vpop.permute.xlu2 %685 }
  0xf7   : > { %750 = vst.msk [vmem:[#allocation2 + $0x28] sm:$0xf] %vm739_vm2, %v664_v60 }
  0xf8   : > { %761 = vst.msk [vmem:[#allocation2 + $0x54] sm:$0xf] %vm739_vm2, %v686_v32  ;;  %v2693_v32 = vld [vmem:[%s3064_s22 + $0x129] sm:$0xff] }
  0xfb   : > { %919 = vrot.lane.b32.xlu1 %v3358_v49, %s3009_s25  ;;  %917 = vrot.lane.b32.xlu0 %v3363_v52, %s3009_s25  ;;  %v2668_v49 = vld [vmem:[%s3064_s22 + $0x180] sm:$0xff] }
  0xfc   : > { %921 = vrot.lane.b32.xlu2 %v3395_v38, %s3009_s25  ;;  %v837_v19 = vpack.c.bf16 %v2668_v49, %v2668_v49  ;;  %v2672_v38 = vld [vmem:[%s3064_s22 + $0x31] sm:$0xff]  ;;  %v3612_v49 = vpack.c.bf16 %v2693_v32, %v2693_v32  ;;  %v2710_v32 = vld [vmem:[%s3064_s22 + $0x7a] sm:$0xff] }
  0xfd   : > { %v672_v15 = vpop.permute.xlu1 %671  ;;  %v670_v24 = vpop.permute.xlu0 %669  ;;  %v3527_v44 = vpack.c.bf16 %v2672_v38, %v2672_v38 }
  0xfe   : > { %754 = vst.msk [vmem:[#allocation2 + $0x38] sm:$0xf] %vm739_vm2, %v672_v15  ;;  %v692_v61 = vpop.permute.xlu2 %691  ;;  %v1054_v15 = vpack.c.bf16 %v2692_v39, %v2692_v39  ;;  %v3681_v39 = vpack.c.bf16 %v2707_v55, %v2707_v55 }
  0xff   : > { %753 = vst.msk [vmem:[#allocation2 + $0x34] sm:$0xf] %vm739_vm2, %v670_v24  ;;  %v3609_v24 = vpack.c.bf16 %v2691_v0, %v2691_v0 }
 0x100   : > { %764 = vst.msk [vmem:[#allocation2 + $0x60] sm:$0xf] %vm739_vm2, %v692_v61 }
 0x103   : > { %925 = vrot.lane.b32.xlu1 %v3385_v12, %s3009_s25  ;;  %923 = vrot.lane.b32.xlu0 %v3390_v26, %s3009_s25  ;;  %v838_v12 = vpack.c.bf16 %v2669_v18, %v2669_v18 }
 0x104   : > { %927 = vrot.lane.b32.xlu2 %v3417_v57, %s3009_s25  ;;  %v3539_v57 = vpack.c.bf16 %v2675_v51, %v2675_v51 }
 0x105   : > { %v678_v52 = vpop.permute.xlu1 %677  ;;  %v676_v10 = vpop.permute.xlu0 %675 }
 0x106   : > { %757 = vst.msk [vmem:[#allocation2 + $0x44] sm:$0xf] %vm739_vm2, %v678_v52  ;;  %v698_v27 = vpop.permute.xlu2 %697  ;;  %v2695_v52 = vld [vmem:[%s3064_s22 + $0x141] sm:$0xff] }
 0x107   : > { %756 = vst.msk [vmem:[#allocation2 + $0x40] sm:$0xf] %vm739_vm2, %v676_v10  ;;  %v2694_v10 = vld [vmem:[%s3064_s22 + $0x139] sm:$0xff] }
 0x108   : > { %767 = vst.msk [vmem:[#allocation2 + $0x6c] sm:$0xf] %vm739_vm2, %v698_v27  ;;  %v2696_v27 = vld [vmem:[%s3064_s22 + $0x151] sm:$0xff] }
 0x109   : > { %v3625_v38 = vpack.c.bf16 %v2696_v27, %v2696_v27 }
 0x10b   : > { %931 = vrot.lane.b32.xlu1 %v837_v19, %s3009_s25  ;;  %929 = vrot.lane.b32.xlu0 %v3415_v53, %s3009_s25 }
 0x10c   : > { %933 = vrot.lane.b32.xlu2 %v838_v12, %s3009_s25  ;;  %v1057_v12 = vpack.c.bf16 %v2695_v52, %v2695_v52 }
 0x10d   : > { %v684_v26 = vpop.permute.xlu1 %683  ;;  %v682_v37 = vpop.permute.xlu0 %681 }
 0x10e   : > { %760 = vst.msk [vmem:[#allocation2 + $0x50] sm:$0xf] %vm739_vm2, %v684_v26  ;;  %v704_v41 = vpop.permute.xlu2 %703  ;;  %v1056_v26 = vpack.c.bf16 %v2694_v10, %v2694_v10  ;;  %v2711_v10 = vld [vmem:[%s3064_s22 + $0x82] sm:$0xff] }
 0x10f   : > { %759 = vst.msk [vmem:[#allocation2 + $0x4c] sm:$0xf] %vm739_vm2, %v682_v37 }
 0x110   : > { %770 = vst.msk [vmem:[#allocation2 + $0x78] sm:$0xf] %vm739_vm2, %v704_v41  ;;  %v2698_v41 = vld [vmem:[%s3064_s22 + $0x169] sm:$0xff] }
 0x113   : > { %1098 = vrot.lane.b32.xlu1 %v3078_v9, %s3010_s26  ;;  %1096 = vrot.lane.b32.xlu0 %v3068_v2, %s3010_s26 }
 0x114   : > { %1100 = vrot.lane.b32.xlu2 %v3527_v44, %s3010_s26 }
 0x115   : > { %v690_v48 = vpop.permute.xlu1 %689  ;;  %v688_v50 = vpop.permute.xlu0 %687 }
 0x116   : > { %763 = vst.msk [vmem:[#allocation2 + $0x5c] sm:$0xf] %vm739_vm2, %v690_v48  ;;  %v874_v53 = vpop.permute.xlu2 %873  ;;  %v2697_v48 = vld [vmem:[%s3064_s22 + $0x159] sm:$0xff] }
 0x117   : > { %762 = vst.msk [vmem:[#allocation2 + $0x58] sm:$0xf] %vm739_vm2, %v688_v50 }
 0x118   : > { %969 = vst.msk [vmem:[#allocation2 + $0x4] sm:$0xf] %vm967_vm3, %v874_v53  ;;  %v2699_v53 = vld [vmem:[%s3064_s22 + $0x171] sm:$0xff] }
 0x11b   : > { %1104 = vrot.lane.b32.xlu1 %v3090_v16, %s3010_s26  ;;  %1102 = vrot.lane.b32.xlu0 %v3080_v11, %s3010_s26 }
 0x11c   : > { %1106 = vrot.lane.b32.xlu2 %v3539_v57, %s3010_s26 }
 0x11d   : > { %v696_v2 = vpop.permute.xlu1 %695  ;;  %v694_v9 = vpop.permute.xlu0 %693 }
 0x11e   : > { %766 = vst.msk [vmem:[#allocation2 + $0x68] sm:$0xf] %vm739_vm2, %v696_v2  ;;  %v880_v3 = vpop.permute.xlu2 %879  ;;  %v3636_v2 = vpack.c.bf16 %v2698_v41, %v2698_v41 }
 0x11f   : > { %765 = vst.msk [vmem:[#allocation2 + $0x64] sm:$0xf] %vm739_vm2, %v694_v9  ;;  %v3638_v9 = vpack.c.bf16 %v2697_v48, %v2697_v48 }
 0x120   : > { %972 = vst.msk [vmem:[#allocation2 + $0x10] sm:$0xf] %vm967_vm3, %v880_v3  ;;  %v3641_v3 = vpack.c.bf16 %v2699_v53, %v2699_v53 }
 0x123   : > { %1110 = vrot.lane.b32.xlu1 %v3102_v22, %s3010_s26  ;;  %1108 = vrot.lane.b32.xlu0 %v3092_v17, %s3010_s26 }
 0x124   : > { %1112 = vrot.lane.b32.xlu2 %v1040_v4, %s3010_s26  ;;  %v2701_v4 = vld [vmem:[%s3064_s22 + $0x189] sm:$0xff] }
 0x125   : > { %v702_v11 = vpop.permute.xlu1 %701  ;;  %v700_v16 = vpop.permute.xlu0 %699 }
 0x126   : > { %769 = vst.msk [vmem:[#allocation2 + $0x74] sm:$0xf] %vm739_vm2, %v702_v11  ;;  %v886_v13 = vpop.permute.xlu2 %885  ;;  %v2700_v11 = vld [vmem:[%s3064_s22 + $0x181] sm:$0xff] }
 0x127   : > { %768 = vst.msk [vmem:[#allocation2 + $0x70] sm:$0xf] %vm739_vm2, %v700_v16 }
 0x128   : > { %975 = vst.msk [vmem:[#allocation2 + $0x1c] sm:$0xf] %vm967_vm3, %v886_v13  ;;  %v2702_v13 = vld [vmem:[%s3064_s22 + $0x1a] sm:$0xff] }
 0x12b   : > { %1116 = vrot.lane.b32.xlu1 %v3114_v28, %s3010_s26  ;;  %1114 = vrot.lane.b32.xlu0 %v3104_v23, %s3010_s26  ;;  %v2686_v23 = vld [vmem:[%s3064_s22 + $0xd9] sm:$0xff] }
 0x12c   : > { %1118 = vrot.lane.b32.xlu2 %v3560_v6, %s3010_s26  ;;  %v1048_v46 = vpack.c.bf16 %v2686_v23, %v2686_v23  ;;  %v2703_v23 = vld [vmem:[%s3064_s22 + $0x22] sm:$0xff] }
 0x12d   : > { %v872_v17 = vpop.permute.xlu1 %871  ;;  %v706_v22 = vpop.permute.xlu0 %705 }
 0x12e   : > { %968 = vst.msk [vmem:[#allocation2] sm:$0xf] %vm967_vm3, %v872_v17  ;;  %v892_v25 = vpop.permute.xlu2 %891  ;;  %v3654_v17 = vpack.c.bf16 %v2701_v4, %v2701_v4 }
 0x12f   : > { %771 = vst.msk [vmem:[#allocation2 + $0x7c] sm:$0xf] %vm739_vm2, %v706_v22  ;;  %v1062_v22 = vpack.c.bf16 %v2700_v11, %v2700_v11  ;;  %v2716_v11 = vld [vmem:[%s3064_s22 + $0xc2] sm:$0xff] }
 0x130   : > { %978 = vst.msk [vmem:[#allocation2 + $0x28] sm:$0xf] %vm967_vm3, %v892_v25  ;;  %v1257_v25 = vpack.c.bf16 %v2702_v13, %v2702_v13  ;;  %v2717_v13 = vld [vmem:[%s3064_s22 + $0xca] sm:$0xff] }
 0x133   : > { %1122 = vrot.lane.b32.xlu1 %v3126_v34, %s3010_s26  ;;  %1120 = vrot.lane.b32.xlu0 %v3116_v29, %s3010_s26  ;;  %v1049_v34 = vpack.c.bf16 %v2687_v42, %v2687_v42  ;;  %v2689_v29 = vld [vmem:[%s3064_s22 + $0xf9] sm:$0xff] }
 0x134   : > { %1124 = vrot.lane.b32.xlu2 %v1046_v8, %s3010_s26  ;;  %v3591_v14 = vpack.c.bf16 %v2689_v29, %v2689_v29  ;;  %v2704_v8 = vld [vmem:[%s3064_s22 + $0x32] sm:$0xff]  ;;  %v2705_v42 = vld [vmem:[%s3064_s22 + $0x3a] sm:$0xff] }
 0x135   : > { %v878_v28 = vpop.permute.xlu1 %877  ;;  %v876_v43 = vpop.permute.xlu0 %875  ;;  %v3669_v29 = vpack.c.bf16 %v2705_v42, %v2705_v42 }
 0x136   : > { %971 = vst.msk [vmem:[#allocation2 + $0xc] sm:$0xf] %vm967_vm3, %v878_v28  ;;  %v898_v56 = vpop.permute.xlu2 %897 }
 0x137   : > { %970 = vst.msk [vmem:[#allocation2 + $0x8] sm:$0xf] %vm967_vm3, %v876_v43 }
 0x138   : > { %981 = vst.msk [vmem:[#allocation2 + $0x34] sm:$0xf] %vm967_vm3, %v898_v56  ;;  %v1258_v56 = vpack.c.bf16 %v2703_v23, %v2703_v23 }
 0x13b   : > { %1128 = vrot.lane.b32.xlu1 %v1048_v46, %s3010_s26  ;;  %1126 = vrot.lane.b32.xlu0 %v3128_v35, %s3010_s26  ;;  %v3596_v35 = vpack.c.bf16 %v2690_v7, %v2690_v7  ;;  %v3666_v46 = vpack.c.bf16 %v2704_v8, %v2704_v8  ;;  %v2719_v8 = vld [vmem:[%s3064_s22 + $0xe2] sm:$0xff] }
 0x13c   : > { %1130 = vrot.lane.b32.xlu2 %v1049_v34, %s3010_s26  ;;  %v1274_v42 = vpack.c.bf16 %v2719_v8, %v2719_v8  ;;  %v2736_v8 = vld [vmem:[%s3064_s22 + $0x48] sm:$0xff] }
 0x13d   : > { %v884_v59 = vpop.permute.xlu1 %883  ;;  %v882_v20 = vpop.permute.xlu0 %881 }
 0x13e   : > { %974 = vst.msk [vmem:[#allocation2 + $0x18] sm:$0xf] %vm967_vm3, %v884_v59  ;;  %v904_v36 = vpop.permute.xlu2 %903  ;;  %v2706_v59 = vld [vmem:[%s3064_s22 + $0x4a] sm:$0xff] }
 0x13f   : > { %973 = vst.msk [vmem:[#allocation2 + $0x14] sm:$0xf] %vm967_vm3, %v882_v20  ;;  %v3683_v0 = vpack.c.bf16 %v2706_v59, %v2706_v59 }
 0x140   : > { %984 = vst.msk [vmem:[#allocation2 + $0x40] sm:$0xf] %vm967_vm3, %v904_v36  ;;  %v2708_v36 = vld [vmem:[%s3064_s22 + $0x62] sm:$0xff] }
 0x143   : > { %1134 = vrot.lane.b32.xlu1 %v3591_v14, %s3010_s26  ;;  %1132 = vrot.lane.b32.xlu0 %v3593_v45, %s3010_s26 }
 0x144   : > { %1136 = vrot.lane.b32.xlu2 %v3596_v35, %s3010_s26 }
 0x145   : > { %v890_v54 = vpop.permute.xlu1 %889  ;;  %v888_v60 = vpop.permute.xlu0 %887 }
 0x146   : > { %977 = vst.msk [vmem:[#allocation2 + $0x24] sm:$0xf] %vm967_vm3, %v890_v54  ;;  %v910_v61 = vpop.permute.xlu2 %909 }
 0x147   : > { %976 = vst.msk [vmem:[#allocation2 + $0x20] sm:$0xf] %vm967_vm3, %v888_v60  ;;  %v3686_v60 = vpack.c.bf16 %v2708_v36, %v2708_v36 }
 0x148   : > { %987 = vst.msk [vmem:[#allocation2 + $0x4c] sm:$0xf] %vm967_vm3, %v910_v61 }
 0x14b   : > { %1140 = vrot.lane.b32.xlu1 %v1054_v15, %s3010_s26  ;;  %1138 = vrot.lane.b32.xlu0 %v3609_v24, %s3010_s26  ;;  %v2709_v15 = vld [vmem:[%s3064_s22 + $0x6a] sm:$0xff] }
 0x14c   : > { %1142 = vrot.lane.b32.xlu2 %v3612_v49, %s3010_s26 }
 0x14d   : > { %v896_v18 = vpop.permute.xlu1 %895  ;;  %v894_v19 = vpop.permute.xlu0 %893 }
 0x14e   : > { %980 = vst.msk [vmem:[#allocation2 + $0x30] sm:$0xf] %vm967_vm3, %v896_v18  ;;  %v916_v37 = vpop.permute.xlu2 %915  ;;  %v1265_v18 = vpack.c.bf16 %v2710_v32, %v2710_v32 }
 0x14f   : > { %979 = vst.msk [vmem:[#allocation2 + $0x2c] sm:$0xf] %vm967_vm3, %v894_v19  ;;  %v3699_v19 = vpack.c.bf16 %v2709_v15, %v2709_v15 }
 0x150   : > { %990 = vst.msk [vmem:[#allocation2 + $0x58] sm:$0xf] %vm967_vm3, %v916_v37  ;;  %v2712_v37 = vld [vmem:[%s3064_s22 + $0x92] sm:$0xff] }
 0x151   : > { %v3713_v53 = vpack.c.bf16 %v2712_v37, %v2712_v37 }
 0x153   : > { %1146 = vrot.lane.b32.xlu1 %v1057_v12, %s3010_s26  ;;  %1144 = vrot.lane.b32.xlu0 %v1056_v26, %s3010_s26  ;;  %v1266_v12 = vpack.c.bf16 %v2711_v10, %v2711_v10  ;;  %v2713_v26 = vld [vmem:[%s3064_s22 + $0x9a] sm:$0xff] }
 0x154   : > { %1148 = vrot.lane.b32.xlu2 %v3625_v38, %s3010_s26 }
 0x155   : > { %v902_v50 = vpop.permute.xlu1 %901  ;;  %v900_v51 = vpop.permute.xlu0 %899 }
 0x156   : > { %983 = vst.msk [vmem:[#allocation2 + $0x3c] sm:$0xf] %vm967_vm3, %v902_v50  ;;  %v922_v63 = vpop.permute.xlu2 %921  ;;  %v2714_v50 = vld [vmem:[%s3064_s22 + $0xaa] sm:$0xff] }
 0x157   : > { %982 = vst.msk [vmem:[#allocation2 + $0x38] sm:$0xf] %vm967_vm3, %v900_v51  ;;  %v3711_v51 = vpack.c.bf16 %v2713_v26, %v2713_v26  ;;  %v3716_v4 = vpack.c.bf16 %v2714_v50, %v2714_v50 }
 0x158   : > { %993 = vst.msk [vmem:[#allocation2 + $0x64] sm:$0xf] %vm967_vm3, %v922_v63 }
 0x15b   : > { %1152 = vrot.lane.b32.xlu1 %v3636_v2, %s3010_s26  ;;  %1150 = vrot.lane.b32.xlu0 %v3638_v9, %s3010_s26 }
 0x15c   : > { %1154 = vrot.lane.b32.xlu2 %v3641_v3, %s3010_s26 }
 0x15d   : > { %v908_v16 = vpop.permute.xlu1 %907  ;;  %v906_v5 = vpop.permute.xlu0 %905 }
 0x15e   : > { %986 = vst.msk [vmem:[#allocation2 + $0x48] sm:$0xf] %vm967_vm3, %v908_v16  ;;  %v928_v31 = vpop.permute.xlu2 %927 }
 0x15f   : > { %985 = vst.msk [vmem:[#allocation2 + $0x44] sm:$0xf] %vm967_vm3, %v906_v5 }
 0x160   : > { %996 = vst.msk [vmem:[#allocation2 + $0x70] sm:$0xf] %vm967_vm3, %v928_v31 }
 0x163   : > { %1158 = vrot.lane.b32.xlu1 %v3654_v17, %s3010_s26  ;;  %1156 = vrot.lane.b32.xlu0 %v1062_v22, %s3010_s26  ;;  %v1271_v22 = vpack.c.bf16 %v2716_v11, %v2716_v11 }
 0x164   : > { %1321 = vrot.lane.b32.xlu2 %v1257_v25, %s3011_s27  ;;  %v3729_v25 = vpack.c.bf16 %v2717_v13, %v2717_v13 }
 0x165   : > { %v914_v28 = vpop.permute.xlu1 %913  ;;  %v912_v43 = vpop.permute.xlu0 %911 }
 0x166   : > { %989 = vst.msk [vmem:[#allocation2 + $0x54] sm:$0xf] %vm967_vm3, %v914_v28  ;;  %v934_v34 = vpop.permute.xlu2 %933 }
 0x167   : > { %988 = vst.msk [vmem:[#allocation2 + $0x50] sm:$0xf] %vm967_vm3, %v912_v43  ;;  %v2720_v43 = vld [vmem:[%s3064_s22 + $0xf2] sm:$0xff] }
 0x168   : > { %999 = vst.msk [vmem:[#allocation2 + $0x7c] sm:$0xf] %vm967_vm3, %v934_v34  ;;  %v3741_v34 = vpack.c.bf16 %v2720_v43, %v2720_v43  ;;  %v2738_v43 = vld [vmem:[%s3064_s22 + $0x60] sm:$0xff] }
 0x16b   : > { %1325 = vrot.lane.b32.xlu1 %v3666_v46, %s3011_s27  ;;  %1323 = vrot.lane.b32.xlu0 %v1258_v56, %s3011_s27 }
 0x16c   : > { %1327 = vrot.lane.b32.xlu2 %v3669_v29, %s3011_s27 }
 0x16d   : > { %v920_v20 = vpop.permute.xlu1 %919  ;;  %v918_v7 = vpop.permute.xlu0 %917 }
 0x16e   : > { %992 = vst.msk [vmem:[#allocation2 + $0x60] sm:$0xf] %vm967_vm3, %v920_v20  ;;  %v1101_v54 = vpop.permute.xlu2 %1100  ;;  %v2723_v20 = vld [vmem:[%s3064_s22 + $0x112] sm:$0xff] }
 0x16f   : > { %991 = vst.msk [vmem:[#allocation2 + $0x5c] sm:$0xf] %vm967_vm3, %v918_v7 }
 0x170   : > { %1195 = vst.msk [vmem:[#allocation2 + $0x8] sm:$0xf] %vm1192_vm4, %v1101_v54  ;;  %v3755_v54 = vpack.c.bf16 %v2723_v20, %v2723_v20  ;;  %v2739_v20 = vld [vmem:[%s3064_s22 + $0x68] sm:$0xff] }
 0x173   : > { %1331 = vrot.lane.b32.xlu1 %v3681_v39, %s3011_s27  ;;  %1329 = vrot.lane.b32.xlu0 %v3683_v0, %s3011_s27 }
 0x174   : > { %1333 = vrot.lane.b32.xlu2 %v3686_v60, %s3011_s27 }
 0x175   : > { %v926_v61 = vpop.permute.xlu1 %925  ;;  %v924_v52 = vpop.permute.xlu0 %923 }
 0x176   : > { %995 = vst.msk [vmem:[#allocation2 + $0x6c] sm:$0xf] %vm967_vm3, %v926_v61  ;;  %v1107_v27 = vpop.permute.xlu2 %1106  ;;  %v2726_v61 = vld [vmem:[%s3064_s22 + $0x13a] sm:$0xff] }
 0x177   : > { %994 = vst.msk [vmem:[#allocation2 + $0x68] sm:$0xf] %vm967_vm3, %v924_v52 }
 0x178   : > { %1198 = vst.msk [vmem:[#allocation2 + $0x14] sm:$0xf] %vm1192_vm4, %v1107_v27 }
 0x17b   : > { %1337 = vrot.lane.b32.xlu1 %v1265_v18, %s3011_s27  ;;  %1335 = vrot.lane.b32.xlu0 %v3699_v19, %s3011_s27  ;;  %v3770_v18 = vpack.c.bf16 %v2726_v61, %v2726_v61  ;;  %v1490_v61 = vpack.c.bf16 %v2739_v20, %v2739_v20 }
 0x17c   : > { %1339 = vrot.lane.b32.xlu2 %v1266_v12, %s3011_s27  ;;  %v2729_v12 = vld [vmem:[%s3064_s22 + $0x15a] sm:$0xff] }
 0x17d   : > { %v932_v41 = vpop.permute.xlu1 %931  ;;  %v930_v48 = vpop.permute.xlu0 %929  ;;  %v3782_v37 = vpack.c.bf16 %v2729_v12, %v2729_v12  ;;  %v2742_v12 = vld [vmem:[%s3064_s22 + $0x90] sm:$0xff] }
 0x17e   : > { %998 = vst.msk [vmem:[#allocation2 + $0x78] sm:$0xf] %vm967_vm3, %v932_v41  ;;  %v1113_v63 = vpop.permute.xlu2 %1112 }
 0x17f   : > { %997 = vst.msk [vmem:[#allocation2 + $0x74] sm:$0xf] %vm967_vm3, %v930_v48  ;;  %v2732_v48 = vld [vmem:[%s3064_s22 + $0x182] sm:$0xff] }
 0x180   : > { %1201 = vst.msk [vmem:[#allocation2 + $0x20] sm:$0xf] %vm1192_vm4, %v1113_v63  ;;  %v3794_v63 = vpack.c.bf16 %v2732_v48, %v2732_v48 }
 0x183   : > { %1343 = vrot.lane.b32.xlu1 %v3711_v51, %s3011_s27  ;;  %1341 = vrot.lane.b32.xlu0 %v3713_v53, %s3011_s27 }
 0x184   : > { %1345 = vrot.lane.b32.xlu2 %v3716_v4, %s3011_s27 }
 0x185   : > { %v1099_v16 = vpop.permute.xlu1 %1098  ;;  %v1097_v5 = vpop.permute.xlu0 %1096 }
 0x186   : > { %1194 = vst.msk [vmem:[#allocation2 + $0x4] sm:$0xf] %vm1192_vm4, %v1099_v16  ;;  %v1119_v31 = vpop.permute.xlu2 %1118 }
 0x187   : > { %1193 = vst.msk [vmem:[#allocation2] sm:$0xf] %vm1192_vm4, %v1097_v5  ;;  %v2735_v5 = vld [vmem:[%s3064_s22 + $0x38] sm:$0xff] }
 0x188   : > { %1204 = vst.msk [vmem:[#allocation2 + $0x2c] sm:$0xf] %vm1192_vm4, %v1119_v31  ;;  %v2737_v31 = vld [vmem:[%s3064_s22 + $0x50] sm:$0xff] }
 0x18b   : > { %1349 = vrot.lane.b32.xlu1 %v1271_v22, %s3011_s27  ;;  %1347 = vrot.lane.b32.xlu0 %v3261_v21, %s3011_s27  ;;  %v2722_v21 = vld [vmem:[%s3064_s22 + $0x10a] sm:$0xff] }
 0x18c   : > { %1351 = vrot.lane.b32.xlu2 %v3729_v25, %s3011_s27  ;;  %v3752_v7 = vpack.c.bf16 %v2722_v21, %v2722_v21 }
 0x18d   : > { %v1105_v23 = vpop.permute.xlu1 %1104  ;;  %v1103_v28 = vpop.permute.xlu0 %1102 }
 0x18e   : > { %1197 = vst.msk [vmem:[#allocation2 + $0x10] sm:$0xf] %vm1192_vm4, %v1105_v23  ;;  %v1125_v56 = vpop.permute.xlu2 %1124 }
 0x18f   : > { %1196 = vst.msk [vmem:[#allocation2 + $0xc] sm:$0xf] %vm1192_vm4, %v1103_v28 }
 0x190   : > { %1207 = vst.msk [vmem:[#allocation2 + $0x38] sm:$0xf] %vm1192_vm4, %v1125_v56  ;;  %v1487_v56 = vpack.c.bf16 %v2736_v8, %v2736_v8 }
 0x193   : > { %1355 = vrot.lane.b32.xlu1 %v1274_v42, %s3011_s27  ;;  %1353 = vrot.lane.b32.xlu0 %v3288_v47, %s3011_s27  ;;  %v2725_v47 = vld [vmem:[%s3064_s22 + $0x12a] sm:$0xff]  ;;  %v1488_v42 = vpack.c.bf16 %v2737_v31, %v2737_v31 }
 0x194   : > { %1357 = vrot.lane.b32.xlu2 %v3741_v34, %s3011_s27  ;;  %v3767_v52 = vpack.c.bf16 %v2725_v47, %v2725_v47 }
 0x195   : > { %v1111_v55 = vpop.permute.xlu1 %1110  ;;  %v1109_v59 = vpop.permute.xlu0 %1108 }
 0x196   : > { %1200 = vst.msk [vmem:[#allocation2 + $0x1c] sm:$0xf] %vm1192_vm4, %v1111_v55  ;;  %v1131_v36 = vpop.permute.xlu2 %1130  ;;  %v1489_v55 = vpack.c.bf16 %v2738_v43, %v2738_v43  ;;  %v2748_v43 = vld [vmem:[%s3064_s22 + $0xd8] sm:$0xff] }
 0x197   : > { %1199 = vst.msk [vmem:[#allocation2 + $0x18] sm:$0xf] %vm1192_vm4, %v1109_v59  ;;  %v2740_v59 = vld [vmem:[%s3064_s22 + $0x78] sm:$0xff] }
 0x198   : > { %1210 = vst.msk [vmem:[#allocation2 + $0x44] sm:$0xf] %vm1192_vm4, %v1131_v36 }
 0x19b   : > { %1361 = vrot.lane.b32.xlu1 %v3752_v7, %s3011_s27  ;;  %1359 = vrot.lane.b32.xlu0 %v3315_v1, %s3011_s27 }
 0x19c   : > { %1363 = vrot.lane.b32.xlu2 %v3755_v54, %s3011_s27 }
 0x19d   : > { %v1117_v32 = vpop.permute.xlu1 %1116  ;;  %v1115_v15 = vpop.permute.xlu0 %1114 }
 0x19e   : > { %1203 = vst.msk [vmem:[#allocation2 + $0x28] sm:$0xf] %vm1192_vm4, %v1117_v32  ;;  %v1137_v10 = vpop.permute.xlu2 %1136  ;;  %v2741_v32 = vld [vmem:[%s3064_s22 + $0x80] sm:$0xff] }
 0x19f   : > { %1202 = vst.msk [vmem:[#allocation2 + $0x24] sm:$0xf] %vm1192_vm4, %v1115_v15  ;;  %v1491_v15 = vpack.c.bf16 %v2740_v59, %v2740_v59  ;;  %v1499_v59 = vpack.c.bf16 %v2748_v43, %v2748_v43 }
 0x1a0   : > { %1213 = vst.msk [vmem:[#allocation2 + $0x50] sm:$0xf] %vm1192_vm4, %v1137_v10 }
 0x1a3   : > { %1367 = vrot.lane.b32.xlu1 %v3767_v52, %s3011_s27  ;;  %1365 = vrot.lane.b32.xlu0 %v3342_v33, %s3011_s27 }
 0x1a4   : > { %1369 = vrot.lane.b32.xlu2 %v3770_v18, %s3011_s27 }
 0x1a5   : > { %v1123_v1 = vpop.permute.xlu1 %1122  ;;  %v1121_v27 = vpop.permute.xlu0 %1120 }
 0x1a6   : > { %1206 = vst.msk [vmem:[#allocation2 + $0x34] sm:$0xf] %vm1192_vm4, %v1123_v1  ;;  %v1143_v26 = vpop.permute.xlu2 %1142  ;;  %v1492_v1 = vpack.c.bf16 %v2741_v32, %v2741_v32  ;;  %v2758_v32 = vld [vmem:[%s3064_s22 + $0x150] sm:$0xff] }
 0x1a7   : > { %1205 = vst.msk [vmem:[#allocation2 + $0x30] sm:$0xf] %vm1192_vm4, %v1121_v27  ;;  %v2743_v27 = vld [vmem:[%s3064_s22 + $0x98] sm:$0xff] }
 0x1a8   : > { %1216 = vst.msk [vmem:[#allocation2 + $0x5c] sm:$0xf] %vm1192_vm4, %v1143_v26  ;;  %v1494_v48 = vpack.c.bf16 %v2743_v27, %v2743_v27 }
 0x1ab   : > { %1373 = vrot.lane.b32.xlu1 %v3393_v30, %s3011_s27  ;;  %1371 = vrot.lane.b32.xlu0 %v3369_v62, %s3011_s27  ;;  %v2734_v62 = vld [vmem:[%s3064_s22 + $0x30] sm:$0xff] }
 0x1ac   : > { %1375 = vrot.lane.b32.xlu2 %v3782_v37, %s3011_s27  ;;  %v2733_v30 = vld [vmem:[%s3064_s22 + $0x18a] sm:$0xff]  ;;  %v1485_v13 = vpack.c.bf16 %v2734_v62, %v2734_v62 }
 0x1ad   : > { %v1129_v33 = vpop.permute.xlu1 %1128  ;;  %v1127_v41 = vpop.permute.xlu0 %1126 }
 0x1ae   : > { %1209 = vst.msk [vmem:[#allocation2 + $0x40] sm:$0xf] %vm1192_vm4, %v1129_v33  ;;  %v1149_v50 = vpop.permute.xlu2 %1148 }
 0x1af   : > { %1208 = vst.msk [vmem:[#allocation2 + $0x3c] sm:$0xf] %vm1192_vm4, %v1127_v41  ;;  %v2744_v41 = vld [vmem:[%s3064_s22 + $0xa8] sm:$0xff] }
 0x1b0   : > { %1219 = vst.msk [vmem:[#allocation2 + $0x68] sm:$0xf] %vm1192_vm4, %v1149_v50  ;;  %v1493_v50 = vpack.c.bf16 %v2742_v12, %v2742_v12 }
 0x1b3   : > { %1379 = vrot.lane.b32.xlu1 %v3420_v58, %s3011_s27  ;;  %1377 = vrot.lane.b32.xlu0 %v3398_v40, %s3011_s27  ;;  %v3807_v58 = vpack.c.bf16 %v2733_v30, %v2733_v30  ;;  %v1486_v40 = vpack.c.bf16 %v2735_v5, %v2735_v5  ;;  %v1495_v30 = vpack.c.bf16 %v2744_v41, %v2744_v41  ;;  %v2815_v41 = vld [vmem:[%s3064_s22 + $0xfa] sm:$0xff] }
 0x1b4   : > { %1381 = vrot.lane.b32.xlu2 %v3794_v63, %s3011_s27 }
 0x1b5   : > { %v1135_v11 = vpop.permute.xlu1 %1134  ;;  %v1133_v16 = vpop.permute.xlu0 %1132 }
 0x1b6   : > { %1212 = vst.msk [vmem:[#allocation2 + $0x4c] sm:$0xf] %vm1192_vm4, %v1135_v11  ;;  %v1155_v22 = vpop.permute.xlu2 %1154  ;;  %v2746_v11 = vld [vmem:[%s3064_s22 + $0xc0] sm:$0xff] }
 0x1b7   : > { %1211 = vst.msk [vmem:[#allocation2 + $0x48] sm:$0xf] %vm1192_vm4, %v1133_v16  ;;  %v2745_v16 = vld [vmem:[%s3064_s22 + $0xb0] sm:$0xff] }
 0x1b8   : > { %1222 = vst.msk [vmem:[#allocation2 + $0x74] sm:$0xf] %vm1192_vm4, %v1155_v22  ;;  %v2747_v22 = vld [vmem:[%s3064_s22 + $0xc8] sm:$0xff]  ;;  %v1496_v31 = vpack.c.bf16 %v2745_v16, %v2745_v16 }
 0x1bb   : > { %1549 = vrot.lane.b32.xlu1 %v1485_v13, %s3012_s28  ;;  %1383 = vrot.lane.b32.xlu0 %v3807_v58, %s3011_s27 }
 0x1bc   : > { %1551 = vrot.lane.b32.xlu2 %v1486_v40, %s3012_s28  ;;  %v1497_v40 = vpack.c.bf16 %v2746_v11, %v2746_v11 }
 0x1bd   : > { %v1141_v23 = vpop.permute.xlu1 %1140  ;;  %v1139_v28 = vpop.permute.xlu0 %1138 }
 0x1be   : > { %1215 = vst.msk [vmem:[#allocation2 + $0x58] sm:$0xf] %vm1192_vm4, %v1141_v23  ;;  %v1322_v21 = vpop.permute.xlu2 %1321  ;;  %v1498_v23 = vpack.c.bf16 %v2747_v22, %v2747_v22 }
 0x1bf   : > { %1214 = vst.msk [vmem:[#allocation2 + $0x54] sm:$0xf] %vm1192_vm4, %v1139_v28  ;;  %v2750_v28 = vld [vmem:[%s3064_s22 + $0xf0] sm:$0xff] }
 0x1c0   : > { %1418 = vst.msk [vmem:[#allocation2] sm:$0xf] %vm1417_vm5, %v1322_v21  ;;  %v2751_v21 = vld [vmem:[%s3064_s22 + $0xf8] sm:$0xff] }
 0x1c3   : > { %1555 = vrot.lane.b32.xlu1 %v1488_v42, %s3012_s28  ;;  %1553 = vrot.lane.b32.xlu0 %v1487_v56, %s3012_s28 }
 0x1c4   : > { %1557 = vrot.lane.b32.xlu2 %v1489_v55, %s3012_s28  ;;  %v1501_v55 = vpack.c.bf16 %v2750_v28, %v2750_v28 }
 0x1c5   : > { %v1147_v36 = vpop.permute.xlu1 %1146  ;;  %v1145_v47 = vpop.permute.xlu0 %1144 }
 0x1c6   : > { %1218 = vst.msk [vmem:[#allocation2 + $0x64] sm:$0xf] %vm1192_vm4, %v1147_v36  ;;  %v1328_v10 = vpop.permute.xlu2 %1327  ;;  %v1502_v36 = vpack.c.bf16 %v2751_v21, %v2751_v21  ;;  %v2761_v21 = vld [vmem:[%s3064_s22 + $0x170] sm:$0xff] }
 0x1c7   : > { %1217 = vst.msk [vmem:[#allocation2 + $0x60] sm:$0xf] %vm1192_vm4, %v1145_v47  ;;  %v2759_v47 = vld [vmem:[%s3064_s22 + $0x158] sm:$0xff] }
 0x1c8   : > { %1421 = vst.msk [vmem:[#allocation2 + $0xc] sm:$0xf] %vm1417_vm5, %v1328_v10  ;;  %v1510_v10 = vpack.c.bf16 %v2759_v47, %v2759_v47 }
 0x1cb   : > { %1561 = vrot.lane.b32.xlu1 %v1491_v15, %s3012_s28  ;;  %1559 = vrot.lane.b32.xlu0 %v1490_v61, %s3012_s28 }
 0x1cc   : > { %1563 = vrot.lane.b32.xlu2 %v1492_v1, %s3012_s28  ;;  %v1509_v1 = vpack.c.bf16 %v2758_v32, %v2758_v32 }
 0x1cd   : > { %v1153_v26 = vpop.permute.xlu1 %1152  ;;  %v1151_v33 = vpop.permute.xlu0 %1150 }
 0x1ce   : > { %1221 = vst.msk [vmem:[#allocation2 + $0x70] sm:$0xf] %vm1192_vm4, %v1153_v26  ;;  %v1334_v62 = vpop.permute.xlu2 %1333 }
 0x1cf   : > { %1220 = vst.msk [vmem:[#allocation2 + $0x6c] sm:$0xf] %vm1192_vm4, %v1151_v33 }
 0x1d0   : > { %1424 = vst.msk [vmem:[#allocation2 + $0x18] sm:$0xf] %vm1417_vm5, %v1334_v62  ;;  %v1952_v62 = vpack.c.bf16 %v2815_v41, %v2815_v41 }
 0x1d3   : > { %1567 = vrot.lane.b32.xlu1 %v1494_v48, %s3012_s28  ;;  %1565 = vrot.lane.b32.xlu0 %v1493_v50, %s3012_s28 }
 0x1d4   : > { %1569 = vrot.lane.b32.xlu2 %v1495_v30, %s3012_s28 }
 0x1d5   : > { %v1159_v5 = vpop.permute.xlu1 %1158  ;;  %v1157_v13 = vpop.permute.xlu0 %1156 }
 0x1d6   : > { %1224 = vst.msk [vmem:[#allocation2 + $0x7c] sm:$0xf] %vm1192_vm4, %v1159_v5  ;;  %v1340_v8 = vpop.permute.xlu2 %1339 }
 0x1d7   : > { %1223 = vst.msk [vmem:[#allocation2 + $0x78] sm:$0xf] %vm1192_vm4, %v1157_v13 }
 0x1d8   : > { %1427 = vst.msk [vmem:[#allocation2 + $0x24] sm:$0xf] %vm1417_vm5, %v1340_v8 }
 0x1db   : > { %1573 = vrot.lane.b32.xlu1 %v1497_v40, %s3012_s28  ;;  %1571 = vrot.lane.b32.xlu0 %v1496_v31, %s3012_s28 }
 0x1dc   : > { %1575 = vrot.lane.b32.xlu2 %v1498_v23, %s3012_s28  ;;  %v2752_v23 = vld [vmem:[%s3064_s22 + $0x108] sm:$0xff] }
 0x1dd   : > { %v1326_v42 = vpop.permute.xlu1 %1325  ;;  %v1324_v56 = vpop.permute.xlu0 %1323 }
 0x1de   : > { %1420 = vst.msk [vmem:[#allocation2 + $0x8] sm:$0xf] %vm1417_vm5, %v1326_v42  ;;  %v1346_v20 = vpop.permute.xlu2 %1345 }
 0x1df   : > { %1419 = vst.msk [vmem:[#allocation2 + $0x4] sm:$0xf] %vm1417_vm5, %v1324_v56  ;;  %v1503_v56 = vpack.c.bf16 %v2752_v23, %v2752_v23 }
 0x1e0   : > { %1430 = vst.msk [vmem:[#allocation2 + $0x30] sm:$0xf] %vm1417_vm5, %v1346_v20 }
 0x1e3   : > { %1581 = vrot.lane.b32.xlu1 %v1501_v55, %s3012_s28  ;;  %1577 = vrot.lane.b32.xlu0 %v1499_v59, %s3012_s28 }
 0x1e4   : > { %1583 = vrot.lane.b32.xlu2 %v1502_v36, %s3012_s28 }
 0x1e5   : > { %v1332_v15 = vpop.permute.xlu1 %1331  ;;  %v1330_v61 = vpop.permute.xlu0 %1329 }
 0x1e6   : > { %1423 = vst.msk [vmem:[#allocation2 + $0x14] sm:$0xf] %vm1417_vm5, %v1332_v15  ;;  %v1352_v27 = vpop.permute.xlu2 %1351 }
 0x1e7   : > { %1422 = vst.msk [vmem:[#allocation2 + $0x10] sm:$0xf] %vm1417_vm5, %v1330_v61 }
 0x1e8   : > { %1433 = vst.msk [vmem:[#allocation2 + $0x3c] sm:$0xf] %vm1417_vm5, %v1352_v27 }
 0x1eb   : > { %1599 = vrot.lane.b32.xlu1 %v1510_v10, %s3012_s28  ;;  %1597 = vrot.lane.b32.xlu0 %v1509_v1, %s3012_s28 }
 0x1ec   : > { %1806 = vrot.lane.b32.xlu2 %v3593_v45, %s3013_s29  ;;  %v2822_v45 = vld [vmem:[%s3064_s22 + $0x152] sm:$0xff] }
 0x1ed   : > { %v1338_v12 = vpop.permute.xlu1 %1337  ;;  %v1336_v26 = vpop.permute.xlu0 %1335 }
 0x1ee   : > { %1426 = vst.msk [vmem:[#allocation2 + $0x20] sm:$0xf] %vm1417_vm5, %v1338_v12  ;;  %v1358_v33 = vpop.permute.xlu2 %1357 }
 0x1ef   : > { %1425 = vst.msk [vmem:[#allocation2 + $0x1c] sm:$0xf] %vm1417_vm5, %v1336_v26 }
 0x1f0   : > { %1436 = vst.msk [vmem:[#allocation2 + $0x48] sm:$0xf] %vm1417_vm5, %v1358_v33 }
 0x1f3   : > { %1822 = vrot.lane.b32.xlu1 %v3625_v38, %s3013_s29  ;;  %1808 = vrot.lane.b32.xlu0 %v3591_v14, %s3013_s29  ;;  %v1959_v38 = vpack.c.bf16 %v2822_v45, %v2822_v45 }
 0x1f4   : > { %1824 = vrot.lane.b32.xlu2 %v3638_v9, %s3013_s29  ;;  %v2767_v9 = vld [vmem:[%s3064_s22 + $0x39] sm:$0xff] }
 0x1f5   : > { %v1344_v48 = vpop.permute.xlu1 %1343  ;;  %v1342_v50 = vpop.permute.xlu0 %1341  ;;  %v1711_v5 = vpack.c.bf16 %v2767_v9, %v2767_v9 }
 0x1f6   : > { %1429 = vst.msk [vmem:[#allocation2 + $0x2c] sm:$0xf] %vm1417_vm5, %v1344_v48  ;;  %v1364_v30 = vpop.permute.xlu2 %1363 }
 0x1f7   : > { %1428 = vst.msk [vmem:[#allocation2 + $0x28] sm:$0xf] %vm1417_vm5, %v1342_v50 }
 0x1f8   : > { %1439 = vst.msk [vmem:[#allocation2 + $0x54] sm:$0xf] %vm1417_vm5, %v1364_v30 }
 0x1fb   : > { %2033 = vrot.lane.b32.xlu1 %v1952_v62, %s3014_s30  ;;  %2031 = vrot.lane.b32.xlu0 %v3741_v34, %s3014_s30  ;;  %v2774_v34 = vld [vmem:[%s3064_s22 + $0x91] sm:$0xff] }
 0x1fc   : > { %2047 = vrot.lane.b32.xlu2 %v1959_v38, %s3014_s30  ;;  %v1718_v40 = vpack.c.bf16 %v2774_v34, %v2774_v34 }
 0x1fd   : > { %v1350_v14 = vpop.permute.xlu1 %1349  ;;  %v1348_v11 = vpop.permute.xlu0 %1347 }
 0x1fe   : > { %1432 = vst.msk [vmem:[#allocation2 + $0x38] sm:$0xf] %vm1417_vm5, %v1350_v14  ;;  %v1370_v16 = vpop.permute.xlu2 %1369  ;;  %v2754_v14 = vld [vmem:[%s3064_s22 + $0x120] sm:$0xff] }
 0x1ff   : > { %1431 = vst.msk [vmem:[#allocation2 + $0x34] sm:$0xf] %vm1417_vm5, %v1348_v11 }
 0x200   : > { %1442 = vst.msk [vmem:[#allocation2 + $0x60] sm:$0xf] %vm1417_vm5, %v1370_v16 }
 0x203   : > { %1774 = vrot.lane.b32.xlu1 %v3527_v44, %s3013_s29  ;;  %2049 = vrot.lane.b32.xlu0 %v3782_v37, %s3014_s30 }
 0x204   : > { %1776 = vrot.lane.b32.xlu2 %v1711_v5, %s3013_s29  ;;  %v1505_v5 = vpack.c.bf16 %v2754_v14, %v2754_v14 }
 0x205   : > { %v1356_v13 = vpop.permute.xlu1 %1355  ;;  %v1354_v22 = vpop.permute.xlu0 %1353 }
 0x206   : > { %1435 = vst.msk [vmem:[#allocation2 + $0x44] sm:$0xf] %vm1417_vm5, %v1356_v13  ;;  %v1376_v31 = vpop.permute.xlu2 %1375  ;;  %v2755_v13 = vld [vmem:[%s3064_s22 + $0x128] sm:$0xff] }
 0x207   : > { %1434 = vst.msk [vmem:[#allocation2 + $0x40] sm:$0xf] %vm1417_vm5, %v1354_v22 }
 0x208   : > { %1445 = vst.msk [vmem:[#allocation2 + $0x6c] sm:$0xf] %vm1417_vm5, %v1376_v31 }
 0x20b   : > { %1792 = vrot.lane.b32.xlu1 %v3560_v6, %s3013_s29  ;;  %1790 = vrot.lane.b32.xlu0 %v1718_v40, %s3013_s29  ;;  %v2753_v6 = vld [vmem:[%s3064_s22 + $0x110] sm:$0xff] }
 0x20c   : > { %1999 = vrot.lane.b32.xlu2 %v3666_v46, %s3014_s30  ;;  %v2760_v46 = vld [vmem:[%s3064_s22 + $0x168] sm:$0xff]  ;;  %v1504_v42 = vpack.c.bf16 %v2753_v6, %v2753_v6 }
 0x20d   : > { %v1362_v44 = vpop.permute.xlu1 %1361  ;;  %v1360_v37 = vpop.permute.xlu0 %1359  ;;  %v2938_v6 = vld [vmem:[%s4317_s1 + $0x8] sm:$0xff] }
 0x20e   : > { %1438 = vst.msk [vmem:[#allocation2 + $0x50] sm:$0xf] %vm1417_vm5, %v1362_v44  ;;  %v1382_v8 = vpop.permute.xlu2 %1381  ;;  %v2763_v44 = vld [vmem:[%s3064_s22 + $0x188] sm:$0xff] }
 0x20f   : > { %1437 = vst.msk [vmem:[#allocation2 + $0x4c] sm:$0xf] %vm1417_vm5, %v1360_v37  ;;  %v1514_v23 = vpack.c.bf16 %v2763_v44, %v2763_v44 }
 0x210   : > { %1448 = vst.msk [vmem:[#allocation2 + $0x78] sm:$0xf] %vm1417_vm5, %v1382_v8  ;;  %v1506_v8 = vpack.c.bf16 %v2755_v13, %v2755_v13 }
 0x213   : > { %2015 = vrot.lane.b32.xlu1 %v3713_v53, %s3014_s30  ;;  %2001 = vrot.lane.b32.xlu0 %v3669_v29, %s3014_s30  ;;  %v1511_v29 = vpack.c.bf16 %v2760_v46, %v2760_v46 }
 0x214   : > { %2017 = vrot.lane.b32.xlu2 %v3711_v51, %s3014_s30  ;;  %v1512_v51 = vpack.c.bf16 %v2761_v21, %v2761_v21 }
 0x215   : > { %v1368_v28 = vpop.permute.xlu1 %1367  ;;  %v1366_v43 = vpop.permute.xlu0 %1365 }
 0x216   : > { %1441 = vst.msk [vmem:[#allocation2 + $0x5c] sm:$0xf] %vm1417_vm5, %v1368_v28  ;;  %v1552_v53 = vpop.permute.xlu2 %1551  ;;  %v2937_v28 = vld [vmem:[%s4317_s1] sm:$0xff] }
 0x217   : > { %1440 = vst.msk [vmem:[#allocation2 + $0x58] sm:$0xf] %vm1417_vm5, %v1366_v43  ;;  %v2786_v43 = vld [vmem:[%s3064_s22 + $0x121] sm:$0xff] }
 0x218   : > { %1647 = vst.msk [vmem:[#allocation2 + $0x4] sm:$0xf] %vm1645_vm6, %v1552_v53  ;;  %v1730_v53 = vpack.c.bf16 %v2786_v43, %v2786_v43 }
 0x21b   : > { %1587 = vrot.lane.b32.xlu1 %v1504_v42, %s3012_s28  ;;  %1585 = vrot.lane.b32.xlu0 %v1503_v56, %s3012_s28  ;;  %v2794_v56 = vld [vmem:[%s3064_s22 + $0x181] sm:$0xff] }
 0x21c   : > { %1601 = vrot.lane.b32.xlu2 %v1511_v29, %s3012_s28  ;;  %v1738_v21 = vpack.c.bf16 %v2794_v56, %v2794_v56 }
 0x21d   : > { %v1374_v55 = vpop.permute.xlu1 %1373  ;;  %v1372_v59 = vpop.permute.xlu0 %1371 }
 0x21e   : > { %1444 = vst.msk [vmem:[#allocation2 + $0x68] sm:$0xf] %vm1417_vm5, %v1374_v55  ;;  %v1558_v20 = vpop.permute.xlu2 %1557  ;;  %v2818_v55 = vld [vmem:[%s3064_s22 + $0x122] sm:$0xff] }
 0x21f   : > { %1443 = vst.msk [vmem:[#allocation2 + $0x64] sm:$0xf] %vm1417_vm5, %v1372_v59 }
 0x220   : > { %1650 = vst.msk [vmem:[#allocation2 + $0x10] sm:$0xf] %vm1645_vm6, %v1558_v20  ;;  %v1955_v20 = vpack.c.bf16 %v2818_v55, %v2818_v55 }
 0x223   : > { %1810 = vrot.lane.b32.xlu1 %v3596_v35, %s3013_s29  ;;  %1603 = vrot.lane.b32.xlu0 %v1512_v51, %s3012_s28  ;;  %v2824_v35 = vld [vmem:[%s3064_s22 + $0x16a] sm:$0xff] }
 0x224   : > { %1812 = vrot.lane.b32.xlu2 %v3609_v24, %s3013_s29  ;;  %v2825_v24 = vld [vmem:[%s3064_s22 + $0x172] sm:$0xff]  ;;  %v1961_v10 = vpack.c.bf16 %v2824_v35, %v2824_v35  ;;  %v2770_v35 = vld [vmem:[%s3064_s22 + $0x61] sm:$0xff] }
 0x225   : > { %v1380_v36 = vpop.permute.xlu1 %1379  ;;  %v1378_v47 = vpop.permute.xlu0 %1377 }
 0x226   : > { %1447 = vst.msk [vmem:[#allocation2 + $0x74] sm:$0xf] %vm1417_vm5, %v1380_v36  ;;  %v1564_v32 = vpop.permute.xlu2 %1563 }
 0x227   : > { %1446 = vst.msk [vmem:[#allocation2 + $0x70] sm:$0xf] %vm1417_vm5, %v1378_v47 }
 0x228   : > { %1653 = vst.msk [vmem:[#allocation2 + $0x1c] sm:$0xf] %vm1645_vm6, %v1564_v32 }
 0x22b   : > { %1828 = vrot.lane.b32.xlu1 %v3641_v3, %s3013_s29  ;;  %1826 = vrot.lane.b32.xlu0 %v3636_v2, %s3013_s29  ;;  %v1962_v3 = vpack.c.bf16 %v2825_v24, %v2825_v24  ;;  %v2768_v2 = vld [vmem:[%s3064_s22 + $0x49] sm:$0xff] }
 0x22c   : > { %2035 = vrot.lane.b32.xlu2 %v3752_v7, %s3014_s30  ;;  %v2776_v7 = vld [vmem:[%s3064_s22 + $0xa9] sm:$0xff]  ;;  %v1712_v26 = vpack.c.bf16 %v2768_v2, %v2768_v2 }
 0x22d   : > { %v1550_v15 = vpop.permute.xlu1 %1549  ;;  %v1384_v61 = vpop.permute.xlu0 %1383  ;;  %v1720_v41 = vpack.c.bf16 %v2776_v7, %v2776_v7  ;;  %v2779_v2 = vld [vmem:[%s3064_s22 + $0xc9] sm:$0xff] }
 0x22e   : > { %1646 = vst.msk [vmem:[#allocation2] sm:$0xf] %vm1645_vm6, %v1550_v15  ;;  %v1570_v1 = vpop.permute.xlu2 %1569  ;;  %v1714_v15 = vpack.c.bf16 %v2770_v35, %v2770_v35 }
 0x22f   : > { %1449 = vst.msk [vmem:[#allocation2 + $0x7c] sm:$0xf] %vm1417_vm5, %v1384_v61  ;;  %v2771_v61 = vld [vmem:[%s3064_s22 + $0x69] sm:$0xff] }
 0x230   : > { %1656 = vst.msk [vmem:[#allocation2 + $0x28] sm:$0xf] %vm1645_vm6, %v1570_v1  ;;  %v1715_v1 = vpack.c.bf16 %v2771_v61, %v2771_v61 }
 0x233   : > { %2051 = vrot.lane.b32.xlu1 %v1961_v10, %s3014_s30  ;;  %2037 = vrot.lane.b32.xlu0 %v3755_v54, %s3014_s30  ;;  %v2777_v54 = vld [vmem:[%s3064_s22 + $0xb1] sm:$0xff] }
 0x234   : > { %2053 = vrot.lane.b32.xlu2 %v1962_v3, %s3014_s30  ;;  %v1721_v45 = vpack.c.bf16 %v2777_v54, %v2777_v54 }
 0x235   : > { %v1556_v27 = vpop.permute.xlu1 %1555  ;;  %v1554_v12 = vpop.permute.xlu0 %1553 }
 0x236   : > { %1649 = vst.msk [vmem:[#allocation2 + $0xc] sm:$0xf] %vm1645_vm6, %v1556_v27  ;;  %v1576_v33 = vpop.permute.xlu2 %1575  ;;  %v1723_v27 = vpack.c.bf16 %v2779_v2, %v2779_v2 }
 0x237   : > { %1648 = vst.msk [vmem:[#allocation2 + $0x8] sm:$0xf] %vm1645_vm6, %v1554_v12 }
 0x238   : > { %1659 = vst.msk [vmem:[#allocation2 + $0x34] sm:$0xf] %vm1645_vm6, %v1576_v33 }
 0x23b   : > { %1780 = vrot.lane.b32.xlu1 %v3539_v57, %s3013_s29  ;;  %1778 = vrot.lane.b32.xlu0 %v1712_v26, %s3013_s29  ;;  %v2809_v57 = vld [vmem:[%s3064_s22 + $0xb2] sm:$0xff]  ;;  %v2810_v26 = vld [vmem:[%s3064_s22 + $0xc2] sm:$0xff] }
 0x23c   : > { %1794 = vrot.lane.b32.xlu2 %v1720_v41, %s3013_s29  ;;  %v1946_v11 = vpack.c.bf16 %v2809_v57, %v2809_v57  ;;  %v1947_v33 = vpack.c.bf16 %v2810_v26, %v2810_v26  ;;  %v2756_v41 = vld [vmem:[%s3064_s22 + $0x138] sm:$0xff]  ;;  %v2757_v57 = vld [vmem:[%s3064_s22 + $0x140] sm:$0xff] }
 0x23d   : > { %v1562_v48 = vpop.permute.xlu1 %1561  ;;  %v1560_v50 = vpop.permute.xlu0 %1559  ;;  %v2812_v26 = vld [vmem:[%s3064_s22 + $0xda] sm:$0xff] }
 0x23e   : > { %1652 = vst.msk [vmem:[#allocation2 + $0x18] sm:$0xf] %vm1645_vm6, %v1562_v48  ;;  %v1584_v62 = vpop.permute.xlu2 %1583 }
 0x23f   : > { %1651 = vst.msk [vmem:[#allocation2 + $0x14] sm:$0xf] %vm1645_vm6, %v1560_v50 }
 0x240   : > { %1663 = vst.msk [vmem:[#allocation2 + $0x44] sm:$0xf] %vm1645_vm6, %v1584_v62 }
 0x243   : > { %2003 = vrot.lane.b32.xlu1 %v3683_v0, %s3014_s30  ;;  %1796 = vrot.lane.b32.xlu0 %v1721_v45, %s3013_s29  ;;  %v2164_v0 = vld [vmem:[%s4317_s1 + $0x10] sm:$0x3]  ;;  %v1507_v45 = vpack.c.bf16 %v2756_v41, %v2756_v41  ;;  %v2813_v41 = vld [vmem:[%s3064_s22 + $0xe2] sm:$0xff] }
 0x244   : > { %2005 = vrot.lane.b32.xlu2 %v3681_v39, %s3014_s30  ;;  %v2254_v16 = vunpack.c.l.b16 %v2164_v0  ;;  %v2762_v39 = vld [vmem:[%s3064_s22 + $0x180] sm:$0xff] }
 0x245   : > { %v1568_v30 = vpop.permute.xlu1 %1567  ;;  %v1566_v38 = vpop.permute.xlu0 %1565  ;;  %v1513_v37 = vpack.c.bf16 %v2762_v39, %v2762_v39 }
 0x246   : > { %1655 = vst.msk [vmem:[#allocation2 + $0x24] sm:$0xf] %vm1645_vm6, %v1568_v30  ;;  %v1807_v9 = vpop.permute.xlu2 %1806  ;;  %v2257_v34 = vpack.c.b16 %v2254_v16, %v2254_v16  ;;  %v2764_v30 = vld [vmem:[%s3064_s22 + $0x198] sm:$0xff] }
 0x247   : > { %1654 = vst.msk [vmem:[#allocation2 + $0x20] sm:$0xf] %vm1645_vm6, %v1566_v38  ;;  %v2788_v16 = vld [vmem:[%s3064_s22 + $0x139] sm:$0xff] }
 0x248   : > { %v2311_v22 = vsel %vm2309_vm7, %v2257_v34, 0  ;;  %v2789_v34 = vld [vmem:[%s3064_s22 + $0x141] sm:$0xff] }
 0x249   : > { %2940 = vmatpush.bf16.msra.mxu2 %v2311_v22  ;;  %2941 = vmatpush.bf16.msra.mxu3 %v2311_v22  ;;  %v1733_v44 = vpack.c.bf16 %v2789_v34, %v2789_v34 }
 0x24a   : > { %2318 = vmatpush.bf16.msra.mxu0 %v2311_v22  ;;  %2939 = vmatpush.bf16.msra.mxu1 %v2311_v22 }
 0x24b   : > { %2021 = vrot.lane.b32.xlu1 %v1946_v11, %s3014_s30  ;;  %2019 = vrot.lane.b32.xlu0 %v3716_v4, %s3014_s30 }
 0x24c   : > { %1589 = vrot.lane.b32.xlu2 %v1505_v5, %s3012_s28  ;;  %v1732_v5 = vpack.c.bf16 %v2788_v16, %v2788_v16 }
 0x24d   : > { %v1574_v40 = vpop.permute.xlu1 %1573  ;;  %v1572_v31 = vpop.permute.xlu0 %1571  ;;  %2943 = vmatpush.bf16.msra.mxu2 %v2938_v6  ;;  %2944 = vmatpush.bf16.msra.mxu3 %v2938_v6 }
 0x24e   : > { %1658 = vst.msk [vmem:[#allocation2 + $0x30] sm:$0xf] %vm1645_vm6, %v1574_v40  ;;  %v1825_v4 = vpop.permute.xlu2 %1824  ;;  %2319 = vmatpush.bf16.msra.mxu0 %v2938_v6  ;;  %2942 = vmatpush.bf16.msra.mxu1 %v2938_v6  ;;  %v2821_v6 = vld [vmem:[%s3064_s22 + $0x142] sm:$0xff] }
 0x24f   : > { %1657 = vst.msk [vmem:[#allocation2 + $0x2c] sm:$0xf] %vm1645_vm6, %v1572_v31  ;;  %v1958_v43 = vpack.c.bf16 %v2821_v6, %v2821_v6 }
 0x251   : > { %2946 = vmatpush.bf16.msra.mxu2 %v2937_v28  ;;  %2947 = vmatpush.bf16.msra.mxu3 %v2937_v28 }
 0x252   : > { %2320 = vmatpush.bf16.msra.mxu0 %v2937_v28  ;;  %2945 = vmatpush.bf16.msra.mxu1 %v2937_v28 }
 0x253   : > { %1605 = vrot.lane.b32.xlu1 %v1513_v37, %s3012_s28  ;;  %1591 = vrot.lane.b32.xlu0 %v1506_v8, %s3012_s28  ;;  %v2797_v8 = vld [vmem:[%s3064_s22 + $0x1a1] sm:$0xff] }
 0x254   : > { %1607 = vrot.lane.b32.xlu2 %v1514_v23, %s3012_s28 }
 0x255   : > { %v1582_v46 = vpop.permute.xlu1 %1581  ;;  %v1578_v42 = vpop.permute.xlu0 %1577 }
 0x256   : > { %1662 = vst.msk [vmem:[#allocation2 + $0x40] sm:$0xf] %vm1645_vm6, %v1582_v46  ;;  %v2048_v29 = vpop.permute.xlu2 %2047 }
 0x257   : > { %1660 = vst.msk [vmem:[#allocation2 + $0x38] sm:$0xf] %vm1645_vm6, %v1578_v42  ;;  %v2828_v42 = vld [vmem:[%s3064_s22 + $0x19a] sm:$0xff] }
 0x258   : > { %1887 = vst.msk [vmem:[#allocation2 + $0x40] sm:$0xf] %vm1870_vm8, %v1807_v9  ;;  %v1515_v9 = vpack.c.bf16 %v2764_v30, %v2764_v30  ;;  %v1965_v56 = vpack.c.bf16 %v2828_v42, %v2828_v42 }
 0x25b   : > { %1816 = vrot.lane.b32.xlu1 %v3612_v49, %s3013_s29  ;;  %1814 = vrot.lane.b32.xlu0 %v1730_v53, %s3013_s29  ;;  %v2749_v53 = vld [vmem:[%s3064_s22 + $0xe0] sm:$0xff] }
 0x25c   : > { %1830 = vrot.lane.b32.xlu2 %v1738_v21, %s3013_s29 }
 0x25d   : > { %v1600_v59 = vpop.permute.xlu1 %1599  ;;  %v1598_v51 = vpop.permute.xlu0 %1597 }
 0x25e   : > { %1671 = vst.msk [vmem:[#allocation2 + $0x64] sm:$0xf] %vm1645_vm6, %v1600_v59  ;;  %v1777_v36 = vpop.permute.xlu2 %1776  ;;  %v1500_v59 = vpack.c.bf16 %v2749_v53, %v2749_v53  ;;  %v4148_v53 = vld [vmem:[%s4319_s3] ss:$0 sm:$0xff] }
 0x25f   : > { %1670 = vst.msk [vmem:[#allocation2 + $0x60] sm:$0xf] %vm1645_vm6, %v1598_v51 }
 0x260   : > { %1896 = vst.msk [vmem:[#allocation2 + $0x64] sm:$0xf] %vm1870_vm8, %v1825_v4  ;;  %v1741_v4 = vpack.c.bf16 %v2797_v8, %v2797_v8 }
 0x261   : > { %1872 = vst.msk [vmem:[#allocation2 + $0x4] sm:$0xf] %vm1870_vm8, %v1777_v36  ;;  %v2772_v36 = vld [vmem:[%s3064_s22 + $0x79] sm:$0xff] }
 0x263   : > { %2039 = vrot.lane.b32.xlu1 %v1955_v20, %s3014_s30  ;;  %1832 = vrot.lane.b32.xlu0 %v3654_v17, %s3013_s29  ;;  %v2778_v17 = vld [vmem:[%s3064_s22 + $0xc1] sm:$0xff] }
 0x264   : > { %2041 = vrot.lane.b32.xlu2 %v3767_v52, %s3014_s30  ;;  %v1722_v10 = vpack.c.bf16 %v2778_v17, %v2778_v17 }
 0x265   : > { %v1823_v49 = vpop.permute.xlu1 %1822  ;;  %v1809_v47 = vpop.permute.xlu0 %1808 }
 0x266   : > { %1895 = vst.msk [vmem:[#allocation2 + $0x60] sm:$0xf] %vm1870_vm8, %v1823_v49  ;;  %v2000_v32 = vpop.permute.xlu2 %1999  ;;  %v2780_v49 = vld [vmem:[%s3064_s22 + $0xd9] sm:$0xff] }
 0x267   : > { %1888 = vst.msk [vmem:[#allocation2 + $0x44] sm:$0xf] %vm1870_vm8, %v1809_v47  ;;  %v2773_v47 = vld [vmem:[%s3064_s22 + $0x81] sm:$0xff] }
 0x268   : > { %2120 = vst.msk [vmem:[#allocation2 + $0x60] sm:$0xf] %vm2095_vm9, %v2048_v29  ;;  %v2829_v29 = vld [vmem:[%s3064_s22 + $0x1a2] sm:$0xff]  ;;  %v1717_v17 = vpack.c.bf16 %v2773_v47, %v2773_v47 }
 0x269   : > { %v1966_v51 = vpack.c.bf16 %v2829_v29, %v2829_v29 }
 0x26b   : > { %2057 = vrot.lane.b32.xlu1 %v3807_v58, %s3014_s30  ;;  %2055 = vrot.lane.b32.xlu0 %v3794_v63, %s3014_s30 }
 0x26c   : > { %1782 = vrot.lane.b32.xlu2 %v1714_v15, %s3013_s29  ;;  %v1724_v15 = vpack.c.bf16 %v2780_v49, %v2780_v49 }
 0x26d   : > { %v2034_v52 = vpop.permute.xlu1 %2033  ;;  %v2032_v24 = vpop.permute.xlu0 %2031 }
 0x26e   : > { %2113 = vst.msk [vmem:[#allocation2 + $0x44] sm:$0xf] %vm2095_vm9, %v2034_v52  ;;  %v2018_v3 = vpop.permute.xlu2 %2017  ;;  %v2781_v52 = vld [vmem:[%s3064_s22 + $0xe1] sm:$0xff] }
 0x26f   : > { %2112 = vst.msk [vmem:[#allocation2 + $0x40] sm:$0xf] %vm2095_vm9, %v2032_v24  ;;  %v1725_v24 = vpack.c.bf16 %v2781_v52, %v2781_v52 }
 0x273   : > { %1798 = vrot.lane.b32.xlu1 %v1722_v10, %s3013_s29  ;;  %1784 = vrot.lane.b32.xlu0 %v1715_v1, %s3013_s29  ;;  %v2805_v10 = vld [vmem:[%s3064_s22 + $0x82] sm:$0xff]  ;;  %v2804_v1 = vld [vmem:[%s3064_s22 + $0x7a] sm:$0xff] }
 0x274   : > { %1800 = vrot.lane.b32.xlu2 %v1723_v27, %s3013_s29 }
 0x275   : > { %v1775_v63 = vpop.permute.xlu1 %1774  ;;  %v2050_v58 = vpop.permute.xlu0 %2049 }
 0x276   : > { %1871 = vst.msk [vmem:[#allocation2] sm:$0xf] %vm1870_vm8, %v1775_v63  ;;  %v2929_v12 = vld [vmem:[#allocation2 + $0x40] sm:$0xff]  ;;  %v1602_v7 = vpop.permute.xlu2 %1601 }
 0x277   : > { %2121 = vst.msk [vmem:[#allocation2 + $0x64] sm:$0xf] %vm2095_vm9, %v2050_v58  ;;  %2910 = vmatmul.msk.bf16.vlgmr.msra.gmra.mxu2 %vm2260_vm10, %v2929_v12  ;;  %v1942_v58 = vpack.c.bf16 %v2805_v10, %v2805_v10  ;;  %v1941_v12 = vpack.c.bf16 %v2804_v1, %v2804_v1 }
 0x278   : > { %2096 = vst.msk [vmem:[#allocation2] sm:$0xf] %vm2095_vm9, %v2000_v32 }
 0x279   : > { %1672 = vst.msk [vmem:[#allocation2 + $0x68] sm:$0xf] %vm1645_vm6, %v1602_v7 }
 0x27b   : > { %2009 = vrot.lane.b32.xlu1 %v3699_v19, %s3014_s30  ;;  %2007 = vrot.lane.b32.xlu0 %v3686_v60, %s3014_s30  ;;  %v1508_v60 = vpack.c.bf16 %v2757_v57, %v2757_v57  ;;  %v2765_v19 = vld [vmem:[%s3064_s22 + $0x1a0] sm:$0xff] }
 0x27c   : > { %2023 = vrot.lane.b32.xlu2 %v1947_v33, %s3014_s30  ;;  %v1516_v11 = vpack.c.bf16 %v2765_v19, %v2765_v19  ;;  %v1949_v33 = vpack.c.bf16 %v2812_v26, %v2812_v26 }
 0x27d   : > { %v1793_v54 = vpop.permute.xlu1 %1792  ;;  %v1791_v48 = vpop.permute.xlu0 %1790 }
 0x27e   : > { %1880 = vst.msk [vmem:[#allocation2 + $0x24] sm:$0xf] %vm1870_vm8, %v1793_v54  ;;  %v2933_v50 = vld [vmem:[#allocation2 + $0x60] sm:$0xff]  ;;  %v1813_v62 = vpop.permute.xlu2 %1812 }
 0x27f   : > { %1879 = vst.msk [vmem:[#allocation2 + $0x20] sm:$0xf] %vm1870_vm8, %v1791_v48  ;;  %2914 = vmatmul.msk.bf16.vlgmr.msra.gmra.mxu3 %vm2260_vm10, %v2933_v50  ;;  %v1950_v50 = vpack.c.bf16 %v2813_v41, %v2813_v41 }
 0x280   : > { %2105 = vst.msk [vmem:[#allocation2 + $0x24] sm:$0xf] %vm2095_vm9, %v2018_v3 }
 0x283   : > { %1593 = vrot.lane.b32.xlu1 %v1507_v45, %s3012_s28  ;;  %2025 = vrot.lane.b32.xlu0 %v3729_v25, %s3014_s30  ;;  %v2796_v25 = vld [vmem:[%s3064_s22 + $0x199] sm:$0xff]  ;;  %s4157_s22 = scalar_lea.vmem %s4320_s4, %s2920_s19 }
 0x284   : > { %1595 = vrot.lane.b32.xlu2 %v1508_v60, %s3012_s28  ;;  %v1740_v31 = vpack.c.bf16 %v2796_v25, %v2796_v25 }
 0x285   : > { %v2016_v38 = vpop.permute.xlu1 %2015  ;;  %v2002_v14 = vpop.permute.xlu0 %2001 }
 0x286   : > { %2104 = vst.msk [vmem:[#allocation2 + $0x20] sm:$0xf] %vm2095_vm9, %v2016_v38  ;;  %v2036_v0 = vpop.permute.xlu2 %2035 }
 0x287   : > { %2097 = vst.msk [vmem:[#allocation2 + $0x4] sm:$0xf] %vm2095_vm9, %v2002_v14 }
 0x28b   : > { %1611 = vrot.lane.b32.xlu1 %v1516_v11, %s3012_s28  ;;  %1609 = vrot.lane.b32.xlu0 %v1515_v9, %s3012_s28 }
 0x28c   : > { %1818 = vrot.lane.b32.xlu2 %v1732_v5, %s3013_s29 }
 0x28d   : > { %v1588_v39 = vpop.permute.xlu1 %1587  ;;  %v1586_v13 = vpop.permute.xlu0 %1585  ;;  %v2925_v22 = vld [vmem:[#allocation2 + $0x20] sm:$0xff] }
 0x28e   : > { %1665 = vst.msk [vmem:[#allocation2 + $0x4c] sm:$0xf] %vm1645_vm6, %v1588_v39  ;;  %v2921_v40 = vld [vmem:[#allocation2] sm:$0xff]  ;;  %2906 = vmatmul.msk.bf16.vlgmr.msra.gmra.mxu1 %vm2260_vm10, %v2925_v22  ;;  %v2054_v37 = vpop.permute.xlu2 %2053 }
 0x28f   : > { %1664 = vst.msk [vmem:[#allocation2 + $0x48] sm:$0xf] %vm1645_vm6, %v1586_v13  ;;  %2902 = vmatmul.msk.bf16.vlgmr.msra.gmra.mxu0 %vm2260_vm10, %v2921_v40 }
 0x290   : > { %1890 = vst.msk [vmem:[#allocation2 + $0x4c] sm:$0xf] %vm1870_vm8, %v1813_v62 }
 0x293   : > { %1834 = vrot.lane.b32.xlu1 %v1740_v31, %s3013_s29  ;;  %1820 = vrot.lane.b32.xlu0 %v1733_v44, %s3013_s29 }
 0x294   : > { %1836 = vrot.lane.b32.xlu2 %v1741_v4, %s3013_s29 }
 0x295   : > { %v1811_v23 = vpop.permute.xlu1 %1810  ;;  %v1604_v28 = vpop.permute.xlu0 %1603 }
 0x296   : > { %1889 = vst.msk [vmem:[#allocation2 + $0x48] sm:$0xf] %vm1870_vm8, %v1811_v23  ;;  %v1795_v46 = vpop.permute.xlu2 %1794 }
 0x297   : > { %1673 = vst.msk [vmem:[#allocation2 + $0x6c] sm:$0xf] %vm1645_vm6, %v1604_v28 }
 0x298   : > { %2114 = vst.msk [vmem:[#allocation2 + $0x48] sm:$0xf] %vm2095_vm9, %v2036_v0 }
 0x299   : > { %1881 = vst.msk [vmem:[#allocation2 + $0x28] sm:$0xf] %vm1870_vm8, %v1795_v46 }
 0x29b   : > { %2045 = vrot.lane.b32.xlu1 %v1958_v43, %s3014_s30  ;;  %2043 = vrot.lane.b32.xlu0 %v3770_v18, %s3014_s30  ;;  %v1716_v18 = vpack.c.bf16 %v2772_v36, %v2772_v36 }
 0x29c   : > { %2059 = vrot.lane.b32.xlu2 %v1965_v56, %s3014_s30  ;;  %v4142_v56 = vld [vmem:[%s4318_s2] ss:$0 sm:$0xff] }
 0x29d   : > { %v1829_v21 = vpop.permute.xlu1 %1828  ;;  %v1827_v55 = vpop.permute.xlu0 %1826 }
 0x29e   : > { %1898 = vst.msk [vmem:[#allocation2 + $0x6c] sm:$0xf] %vm1870_vm8, %v1829_v21  ;;  %v2006_v20 = vpop.permute.xlu2 %2005 }
 0x29f   : > { %1897 = vst.msk [vmem:[#allocation2 + $0x68] sm:$0xf] %vm1870_vm8, %v1827_v55 }
 0x2a0   : > { %2123 = vst.msk [vmem:[#allocation2 + $0x6c] sm:$0xf] %vm2095_vm9, %v2054_v37 }
 0x2a3   : > { %1579 = vrot.lane.b32.xlu1 %v1500_v59, %s3012_s28  ;;  %2061 = vrot.lane.b32.xlu0 %v1966_v51, %s3014_s30 }
 0x2a4   : > { %1786 = vrot.lane.b32.xlu2 %v1716_v18, %s3013_s29 }
 0x2a5   : > { %v2052_v32 = vpop.permute.xlu1 %2051  ;;  %v2038_v35 = vpop.permute.xlu0 %2037 }
 0x2a6   : > { %2122 = vst.msk [vmem:[#allocation2 + $0x68] sm:$0xf] %vm2095_vm9, %v2052_v32  ;;  %v1590_v61 = vpop.permute.xlu2 %1589 }
 0x2a7   : > { %2115 = vst.msk [vmem:[#allocation2 + $0x4c] sm:$0xf] %vm2095_vm9, %v2038_v35 }
 0x2a8   : > { %1666 = vst.msk [vmem:[#allocation2 + $0x50] sm:$0xf] %vm1645_vm6, %v1590_v61 }
 0x2ab   : > { %1802 = vrot.lane.b32.xlu1 %v1724_v15, %s3013_s29  ;;  %1788 = vrot.lane.b32.xlu0 %v1717_v17, %s3013_s29 }
 0x2ac   : > { %1804 = vrot.lane.b32.xlu2 %v1725_v24, %s3013_s29 }
 0x2ad   : > { %v1781_v3 = vpop.permute.xlu1 %1780  ;;  %v1779_v2 = vpop.permute.xlu0 %1778  ;;  %v2934_v27 = vld [vmem:[#allocation2 + $0x68] sm:$0xff] }
 0x2ae   : > { %1874 = vst.msk [vmem:[#allocation2 + $0xc] sm:$0xf] %vm1870_vm8, %v1781_v3  ;;  %v2930_v63 = vld [vmem:[#allocation2 + $0x48] sm:$0xff]  ;;  %2915 = vmatmul.msk.bf16.gmra.mxu3 %vm2260_vm10, %v2934_v27  ;;  %v1608_v7 = vpop.permute.xlu2 %1607 }
 0x2af   : > { %1873 = vst.msk [vmem:[#allocation2 + $0x8] sm:$0xf] %vm1870_vm8, %v1779_v2  ;;  %2911 = vmatmul.msk.bf16.gmra.mxu2 %vm2260_vm10, %v2930_v63 }
 0x2b0   : > { %2099 = vst.msk [vmem:[#allocation2 + $0xc] sm:$0xf] %vm2095_vm9, %v2006_v20 }
 0x2b1   : > { %1675 = vst.msk [vmem:[#allocation2 + $0x74] sm:$0xf] %vm1645_vm6, %v1608_v7 }
 0x2b3   : > { %2013 = vrot.lane.b32.xlu1 %v1942_v58, %s3014_s30  ;;  %2011 = vrot.lane.b32.xlu0 %v1941_v12, %s3014_s30 }
 0x2b4   : > { %2027 = vrot.lane.b32.xlu2 %v1949_v33, %s3014_s30 }
 0x2b5   : > { %v2004_v54 = vpop.permute.xlu1 %2003  ;;  %v1797_v48 = vpop.permute.xlu0 %1796 }
 0x2b6   : > { %2098 = vst.msk [vmem:[#allocation2 + $0x8] sm:$0xf] %vm2095_vm9, %v2004_v54  ;;  %v1831_v45 = vpop.permute.xlu2 %1830 }
 0x2b7   : > { %1882 = vst.msk [vmem:[#allocation2 + $0x2c] sm:$0xf] %vm1870_vm8, %v1797_v48 }
 0x2bb   : > { %2029 = vrot.lane.b32.xlu0 %v1950_v50, %s3014_s30 }
 0x2bd   : > { %v2022_v62 = vpop.permute.xlu1 %2021  ;;  %v2020_v57 = vpop.permute.xlu0 %2019  ;;  %v2922_v60 = vld [vmem:[#allocation2 + $0x8] sm:$0xff] }
 0x2be   : > { %2107 = vst.msk [vmem:[#allocation2 + $0x2c] sm:$0xf] %vm2095_vm9, %v2022_v62  ;;  %2903 = vmatmul.msk.bf16.gmra.mxu0 %vm2260_vm10, %v2922_v60  ;;  %v2042_v19 = vpop.permute.xlu2 %2041 }
 0x2bf   : > { %2106 = vst.msk [vmem:[#allocation2 + $0x28] sm:$0xf] %vm2095_vm9, %v2020_v57 }
 0x2c5   : > { %v1606_v30 = vpop.permute.xlu1 %1605  ;;  %v1592_v38 = vpop.permute.xlu0 %1591 }
 0x2c6   : > { %1674 = vst.msk [vmem:[#allocation2 + $0x70] sm:$0xf] %vm1645_vm6, %v1606_v30  ;;  %v2926_v14 = vld [vmem:[#allocation2 + $0x28] sm:$0xff]  ;;  %v1783_v11 = vpop.permute.xlu2 %1782 }
 0x2c7   : > { %1667 = vst.msk [vmem:[#allocation2 + $0x54] sm:$0xf] %vm1645_vm6, %v1592_v38  ;;  %2907 = vmatmul.msk.bf16.gmra.mxu1 %vm2260_vm10, %v2926_v14 }
 0x2c8   : > { %1899 = vst.msk [vmem:[#allocation2 + $0x70] sm:$0xf] %vm1870_vm8, %v1831_v45 }
 0x2c9   : > { %1875 = vst.msk [vmem:[#allocation2 + $0x10] sm:$0xf] %vm1870_vm8, %v1783_v11 }
 0x2cd   : > { %v1817_v9 = vpop.permute.xlu1 %1816  ;;  %v1815_v0 = vpop.permute.xlu0 %1814 }
 0x2ce   : > { %1892 = vst.msk [vmem:[#allocation2 + $0x54] sm:$0xf] %vm1870_vm8, %v1817_v9  ;;  %v1801_v16 = vpop.permute.xlu2 %1800 }
 0x2cf   : > { %1891 = vst.msk [vmem:[#allocation2 + $0x50] sm:$0xf] %vm1870_vm8, %v1815_v0 }
 0x2d0   : > { %2117 = vst.msk [vmem:[#allocation2 + $0x54] sm:$0xf] %vm2095_vm9, %v2042_v19 }
 0x2d1   : > { %1884 = vst.msk [vmem:[#allocation2 + $0x34] sm:$0xf] %vm1870_vm8, %v1801_v16 }
 0x2d5   : > { %v2040_v5 = vpop.permute.xlu1 %2039  ;;  %v1833_v25 = vpop.permute.xlu0 %1832 }
 0x2d6   : > { %2116 = vst.msk [vmem:[#allocation2 + $0x50] sm:$0xf] %vm2095_vm9, %v2040_v5  ;;  %v2024_v34 = vpop.permute.xlu2 %2023 }
 0x2d7   : > { %1900 = vst.msk [vmem:[#allocation2 + $0x74] sm:$0xf] %vm1870_vm8, %v1833_v25 }
 0x2dd   : > { %v2058_v39 = vpop.permute.xlu1 %2057  ;;  %v2056_v13 = vpop.permute.xlu0 %2055  ;;  %v2931_v22 = vld [vmem:[#allocation2 + $0x50] sm:$0xff] }
 0x2de   : > { %2125 = vst.msk [vmem:[#allocation2 + $0x74] sm:$0xf] %vm2095_vm9, %v2058_v39  ;;  %2912 = vmatmul.msk.bf16.gmra.mxu2 %vm2260_vm10, %v2931_v22  ;;  %v1596_v40 = vpop.permute.xlu2 %1595 }
 0x2df   : > { %2124 = vst.msk [vmem:[#allocation2 + $0x70] sm:$0xf] %vm2095_vm9, %v2056_v13 }
 0x2e0   : > { %1669 = vst.msk [vmem:[#allocation2 + $0x5c] sm:$0xf] %vm1645_vm6, %v1596_v40 }
 0x2e5   : > { %v1799_v31 = vpop.permute.xlu1 %1798  ;;  %v1785_v44 = vpop.permute.xlu0 %1784 }
 0x2e6   : > { %1883 = vst.msk [vmem:[#allocation2 + $0x30] sm:$0xf] %vm1870_vm8, %v1799_v31  ;;  %v2935_v37 = vld [vmem:[#allocation2 + $0x70] sm:$0xff]  ;;  %v1819_v8 = vpop.permute.xlu2 %1818 }
 0x2e7   : > { %1876 = vst.msk [vmem:[#allocation2 + $0x14] sm:$0xf] %vm1870_vm8, %v1785_v44  ;;  %2916 = vmatmul.msk.bf16.gmra.mxu3 %vm2260_vm10, %v2935_v37 }
 0x2e8   : > { %2108 = vst.msk [vmem:[#allocation2 + $0x30] sm:$0xf] %vm2095_vm9, %v2024_v34 }
 0x2ed   : > { %v2010_v4 = vpop.permute.xlu1 %2009  ;;  %v2008_v6 = vpop.permute.xlu0 %2007 }
 0x2ee   : > { %2101 = vst.msk [vmem:[#allocation2 + $0x14] sm:$0xf] %vm2095_vm9, %v2010_v4  ;;  %v1837_v23 = vpop.permute.xlu2 %1836 }
 0x2ef   : > { %2100 = vst.msk [vmem:[#allocation2 + $0x10] sm:$0xf] %vm2095_vm9, %v2008_v6 }
 0x2f5   : > { %v1594_v28 = vpop.permute.xlu1 %1593  ;;  %v2026_v43 = vpop.permute.xlu0 %2025 }
 0x2f6   : > { %1668 = vst.msk [vmem:[#allocation2 + $0x58] sm:$0xf] %vm1645_vm6, %v1594_v28  ;;  %v2923_v46 = vld [vmem:[#allocation2 + $0x10] sm:$0xff]  ;;  %v2060_v42 = vpop.permute.xlu2 %2059 }
 0x2f7   : > { %2109 = vst.msk [vmem:[#allocation2 + $0x34] sm:$0xf] %vm2095_vm9, %v2026_v43  ;;  %2904 = vmatmul.msk.bf16.gmra.mxu0 %vm2260_vm10, %v2923_v46 }
 0x2f8   : > { %1893 = vst.msk [vmem:[#allocation2 + $0x58] sm:$0xf] %vm1870_vm8, %v1819_v8 }
 0x2fa   : > { %v2362_v29 = vpop.f32.mrf.mxu2 }
 0x2fb   : > { %v2422_v21 = vmul.f32 %v4142_v56, %v2362_v29 }
 0x2fd   : > { %v1612_v55 = vpop.permute.xlu1 %1611  ;;  %v1610_v59 = vpop.permute.xlu0 %1609  ;;  %v2458_v51 = vadd.f32 %v4148_v53, %v2422_v21 }
 0x2fe   : > { %1677 = vst.msk [vmem:[#allocation2 + $0x7c] sm:$0xf] %vm1645_vm6, %v1612_v55  ;;  %v2927_v20 = vld [vmem:[#allocation2 + $0x30] sm:$0xff]  ;;  %v1787_v36 = vpop.permute.xlu2 %1786 }
 0x2ff   : > { %1676 = vst.msk [vmem:[#allocation2 + $0x78] sm:$0xf] %vm1645_vm6, %v1610_v59  ;;  %v2490_v18 = vmax.f32 %v2458_v51, 0.0  ;;  %2908 = vmatmul.msk.bf16.gmra.mxu1 %vm2260_vm10, %v2927_v20 }
 0x300   : > { %1902 = vst.msk [vmem:[#allocation2 + $0x7c] sm:$0xf] %vm1870_vm8, %v1837_v23 }
 0x301   : > { %1877 = vst.msk [vmem:[#allocation2 + $0x18] sm:$0xf] %vm1870_vm8, %v1787_v36 }
 0x302   : > { %2523 = vst.msk [vmem:[%s4157_s22 + $0x80] sm:$0xff] %vm2506_vm11, %v2490_v18  ;;  %v2364_v49 = vpop.f32.mrf.mxu2  ;;  %v2382_v47 = vpop.f32.mrf.mxu3 }
 0x303   : > { %v2423_v32 = vmul.f32 %v4142_v56, %v2364_v49  ;;  %v2430_v35 = vmul.f32 %v4142_v56, %v2382_v47 }
 0x305   : > { %v1835_v15 = vpop.permute.xlu1 %1834  ;;  %v1821_v17 = vpop.permute.xlu0 %1820  ;;  %v2459_v61 = vadd.f32 %v4148_v53, %v2423_v32  ;;  %v2466_v52 = vadd.f32 %v4148_v53, %v2430_v35 }
 0x306   : > { %1901 = vst.msk [vmem:[#allocation2 + $0x78] sm:$0xf] %vm1870_vm8, %v1835_v15  ;;  %v1805_v50 = vpop.permute.xlu2 %1804 }
 0x307   : > { %1894 = vst.msk [vmem:[#allocation2 + $0x5c] sm:$0xf] %vm1870_vm8, %v1821_v17  ;;  %v2491_v24 = vmax.f32 %v2459_v61, 0.0  ;;  %v2498_v10 = vmax.f32 %v2466_v52, 0.0 }
 0x308   : > { %2126 = vst.msk [vmem:[#allocation2 + $0x78] sm:$0xf] %vm2095_vm9, %v2060_v42 }
 0x309   : > { %2524 = vst.msk [vmem:[%s4157_s22 + $0x88] sm:$0xff] %vm2506_vm11, %v2491_v24 }
 0x30a   : > { %2531 = vst.msk [vmem:[%s4157_s22 + $0xc0] sm:$0xff] %vm2506_vm11, %v2498_v10  ;;  %v2384_v1 = vpop.f32.mrf.mxu3 }
 0x30b   : > { %v2431_v3 = vmul.f32 %v4142_v56, %v2384_v1  ;;  %v2342_v2 = vpop.f32.mrf.mxu1 }
 0x30c   : > { %v2414_v58 = vmul.f32 %v4142_v56, %v2342_v2  ;;  %v2322_v7 = vpop.f32.mrf.mxu0 }
 0x30d   : > { %v2046_v27 = vpop.permute.xlu1 %2045  ;;  %v2044_v63 = vpop.permute.xlu0 %2043  ;;  %v2467_v12 = vadd.f32 %v4148_v53, %v2431_v3  ;;  %v2406_v26 = vmul.f32 %v4142_v56, %v2322_v7 }
 0x30e   : > { %2119 = vst.msk [vmem:[#allocation2 + $0x5c] sm:$0xf] %vm2095_vm9, %v2046_v27  ;;  %v2450_v33 = vadd.f32 %v4148_v53, %v2414_v58  ;;  %v2028_v5 = vpop.permute.xlu2 %2027 }
 0x30f   : > { %2118 = vst.msk [vmem:[#allocation2 + $0x58] sm:$0xf] %vm2095_vm9, %v2044_v63  ;;  %v2499_v41 = vmax.f32 %v2467_v12, 0.0  ;;  %v2442_v54 = vadd.f32 %v4148_v53, %v2406_v26 }
 0x310   : > { %v2482_v48 = vmax.f32 %v2450_v33, 0.0 }
 0x311   : > { %2532 = vst.msk [vmem:[%s4157_s22 + $0xc8] sm:$0xff] %vm2506_vm11, %v2499_v41  ;;  %v2474_v45 = vmax.f32 %v2442_v54, 0.0 }
 0x312   : > { %2515 = vst.msk [vmem:[%s4157_s22 + $0x40] sm:$0xff] %vm2506_vm11, %v2482_v48 }
 0x313   : > { %v2344_v62 = vpop.f32.mrf.mxu1  ;;  %2507 = vst.msk [vmem:[%s4157_s22] sm:$0xff] %vm2506_vm11, %v2474_v45 }
 0x314   : > { %v2415_v19 = vmul.f32 %v4142_v56, %v2344_v62  ;;  %v2324_v30 = vpop.f32.mrf.mxu0 }
 0x315   : > { %v1580_v57 = vpop.permute.xlu1 %1579  ;;  %v2062_v60 = vpop.permute.xlu0 %2061  ;;  %v2407_v14 = vmul.f32 %v4142_v56, %v2324_v30 }
 0x316   : > { %1661 = vst.msk [vmem:[#allocation2 + $0x3c] sm:$0xf] %vm1645_vm6, %v1580_v57  ;;  %v2932_v38 = vld [vmem:[#allocation2 + $0x58] sm:$0xff]  ;;  %v2451_v11 = vadd.f32 %v4148_v53, %v2415_v19 }
 0x317   : > { %2127 = vst.msk [vmem:[#allocation2 + $0x7c] sm:$0xf] %vm2095_vm9, %v2062_v60  ;;  %2913 = vmatmul.msk.bf16.gmra.mxu2 %vm2260_vm10, %v2932_v38  ;;  %v2443_v9 = vadd.f32 %v4148_v53, %v2407_v14 }
 0x318   : > { %1886 = vst.msk [vmem:[#allocation2 + $0x3c] sm:$0xf] %vm1870_vm8, %v1805_v50  ;;  %v2483_v0 = vmax.f32 %v2451_v11, 0.0 }
 0x319   : > { %v2475_v16 = vmax.f32 %v2443_v9, 0.0 }
 0x31a   : > { %2516 = vst.msk [vmem:[%s4157_s22 + $0x48] sm:$0xff] %vm2506_vm11, %v2483_v0 }
 0x31b   : > { %2508 = vst.msk [vmem:[%s4157_s22 + $0x8] sm:$0xff] %vm2506_vm11, %v2475_v16 }
 0x31d   : > { %v1803_v25 = vpop.permute.xlu1 %1802  ;;  %v1789_v34 = vpop.permute.xlu0 %1788 }
 0x31e   : > { %1885 = vst.msk [vmem:[#allocation2 + $0x38] sm:$0xf] %vm1870_vm8, %v1803_v25  ;;  %v2936_v39 = vld [vmem:[#allocation2 + $0x78] sm:$0xff] }
 0x31f   : > { %1878 = vst.msk [vmem:[#allocation2 + $0x1c] sm:$0xf] %vm1870_vm8, %v1789_v34  ;;  %2917 = vmatmul.msk.bf16.gmra.mxu3 %vm2260_vm10, %v2936_v39 }
 0x320   : > { %2110 = vst.msk [vmem:[#allocation2 + $0x38] sm:$0xf] %vm2095_vm9, %v2028_v5 }
 0x325   : > { %v2014_v13 = vpop.permute.xlu1 %2013  ;;  %v2012_v22 = vpop.permute.xlu0 %2011 }
 0x326   : > { %2103 = vst.msk [vmem:[#allocation2 + $0x1c] sm:$0xf] %vm2095_vm9, %v2014_v13 }
 0x327   : > { %2102 = vst.msk [vmem:[#allocation2 + $0x18] sm:$0xf] %vm2095_vm9, %v2012_v22 }
 0x32d   : > { %v2030_v40 = vpop.permute.xlu0 %2029 }
 0x32e   : > { %2111 = vst.msk [vmem:[#allocation2 + $0x3c] sm:$0xf] %vm2095_vm9, %v2030_v40  ;;  %v2924_v31 = vld [vmem:[#allocation2 + $0x18] sm:$0xff] }
 0x32f   : > { %2905 = vmatmul.msk.bf16.gmra.mxu0 %vm2260_vm10, %v2924_v31 }
 0x331   : > { %v2387_v44 = vpop.f32.mrf.mxu3 }
 0x332   : > { %v2367_v37 = vpop.f32.mrf.mxu2  ;;  %v2432_v8 = vmul.f32 %v4142_v56, %v2387_v44 }
 0x333   : > { %v2424_v4 = vmul.f32 %v4142_v56, %v2367_v37 }
 0x334   : > { %v2468_v6 = vadd.f32 %v4148_v53, %v2432_v8 }
 0x335   : > { %v2928_v23 = vld [vmem:[#allocation2 + $0x38] sm:$0xff]  ;;  %v2460_v28 = vadd.f32 %v4148_v53, %v2424_v4 }
 0x336   : > { %v2500_v43 = vmax.f32 %v2468_v6, 0.0  ;;  %2909 = vmatmul.msk.bf16.gmra.mxu1 %vm2260_vm10, %v2928_v23 }
 0x337   : > { %v2492_v46 = vmax.f32 %v2460_v28, 0.0 }
 0x338   : > { %2533 = vst.msk [vmem:[%s4157_s22 + $0xd0] sm:$0xff] %vm2506_vm11, %v2500_v43 }
 0x339   : > { %2525 = vst.msk [vmem:[%s4157_s22 + $0x90] sm:$0xff] %vm2506_vm11, %v2492_v46  ;;  %v2389_v42 = vpop.f32.mrf.mxu3 }
 0x33a   : > { %v2369_v29 = vpop.f32.mrf.mxu2  ;;  %v2433_v21 = vmul.f32 %v4142_v56, %v2389_v42 }
 0x33b   : > { %v2425_v55 = vmul.f32 %v4142_v56, %v2369_v29  ;;  %v2327_v59 = vpop.f32.mrf.mxu0 }
 0x33c   : > { %v2469_v51 = vadd.f32 %v4148_v53, %v2433_v21  ;;  %v2408_v20 = vmul.f32 %v4142_v56, %v2327_v59 }
 0x33d   : > { %v2461_v36 = vadd.f32 %v4148_v53, %v2425_v55 }
 0x33e   : > { %v2501_v18 = vmax.f32 %v2469_v51, 0.0  ;;  %v2444_v49 = vadd.f32 %v4148_v53, %v2408_v20 }
 0x33f   : > { %v2493_v47 = vmax.f32 %v2461_v36, 0.0 }
 0x340   : > { %2534 = vst.msk [vmem:[%s4157_s22 + $0xd8] sm:$0xff] %vm2506_vm11, %v2501_v18  ;;  %v2476_v32 = vmax.f32 %v2444_v49, 0.0 }
 0x341   : > { %2526 = vst.msk [vmem:[%s4157_s22 + $0x98] sm:$0xff] %vm2506_vm11, %v2493_v47 }
 0x342   : > { %2509 = vst.msk [vmem:[%s4157_s22 + $0x10] sm:$0xff] %vm2506_vm11, %v2476_v32 }
 0x343   : > { %v2329_v35 = vpop.f32.mrf.mxu0 }
 0x344   : > { %v2409_v15 = vmul.f32 %v4142_v56, %v2329_v35  ;;  %v2347_v17 = vpop.f32.mrf.mxu1 }
 0x345   : > { %v2416_v61 = vmul.f32 %v4142_v56, %v2347_v17 }
 0x346   : > { %v2445_v52 = vadd.f32 %v4148_v53, %v2409_v15 }
 0x347   : > { %v2452_v24 = vadd.f32 %v4148_v53, %v2416_v61 }
 0x348   : > { %v2477_v10 = vmax.f32 %v2445_v52, 0.0 }
 0x349   : > { %v2484_v1 = vmax.f32 %v2452_v24, 0.0 }
 0x34a   : > { %2510 = vst.msk [vmem:[%s4157_s22 + $0x18] sm:$0xff] %vm2506_vm11, %v2477_v10 }
 0x34b   : > { %2517 = vst.msk [vmem:[%s4157_s22 + $0x50] sm:$0xff] %vm2506_vm11, %v2484_v1 }
 0x34c   : > { %v2349_v3 = vpop.f32.mrf.mxu1 }
 0x34d   : > { %v2417_v2 = vmul.f32 %v4142_v56, %v2349_v3 }
 0x34f   : > { %v2453_v27 = vadd.f32 %v4148_v53, %v2417_v2 }
 0x351   : > { %v2485_v63 = vmax.f32 %v2453_v27, 0.0 }
 0x353   : > { %2518 = vst.msk [vmem:[%s4157_s22 + $0x58] sm:$0xff] %vm2506_vm11, %v2485_v63 }
 0x361   : > { %v2372_v58 = vpop.f32.mrf.mxu2 }
 0x362   : > { %v2426_v12 = vmul.f32 %v4142_v56, %v2372_v58 }
 0x364   : > { %v2462_v7 = vadd.f32 %v4148_v53, %v2426_v12 }
 0x366   : > { %v2494_v26 = vmax.f32 %v2462_v7, 0.0 }
 0x368   : > { %2527 = vst.msk [vmem:[%s4157_s22 + $0xa0] sm:$0xff] %vm2506_vm11, %v2494_v26 }
 0x369   : > { %v2374_v33 = vpop.f32.mrf.mxu2 }
 0x36a   : > { %v2427_v41 = vmul.f32 %v4142_v56, %v2374_v33  ;;  %v2392_v54 = vpop.f32.mrf.mxu3 }
 0x36b   : > { %v2434_v48 = vmul.f32 %v4142_v56, %v2392_v54 }
 0x36c   : > { %v2463_v50 = vadd.f32 %v4148_v53, %v2427_v41 }
 0x36d   : > { %v2470_v45 = vadd.f32 %v4148_v53, %v2434_v48 }
 0x36e   : > { %v2495_v62 = vmax.f32 %v2463_v50, 0.0 }
 0x36f   : > { %v2502_v57 = vmax.f32 %v2470_v45, 0.0 }
 0x370   : > { %2528 = vst.msk [vmem:[%s4157_s22 + $0xa8] sm:$0xff] %vm2506_vm11, %v2495_v62 }
 0x371   : > { %2535 = vst.msk [vmem:[%s4157_s22 + $0xe0] sm:$0xff] %vm2506_vm11, %v2502_v57 }
 0x372   : > { %v2394_v60 = vpop.f32.mrf.mxu3 }
 0x373   : > { %v2435_v19 = vmul.f32 %v4142_v56, %v2394_v60 }
 0x374   : > { %v2332_v30 = vpop.f32.mrf.mxu0 }
 0x375   : > { %v2471_v38 = vadd.f32 %v4148_v53, %v2435_v19  ;;  %v2410_v14 = vmul.f32 %v4142_v56, %v2332_v30 }
 0x377   : > { %v2503_v11 = vmax.f32 %v2471_v38, 0.0  ;;  %v2446_v9 = vadd.f32 %v4148_v53, %v2410_v14 }
 0x379   : > { %2536 = vst.msk [vmem:[%s4157_s22 + $0xe8] sm:$0xff] %vm2506_vm11, %v2503_v11  ;;  %v2478_v0 = vmax.f32 %v2446_v9, 0.0 }
 0x37b   : > { %2511 = vst.msk [vmem:[%s4157_s22 + $0x20] sm:$0xff] %vm2506_vm11, %v2478_v0 }
 0x37c   : > { %v2334_v16 = vpop.f32.mrf.mxu0  ;;  %v2352_v5 = vpop.f32.mrf.mxu1 }
 0x37d   : > { %v2411_v25 = vmul.f32 %v4142_v56, %v2334_v16  ;;  %v2418_v34 = vmul.f32 %v4142_v56, %v2352_v5 }
 0x37f   : > { %v2447_v39 = vadd.f32 %v4148_v53, %v2411_v25  ;;  %v2454_v13 = vadd.f32 %v4148_v53, %v2418_v34 }
 0x381   : > { %v2479_v22 = vmax.f32 %v2447_v39, 0.0  ;;  %v2486_v40 = vmax.f32 %v2454_v13, 0.0 }
 0x383   : > { %2512 = vst.msk [vmem:[%s4157_s22 + $0x28] sm:$0xff] %vm2506_vm11, %v2479_v22 }
 0x384   : > { %2519 = vst.msk [vmem:[%s4157_s22 + $0x60] sm:$0xff] %vm2506_vm11, %v2486_v40  ;;  %v2354_v31 = vpop.f32.mrf.mxu1 }
 0x385   : > { %v2419_v44 = vmul.f32 %v4142_v56, %v2354_v31 }
 0x387   : > { %v2455_v37 = vadd.f32 %v4148_v53, %v2419_v44 }
 0x389   : > { %v2487_v8 = vmax.f32 %v2455_v37, 0.0 }
 0x38b   : > { %2520 = vst.msk [vmem:[%s4157_s22 + $0x68] sm:$0xff] %vm2506_vm11, %v2487_v8 }
 0x39a   : > { %v2377_v4 = vpop.f32.mrf.mxu2 }
 0x39b   : > { %v2428_v6 = vmul.f32 %v4142_v56, %v2377_v4 }
 0x39d   : > { %v2464_v23 = vadd.f32 %v4148_v53, %v2428_v6 }
 0x39f   : > { %v2496_v28 = vmax.f32 %v2464_v23, 0.0 }
 0x3a1   : > { %2529 = vst.msk [vmem:[%s4157_s22 + $0xb0] sm:$0xff] %vm2506_vm11, %v2496_v28 }
 0x3a2   : > { %v2379_v43 = vpop.f32.mrf.mxu2  ;;  %v2397_v46 = vpop.f32.mrf.mxu3 }
 0x3a3   : > { %v2429_v42 = vmul.f32 %v4142_v56, %v2379_v43  ;;  %v2436_v29 = vmul.f32 %v4142_v56, %v2397_v46 }
 0x3a5   : > { %v2465_v21 = vadd.f32 %v4148_v53, %v2429_v42  ;;  %v2472_v55 = vadd.f32 %v4148_v53, %v2436_v29 }
 0x3a7   : > { %v2497_v59 = vmax.f32 %v2465_v21, 0.0  ;;  %v2504_v51 = vmax.f32 %v2472_v55, 0.0 }
 0x3a9   : > { %2530 = vst.msk [vmem:[%s4157_s22 + $0xb8] sm:$0xff] %vm2506_vm11, %v2497_v59 }
 0x3aa   : > { %2537 = vst.msk [vmem:[%s4157_s22 + $0xf0] sm:$0xff] %vm2506_vm11, %v2504_v51  ;;  %v2399_v20 = vpop.f32.mrf.mxu3 }
 0x3ab   : > { %v2437_v36 = vmul.f32 %v4142_v56, %v2399_v20 }
 0x3ac   : > { %v2337_v18 = vpop.f32.mrf.mxu0 }
 0x3ad   : > { %v2473_v49 = vadd.f32 %v4148_v53, %v2437_v36  ;;  %v2412_v47 = vmul.f32 %v4142_v56, %v2337_v18 }
 0x3af   : > { %v2505_v32 = vmax.f32 %v2473_v49, 0.0  ;;  %v2448_v35 = vadd.f32 %v4148_v53, %v2412_v47 }
 0x3b1   : > { %2538 = vst.msk [vmem:[%s4157_s22 + $0xf8] sm:$0xff] %vm2506_vm11, %v2505_v32  ;;  %v2480_v15 = vmax.f32 %v2448_v35, 0.0 }
 0x3b3   : > { %2513 = vst.msk [vmem:[%s4157_s22 + $0x30] sm:$0xff] %vm2506_vm11, %v2480_v15  ;;  %v2357_v17 = vpop.f32.mrf.mxu1 }
 0x3b4   : > { %v2339_v61 = vpop.f32.mrf.mxu0  ;;  %v2420_v52 = vmul.f32 %v4142_v56, %v2357_v17 }
 0x3b5   : > { %v2413_v24 = vmul.f32 %v4142_v56, %v2339_v61 }
 0x3b6   : > { %v2456_v10 = vadd.f32 %v4148_v53, %v2420_v52 }
 0x3b7   : > { %v2449_v1 = vadd.f32 %v4148_v53, %v2413_v24 }
 0x3b8   : > { %v2488_v3 = vmax.f32 %v2456_v10, 0.0 }
 0x3b9   : > { %v2481_v2 = vmax.f32 %v2449_v1, 0.0 }
 0x3ba   : > { %2521 = vst.msk [vmem:[%s4157_s22 + $0x70] sm:$0xff] %vm2506_vm11, %v2488_v3 }
 0x3bb   : > { %2514 = vst.msk [vmem:[%s4157_s22 + $0x38] sm:$0xff] %vm2506_vm11, %v2481_v2  ;;  %v2359_v27 = vpop.f32.mrf.mxu1 }
 0x3bc   : > { %v2421_v63 = vmul.f32 %v4142_v56, %v2359_v27 }
 0x3be   : > { %v2457_v58 = vadd.f32 %v4148_v53, %v2421_v63 }
 0x3c0   : > { %v2489_v12 = vmax.f32 %v2457_v58, 0.0 }
 0x3c2   : > { %2522 = vst.msk [vmem:[%s4157_s22 + $0x78] sm:$0xff] %vm2506_vm11, %v2489_v12 }
 0x3c3 PF: > { %s14_s17 = sadd.s32 1, %s3005_s17   ;;  %s4321_s15 = smov %s3001_s16 }
 0x3c4   : > { %p11_p5 = scmp.ge.s32.totalorder %s14_s17, 4   ;;  %s4322_s16 = smov %s4324_s18 }
 0x3c6   :  { %13 = sbr.rel (!%p11_p5) target bundleno = 2 (0x2), region = 69 }

</bundles_post_ra>
